<compile_context>
chip_gen: v7x
topology: tpu7x:2x2x1
jax: 0.10.0
libtpu: 0.0.40
codegen_flags: <defaults>
</compile_context>

<pallas_src>
import functools
import math

import jax
import jax.numpy as jnp
from jax.experimental import pallas as pl
from jax.experimental.pallas import tpu as pltpu

BN_EPS = 1e-5
STAT_ROWS = 8            # sublane-aligned stats block


@functools.lru_cache(maxsize=None)
def _vmem_limit_bytes():
    """Generation-aware scoped-VMEM limit: ~3/4 of physical, capped at 96 MiB."""
    phys = 64 * 1024 * 1024                      # conservative fallback (v7x)
    try:
        phys = int(pltpu.get_tpu_info().vmem_capacity_bytes)
    except Exception:
        pass
    return max(32 * 1024 * 1024, min(96 * 1024 * 1024, (phys * 3) // 4))


def _cparams(n_axes):
    return pltpu.CompilerParams(
        dimension_semantics=("parallel",) * n_axes,
        vmem_limit_bytes=_vmem_limit_bytes())


def _pick_tile(n, target):
    """Largest multiple-of-8 divisor of n that is <= target (or n itself)."""
    if n <= target:
        return n
    t = (target // 8) * 8
    while t >= 8:
        if n % t == 0:
            return t
        t -= 8
    return n


def _pick_row_tile(h, w, target_rows=1024):
    """Row-tile height th: divides h, th*w sublane-aligned, th*w <= target."""
    cands = [t for t in range(1, h + 1) if h % t == 0 and (t * w) % 8 == 0]
    if not cands:
        return h
    small = [t for t in cands if t * w <= target_rows]
    return max(small) if small else min(cands)


def _silu(u):
    # exp() rides the EUP; approx reciprocal keeps the divide off the VALU.
    return u * pl.reciprocal(1.0 + jnp.exp(-u), approx=True)


# ------------------------------ pass-1 kernels -------------------------------

def _dual_gemm_stats_kernel(x_ref, w_ref, y1_ref, y2_ref, st_ref, *, c2):
    """cv1 & cv2 (1x1 convs of the same input) as ONE wide bf16 GEMM on an M
    tile (weights concatenated along N), plus merged BN partial statistics."""
    acc = jnp.dot(x_ref[...], w_ref[...],
                  preferred_element_type=jnp.float32)          # (tm, 2*c2) f32
    y1_ref[...] = acc[:, :c2].astype(y1_ref.dtype)
    y2_ref[...] = acc[:, c2:].astype(y2_ref.dtype)
    # rows 0/1 = sum / sumsq over the M tile; rows 2..7 intentionally unwritten.
    st_ref[0:1, :] = jnp.sum(acc, axis=0, keepdims=True)
    st_ref[1:2, :] = jnp.sum(acc * acc, axis=0, keepdims=True)


def _repconv_pass1_kernel(zm_ref, zt_ref, zb_ref, w3_ref, w1_ref,
                          y3_ref, yp_ref, st_ref, xpad_ref, *, TH, W, C):
    """RepConv pass 1 on one spatial row-tile:
       - assemble the 1-px padded tile in VMEM from main + 2 halo rows,
       - build the (TH*W, 9C) im2col tile once and run ONE K=9C bf16 GEMM,
       - run the 1x1 branch GEMM on the unpadded tile,
       - emit bf16 outputs + merged per-tile BN partial statistics."""
    i = pl.program_id(1)
    last = pl.num_programs(1) - 1

    body = zm_ref[0]                                   # (TH, W, C) bf16
    top = zt_ref[0, 0]                                 # (W, C)
    bot = zb_ref[0, 0]
    top = jnp.where(i == 0, jnp.zeros_like(top), top)     # image top border
    bot = jnp.where(i == last, jnp.zeros_like(bot), bot)  # image bottom border

    # Spatially padded tile in VMEM scratch (no HBM pad copy).
    xpad_ref[...] = jnp.zeros(xpad_ref.shape, xpad_ref.dtype)
    xpad_ref[0:1, 1:W + 1, :] = top[None]
    xpad_ref[1:TH + 1, 1:W + 1, :] = body
    xpad_ref[TH + 1:TH + 2, 1:W + 1, :] = bot[None]

    # im2col: concat the 9 shifted windows along channels -> one K=9C GEMM.
    parts = [xpad_ref[dy:dy + TH, dx:dx + W, :]
             for dy in range(3) for dx in range(3)]
    x9 = jnp.concatenate(parts, axis=2).reshape(TH * W, 9 * C)

    acc3 = jnp.dot(x9, w3_ref[...], preferred_element_type=jnp.float32)
    acc1 = jnp.dot(body.reshape(TH * W, C), w1_ref[...],
                   preferred_element_type=jnp.float32)

    y3_ref[...] = acc3.astype(y3_ref.dtype)
    yp_ref[...] = acc1.astype(yp_ref.dtype)
    # rows 0/1: 3x3 branch, rows 2/3: 1x1 branch; rows 4..7 unwritten.
    st_ref[0:1, :] = jnp.sum(acc3, axis=0, keepdims=True)
    st_ref[1:2, :] = jnp.sum(acc3 * acc3, axis=0, keepdims=True)
    st_ref[2:3, :] = jnp.sum(acc1, axis=0, keepdims=True)
    st_ref[3:4, :] = jnp.sum(acc1 * acc1, axis=0, keepdims=True)


# ------------------------------ pass-2 kernels -------------------------------
# Fused BN-apply (+SiLU, +branch add, +residual add) on lane-dense views.

def _bn_silu_kernel(y_ref, sc_ref, sh_ref, o_ref):
    u = y_ref[...].astype(jnp.float32) * sc_ref[...] + sh_ref[...]
    o_ref[...] = _silu(u).astype(o_ref.dtype)


def _rep_combine_kernel(y3_ref, yp_ref, sc3_ref, sh3_ref, scp_ref, shp_ref, o_ref):
    u = (y3_ref[...].astype(jnp.float32) * sc3_ref[...] + sh3_ref[...]) + \
        (yp_ref[...].astype(jnp.float32) * scp_ref[...] + shp_ref[...])
    o_ref[...] = _silu(u).astype(o_ref.dtype)


def _rep_combine_residual_kernel(y3_ref, yp_ref, yr_ref,
                                 sc3_ref, sh3_ref, scp_ref, shp_ref,
                                 scr_ref, shr_ref, o_ref):
    u = (y3_ref[...].astype(jnp.float32) * sc3_ref[...] + sh3_ref[...]) + \
        (yp_ref[...].astype(jnp.float32) * scp_ref[...] + shp_ref[...])
    v = yr_ref[...].astype(jnp.float32) * scr_ref[...] + shr_ref[...]
    o_ref[...] = (_silu(u) + _silu(v)).astype(o_ref.dtype)


# ------------------------------ wrappers --------------------------------------

def _dual_gemm_stats(x2d, wcat, c2):
    m, c1 = x2d.shape
    tm = _pick_tile(m, min(1024, max(256, m // 8)))
    nt = m // tm
    y1, y2, st = pl.pallas_call(
        functools.partial(_dual_gemm_stats_kernel, c2=c2),
        grid=(nt,),
        in_specs=[
            pl.BlockSpec((tm, c1), lambda i: (i, 0)),
            pl.BlockSpec((c1, 2 * c2), lambda i: (0, 0)),
        ],
        out_specs=[
            pl.BlockSpec((tm, c2), lambda i: (i, 0)),
            pl.BlockSpec((tm, c2), lambda i: (i, 0)),
            pl.BlockSpec((STAT_ROWS, 2 * c2), lambda i: (i, 0)),
        ],
        out_shape=[
            jax.ShapeDtypeStruct((m, c2), jnp.bfloat16),
            jax.ShapeDtypeStruct((m, c2), jnp.bfloat16),
            jax.ShapeDtypeStruct((nt * STAT_ROWS, 2 * c2), jnp.float32),
        ],
        compiler_params=_cparams(1),
    )(x2d, wcat)
    return y1, y2, st.reshape(nt, STAT_ROWS, 2 * c2)


def _repconv_pass1(z2d, w3cat, w1, n, h, w):
    c = z2d.shape[1]
    co = w3cat.shape[1]
    m = n * h * w
    z4 = z2d.reshape(n, h, w, c)                        # free metadata reshape
    th = _pick_row_tile(h, w)
    nrt = h // th
    kern = functools.partial(_repconv_pass1_kernel, TH=th, W=w, C=c)

    y3, yp, st = pl.pallas_call(
        kern,
        grid=(n, nrt),
        in_specs=[
            pl.BlockSpec((1, th, w, c), lambda b, i: (b, i, 0, 0)),
            pl.BlockSpec((1, 1, w, c),
                         lambda b, i: (b, jnp.maximum(i * th - 1, 0), 0, 0)),
            pl.BlockSpec((1, 1, w, c),
                         lambda b, i: (b, jnp.minimum((i + 1) * th, h - 1), 0, 0)),
            pl.BlockSpec((9 * c, co), lambda b, i: (0, 0)),
            pl.BlockSpec((c, co), lambda b, i: (0, 0)),
        ],
        out_specs=[
            pl.BlockSpec((th * w, co), lambda b, i: (b * nrt + i, 0)),
            pl.BlockSpec((th * w, co), lambda b, i: (b * nrt + i, 0)),
            pl.BlockSpec((STAT_ROWS, co), lambda b, i: (b * nrt + i, 0)),
        ],
        out_shape=[
            jax.ShapeDtypeStruct((m, co), jnp.bfloat16),
            jax.ShapeDtypeStruct((m, co), jnp.bfloat16),
            jax.ShapeDtypeStruct((n * nrt * STAT_ROWS, co), jnp.float32),
        ],
        scratch_shapes=[pltpu.VMEM((th + 2, w + 2, c), jnp.bfloat16)],
        compiler_params=_cparams(2),
    )(z4, z4, z4, w3cat, w1)
    return y3, yp, st.reshape(n * nrt, STAT_ROWS, co)


def _bn_scale_shift(total, total_sq, m, gamma, beta):
    """Per-channel train-mode BN scale/shift from sum / sum-of-squares."""
    mean = total / m
    # NOTE: E[x^2]-E[x]^2 in f32 can cancel for very large M / large means.
    var = jnp.maximum(total_sq / m - mean * mean, 0.0)   # biased (train) variance
    scale = gamma * jax.lax.rsqrt(var + BN_EPS)
    shift = beta - mean * scale
    return scale, shift


def _ew_layout(m, c):
    """Free lane-dense re-view of a row-major (m, c) array as (rows, 128)."""
    if c <= 128 and 128 % c == 0 and (m * c) % 128 == 0:
        return (m * c) // 128, 128, 128 // c
    return m, c, 1


def _ew_call(kernel, arrays, params, out_dtype):
    m, c = arrays[0].shape
    rows, lanes, rep = _ew_layout(m, c)
    vs = [a.reshape(rows, lanes) for a in arrays]
    ps = [jnp.tile(p.astype(jnp.float32), rep).reshape(1, lanes) for p in params]
    tr = _pick_tile(rows, min(1024, max(512, rows // 8)))
    out = pl.pallas_call(
        kernel,
        grid=(rows // tr,),
        in_specs=[pl.BlockSpec((tr, lanes), lambda i: (i, 0)) for _ in vs]
                + [pl.BlockSpec((1, lanes), lambda i: (0, 0)) for _ in ps],
        out_specs=pl.BlockSpec((tr, lanes), lambda i: (i, 0)),
        out_shape=jax.ShapeDtypeStruct((rows, lanes), out_dtype),
        compiler_params=_cparams(1),
    )(*vs, *ps)
    return out.reshape(m, c)


# ------------------------------ params & forward ------------------------------

def _init_conv_bn(key, cin, cout, k):
    kw, kg, kb = jax.random.split(key, 3)
    w = jax.random.normal(kw, (k, k, cin, cout), jnp.float32) / math.sqrt(cin * k * k)
    gamma = 1.0 + 0.1 * jax.random.normal(kg, (cout,), jnp.float32)
    beta = 0.1 * jax.random.normal(kb, (cout,), jnp.float32)
    return {"w": w, "gamma": gamma, "beta": beta}


def init_repc3(key, c1, c2, n=3, e=1.0):
    c_ = int(c2 * e)
    # cv3 is nn.Identity when c_ == c2 (the only self-consistent RepC3 config).
    assert c_ == c2, "RepC3 implemented for e=1.0 (cv3 = Identity)"
    assert n >= 1
    keys = jax.random.split(key, 2 + 2 * n)
    blocks = [{"conv1": _init_conv_bn(keys[2 + 2 * i], c_, c_, 3),
               "conv2": _init_conv_bn(keys[3 + 2 * i], c_, c_, 1)} for i in range(n)]
    return {"cv1": _init_conv_bn(keys[0], c1, c2, 1),
            "cv2": _init_conv_bn(keys[1], c1, c2, 1),
            "m": blocks}


def repc3_forward(x_nchw, params):
    """RepC3.forward: cv3(m(cv1(x)) + cv2(x)) with cv3 = Identity (e=1.0);
    Conv = conv(bias=False) + BatchNorm(train-mode batch stats) + SiLU;
    RepConv = SiLU(BN(conv3x3(x)) + BN(conv1x1(x)))."""
    x = jnp.transpose(x_nchw, (0, 2, 3, 1))                    # NCHW -> NHWC
    n, h, w, c1 = x.shape
    m = n * h * w
    x2d = x.reshape(m, c1).astype(jnp.bfloat16)

    cv1, cv2 = params["cv1"], params["cv2"]
    w1 = cv1["w"].reshape(c1, -1)
    w2 = cv2["w"].reshape(c1, -1)
    c2 = w1.shape[1]
    wcat = jnp.concatenate([w1, w2], axis=1).astype(jnp.bfloat16)

    # pass 1 for cv1 & cv2 (one wide bf16 GEMM) with merged BN partial stats.
    y1, y2, s12 = _dual_gemm_stats(x2d, wcat, c2)
    sc1, sh1 = _bn_scale_shift(jnp.sum(s12[:, 0, :c2], 0), jnp.sum(s12[:, 1, :c2], 0),
                               m, cv1["gamma"], cv1["beta"])
    sc2, sh2 = _bn_scale_shift(jnp.sum(s12[:, 0, c2:], 0), jnp.sum(s12[:, 1, c2:], 0),
                               m, cv2["gamma"], cv2["beta"])

    # cv1 epilogue feeds the RepConv chain; cv2's BN+SiLU is deferred and fused
    # into the final residual-add kernel.
    z = _ew_call(_bn_silu_kernel, [y1], [sc1, sh1], jnp.bfloat16)

    nrep = len(params["m"])
    out = None
    for i, rp in enumerate(params["m"]):
        w3 = rp["conv1"]["w"].reshape(9 * c2, c2).astype(jnp.bfloat16)   # K=9C
        wp = rp["conv2"]["w"].reshape(c2, c2).astype(jnp.bfloat16)       # 1x1
        y3, yp, s3p = _repconv_pass1(z, w3, wp, n, h, w)
        sc3, sh3 = _bn_scale_shift(jnp.sum(s3p[:, 0, :], 0), jnp.sum(s3p[:, 1, :], 0),
                                   m, rp["conv1"]["gamma"], rp["conv1"]["beta"])
        scp, shp = _bn_scale_shift(jnp.sum(s3p[:, 2, :], 0), jnp.sum(s3p[:, 3, :], 0),
                                   m, rp["conv2"]["gamma"], rp["conv2"]["beta"])
        if i < nrep - 1:
            z = _ew_call(_rep_combine_kernel, [y3, yp],
                         [sc3, sh3, scp, shp], jnp.bfloat16)
        else:
            # fuse RepC3's residual:  m(cv1(x)) + SiLU(BN(cv2(x)))
            out = _ew_call(_rep_combine_residual_kernel, [y3, yp, y2],
                           [sc3, sh3, scp, shp, sc2, sh2], jnp.float32)

    return jnp.transpose(out.reshape(n, h, w, c2), (0, 3, 1, 2))  # NHWC -> NCHW


# ------------------------------ demo -------------------------------------------

if __name__ == "__main__":
    key = jax.random.PRNGKey(0)
    kx, kp_a, kp_b = jax.random.split(key, 3)
    x = jax.random.normal(kx, (2, 4, 16, 16), jnp.float32)      # NCHW, like PyTorch

    # RepC3(c1=4, c2=8, n=3, e=1.0)
    params_a = init_repc3(kp_a, c1=4, c2=8, n=3, e=1.0)
    ya = jax.block_until_ready(jax.jit(repc3_forward)(x, params_a))
    assert ya.shape == (2, 8, 16, 16), ya.shape
    assert bool(jnp.all(jnp.isfinite(ya)))

    # RepC3(c1=4, c2=4, n=2, e=1.0)
    params_b = init_repc3(kp_b, c1=4, c2=4, n=2, e=1.0)
    yb = jax.block_until_ready(jax.jit(repc3_forward)(x, params_b))
    assert yb.shape == (2, 4, 16, 16), yb.shape
    assert bool(jnp.all(jnp.isfinite(yb)))

    print("KERNEL_OK")
</pallas_src>

<mosaic_0001>
module attributes {stable_mosaic.version = 11 : i64} {
  func.func @_dual_gemm_stats_kernel(%arg0: i32, %arg1: memref<256x4xbf16, #tpu.memory_space<vmem>>, %arg2: memref<4x16xbf16, #tpu.memory_space<vmem>>, %arg3: memref<256x8xbf16, #tpu.memory_space<vmem>>, %arg4: memref<256x8xbf16, #tpu.memory_space<vmem>>, %arg5: memref<8x16xf32, #tpu.memory_space<vmem>>) attributes {dimension_semantics = [#tpu.dimension_semantics<parallel>], iteration_bounds = array<i64: 2>, scalar_prefetch = 0 : i64, scratch_operands = 0 : i64, tpu.core_type = #tpu.core_type<tc>, window_params = [{transform_indices = @transform_0, window_bounds = array<i64: 256, 4>}, {pipeline_mode = #tpu.pipeline_mode<synchronous>, transform_indices = @transform_1, window_bounds = array<i64: 4, 16>}, {transform_indices = @transform_2, window_bounds = array<i64: 256, 8>}, {transform_indices = @transform_3, window_bounds = array<i64: 256, 8>}, {transform_indices = @transform_4, window_bounds = array<i64: 8, 16>}]} {
    %c0 = arith.constant 0 : index
    %c0_0 = arith.constant 0 : index
    %0 = vector.load %arg1[%c0, %c0_0] : memref<256x4xbf16, #tpu.memory_space<vmem>>, vector<256x4xbf16>
    %c0_1 = arith.constant 0 : index
    %c0_2 = arith.constant 0 : index
    %1 = vector.load %arg2[%c0_1, %c0_2] : memref<4x16xbf16, #tpu.memory_space<vmem>>, vector<4x16xbf16>
    %cst = arith.constant dense<0.000000e+00> : vector<256x16xf32>
    %2 = tpu.matmul %0, %1, %cst {dimension_numbers = #tpu.dot_dimension_numbers<[1], [0], [0], [1], [0, 0, 1, 1], [], []>} : vector<256x4xbf16>, vector<4x16xbf16>, vector<256x16xf32> -> vector<256x16xf32>
    %3 = vector.extract_strided_slice %2 {offsets = [0, 0], sizes = [256, 8], strides = [1, 1]} : vector<256x16xf32> to vector<256x8xf32>
    %4 = arith.truncf %3 : vector<256x8xf32> to vector<256x8xbf16>
    %c0_3 = arith.constant 0 : index
    %c0_4 = arith.constant 0 : index
    %5 = vector.load %arg3[%c0_3, %c0_4] : memref<256x8xbf16, #tpu.memory_space<vmem>>, vector<256x8xbf16>
    tpu.vector_store %arg3[%c0_3, %c0_4], %4 {strides = array<i32>} : memref<256x8xbf16, #tpu.memory_space<vmem>>, vector<256x8xbf16>,
    %6 = vector.extract_strided_slice %2 {offsets = [0, 8], sizes = [256, 8], strides = [1, 1]} : vector<256x16xf32> to vector<256x8xf32>
    %7 = arith.truncf %6 : vector<256x8xf32> to vector<256x8xbf16>
    %c0_5 = arith.constant 0 : index
    %c0_6 = arith.constant 0 : index
    %8 = vector.load %arg4[%c0_5, %c0_6] : memref<256x8xbf16, #tpu.memory_space<vmem>>, vector<256x8xbf16>
    tpu.vector_store %arg4[%c0_5, %c0_6], %7 {strides = array<i32>} : memref<256x8xbf16, #tpu.memory_space<vmem>>, vector<256x8xbf16>,
    %cst_7 = arith.constant dense<0.000000e+00> : vector<16xf32>
    %9 = vector.multi_reduction <add>, %2, %cst_7 [0] : vector<256x16xf32> to vector<16xf32>
    %10 = vector.shape_cast %9 : vector<16xf32> to vector<1x16xf32>
    %c0_8 = arith.constant 0 : index
    %c0_9 = arith.constant 0 : index
    %11 = vector.load %arg5[%c0_8, %c0_9] : memref<8x16xf32, #tpu.memory_space<vmem>>, vector<1x16xf32>
    tpu.vector_store %arg5[%c0_8, %c0_9], %10 {strides = array<i32>} : memref<8x16xf32, #tpu.memory_space<vmem>>, vector<1x16xf32>,
    %12 = arith.mulf %2, %2 : vector<256x16xf32>
    %cst_10 = arith.constant dense<0.000000e+00> : vector<16xf32>
    %13 = vector.multi_reduction <add>, %12, %cst_10 [0] : vector<256x16xf32> to vector<16xf32>
    %14 = vector.shape_cast %13 : vector<16xf32> to vector<1x16xf32>
    %c1 = arith.constant 1 : index
    %c0_11 = arith.constant 0 : index
    %15 = vector.load %arg5[%c1, %c0_11] : memref<8x16xf32, #tpu.memory_space<vmem>>, vector<1x16xf32>
    tpu.vector_store %arg5[%c1, %c0_11], %14 {strides = array<i32>} : memref<8x16xf32, #tpu.memory_space<vmem>>, vector<1x16xf32>,
    return
  }
  func.func @transform_0(%arg0: i32) -> (i32, i32) {
    %c0_i32 = arith.constant 0 : i32
    %c0_i32_0 = arith.constant 0 : i32
    return %arg0, %c0_i32 : i32, i32
  }
  func.func @transform_1(%arg0: i32) -> (i32, i32) {
    %c0_i32 = arith.constant 0 : i32
    %c0_i32_0 = arith.constant 0 : i32
    %c0_i32_1 = arith.constant 0 : i32
    return %c0_i32, %c0_i32_0 : i32, i32
  }
  func.func @transform_2(%arg0: i32) -> (i32, i32) {
    %c0_i32 = arith.constant 0 : i32
    %c0_i32_0 = arith.constant 0 : i32
    return %arg0, %c0_i32 : i32, i32
  }
  func.func @transform_3(%arg0: i32) -> (i32, i32) {
    %c0_i32 = arith.constant 0 : i32
    %c0_i32_0 = arith.constant 0 : i32
    return %arg0, %c0_i32 : i32, i32
  }
  func.func @transform_4(%arg0: i32) -> (i32, i32) {
    %c0_i32 = arith.constant 0 : i32
    %c0_i32_0 = arith.constant 0 : i32
    return %arg0, %c0_i32 : i32, i32
  }
}

module attributes {stable_mosaic.version = 11 : i64} {
  func.func @_bn_silu_kernel(%arg0: i32, %arg1: memref<32x128xbf16, #tpu.memory_space<vmem>>, %arg2: memref<1x128xf32, #tpu.memory_space<vmem>>, %arg3: memref<1x128xf32, #tpu.memory_space<vmem>>, %arg4: memref<32x128xbf16, #tpu.memory_space<vmem>>) attributes {dimension_semantics = [#tpu.dimension_semantics<parallel>], iteration_bounds = array<i64: 1>, scalar_prefetch = 0 : i64, scratch_operands = 0 : i64, tpu.core_type = #tpu.core_type<tc>, window_params = [{transform_indices = @transform_0, window_bounds = array<i64: 32, 128>}, {pipeline_mode = #tpu.pipeline_mode<synchronous>, transform_indices = @transform_1, window_bounds = array<i64: 1, 128>}, {pipeline_mode = #tpu.pipeline_mode<synchronous>, transform_indices = @transform_2, window_bounds = array<i64: 1, 128>}, {transform_indices = @transform_3, window_bounds = array<i64: 32, 128>}]} {
    %c0 = arith.constant 0 : index
    %c0_0 = arith.constant 0 : index
    %0 = vector.load %arg1[%c0, %c0_0] : memref<32x128xbf16, #tpu.memory_space<vmem>>, vector<32x128xbf16>
    %1 = arith.extf %0 : vector<32x128xbf16> to vector<32x128xf32>
    %c0_1 = arith.constant 0 : index
    %c0_2 = arith.constant 0 : index
    %2 = vector.load %arg2[%c0_1, %c0_2] : memref<1x128xf32, #tpu.memory_space<vmem>>, vector<1x128xf32>
    %3 = vector.broadcast %2 : vector<1x128xf32> to vector<32x128xf32>
    %4 = arith.mulf %1, %3 : vector<32x128xf32>
    %c0_3 = arith.constant 0 : index
    %c0_4 = arith.constant 0 : index
    %5 = vector.load %arg3[%c0_3, %c0_4] : memref<1x128xf32, #tpu.memory_space<vmem>>, vector<1x128xf32>
    %6 = vector.broadcast %5 : vector<1x128xf32> to vector<32x128xf32>
    %7 = arith.addf %4, %6 : vector<32x128xf32>
    %cst = arith.constant 0.000000e+00 : f32
    %8 = vector.broadcast %cst : f32 to vector<32x128xf32>
    %9 = arith.subf %8, %7 : vector<32x128xf32>
    %10 = math.exp %9 : vector<32x128xf32>
    %cst_5 = arith.constant 1.000000e+00 : f32
    %11 = vector.broadcast %cst_5 : f32 to vector<32x128xf32>
    %12 = arith.addf %11, %10 : vector<32x128xf32>
    %13 = tpu.reciprocal %12 {approx = true} : vector<32x128xf32> -> vector<32x128xf32>
    %14 = arith.mulf %7, %13 : vector<32x128xf32>
    %15 = arith.truncf %14 : vector<32x128xf32> to vector<32x128xbf16>
    %c0_6 = arith.constant 0 : index
    %c0_7 = arith.constant 0 : index
    %16 = vector.load %arg4[%c0_6, %c0_7] : memref<32x128xbf16, #tpu.memory_space<vmem>>, vector<32x128xbf16>
    tpu.vector_store %arg4[%c0_6, %c0_7], %15 {strides = array<i32>} : memref<32x128xbf16, #tpu.memory_space<vmem>>, vector<32x128xbf16>,
    return
  }
  func.func @transform_0(%arg0: i32) -> (i32, i32) {
    %c0_i32 = arith.constant 0 : i32
    %c0_i32_0 = arith.constant 0 : i32
    return %arg0, %c0_i32 : i32, i32
  }
  func.func @transform_1(%arg0: i32) -> (i32, i32) {
    %c0_i32 = arith.constant 0 : i32
    %c0_i32_0 = arith.constant 0 : i32
    %c0_i32_1 = arith.constant 0 : i32
    return %c0_i32, %c0_i32_0 : i32, i32
  }
  func.func @transform_2(%arg0: i32) -> (i32, i32) {
    %c0_i32 = arith.constant 0 : i32
    %c0_i32_0 = arith.constant 0 : i32
    %c0_i32_1 = arith.constant 0 : i32
    return %c0_i32, %c0_i32_0 : i32, i32
  }
  func.func @transform_3(%arg0: i32) -> (i32, i32) {
    %c0_i32 = arith.constant 0 : i32
    %c0_i32_0 = arith.constant 0 : i32
    return %arg0, %c0_i32 : i32, i32
  }
}

module attributes {stable_mosaic.version = 11 : i64} {
  func.func @_repconv_pass1_kernel(%arg0: i32, %arg1: i32, %arg2: memref<1x16x16x8xbf16, #tpu.memory_space<vmem>>, %arg3: memref<1x1x16x8xbf16, #tpu.memory_space<vmem>>, %arg4: memref<1x1x16x8xbf16, #tpu.memory_space<vmem>>, %arg5: memref<72x8xbf16, #tpu.memory_space<vmem>>, %arg6: memref<8x8xbf16, #tpu.memory_space<vmem>>, %arg7: memref<256x8xbf16, #tpu.memory_space<vmem>>, %arg8: memref<256x8xbf16, #tpu.memory_space<vmem>>, %arg9: memref<8x8xf32, #tpu.memory_space<vmem>>, %arg10: memref<18x18x8xbf16, #tpu.memory_space<vmem>>) attributes {dimension_semantics = [#tpu.dimension_semantics<parallel>, #tpu.dimension_semantics<parallel>], iteration_bounds = array<i64: 2, 1>, scalar_prefetch = 0 : i64, scratch_operands = 1 : i64, tpu.core_type = #tpu.core_type<tc>, window_params = [{transform_indices = @transform_0, window_bounds = array<i64: 1, 16, 16, 8>}, {transform_indices = @transform_1, window_bounds = array<i64: 1, 1, 16, 8>}, {transform_indices = @transform_2, window_bounds = array<i64: 1, 1, 16, 8>}, {pipeline_mode = #tpu.pipeline_mode<synchronous>, transform_indices = @transform_3, window_bounds = array<i64: 72, 8>}, {pipeline_mode = #tpu.pipeline_mode<synchronous>, transform_indices = @transform_4, window_bounds = array<i64: 8, 8>}, {transform_indices = @transform_5, window_bounds = array<i64: 256, 8>}, {transform_indices = @transform_6, window_bounds = array<i64: 256, 8>}, {transform_indices = @transform_7, window_bounds = array<i64: 8, 8>}]} {
    %c0 = arith.constant 0 : index
    %c0_0 = arith.constant 0 : index
    %c0_1 = arith.constant 0 : index
    %c0_2 = arith.constant 0 : index
    %0 = vector.load %arg2[%c0, %c0_0, %c0_1, %c0_2] : memref<1x16x16x8xbf16, #tpu.memory_space<vmem>>, vector<1x16x16x8xbf16>
    %1 = vector.shape_cast %0 : vector<1x16x16x8xbf16> to vector<16x16x8xbf16>
    %c0_3 = arith.constant 0 : index
    %c0_4 = arith.constant 0 : index
    %c0_5 = arith.constant 0 : index
    %c0_6 = arith.constant 0 : index
    %2 = vector.load %arg3[%c0_3, %c0_4, %c0_5, %c0_6] : memref<1x1x16x8xbf16, #tpu.memory_space<vmem>>, vector<1x1x16x8xbf16>
    %3 = vector.shape_cast %2 : vector<1x1x16x8xbf16> to vector<16x8xbf16>
    %c0_7 = arith.constant 0 : index
    %c0_8 = arith.constant 0 : index
    %c0_9 = arith.constant 0 : index
    %c0_10 = arith.constant 0 : index
    %4 = vector.load %arg4[%c0_7, %c0_8, %c0_9, %c0_10] : memref<1x1x16x8xbf16, #tpu.memory_space<vmem>>, vector<1x1x16x8xbf16>
    %5 = vector.shape_cast %4 : vector<1x1x16x8xbf16> to vector<16x8xbf16>
    %c0_i32 = arith.constant 0 : i32
    %6 = arith.cmpi eq, %arg1, %c0_i32 : i32
    %cst = arith.constant 0.000000e+00 : bf16
    %7 = vector.broadcast %cst : bf16 to vector<16x8xbf16>
    %8 = arith.select %6, %7, %3 : vector<16x8xbf16>
    %c0_i32_11 = arith.constant 0 : i32
    %9 = arith.cmpi eq, %arg1, %c0_i32_11 : i32
    %cst_12 = arith.constant 0.000000e+00 : bf16
    %10 = vector.broadcast %cst_12 : bf16 to vector<16x8xbf16>
    %11 = arith.select %9, %10, %5 : vector<16x8xbf16>
    %cst_13 = arith.constant 0.000000e+00 : bf16
    %12 = vector.broadcast %cst_13 : bf16 to vector<18x18x8xbf16>
    %c0_14 = arith.constant 0 : index
    %c0_15 = arith.constant 0 : index
    %c0_16 = arith.constant 0 : index
    %13 = vector.load %arg10[%c0_14, %c0_15, %c0_16] : memref<18x18x8xbf16, #tpu.memory_space<vmem>>, vector<18x18x8xbf16>
    tpu.vector_store %arg10[%c0_14, %c0_15, %c0_16], %12 {strides = array<i32>} : memref<18x18x8xbf16, #tpu.memory_space<vmem>>, vector<18x18x8xbf16>,
    %14 = vector.shape_cast %8 : vector<16x8xbf16> to vector<1x16x8xbf16>
    %c0_17 = arith.constant 0 : index
    %c1 = arith.constant 1 : index
    %c0_18 = arith.constant 0 : index
    %15 = vector.load %arg10[%c0_17, %c1, %c0_18] : memref<18x18x8xbf16, #tpu.memory_space<vmem>>, vector<1x16x8xbf16>
    tpu.vector_store %arg10[%c0_17, %c1, %c0_18], %14 {strides = array<i32>} : memref<18x18x8xbf16, #tpu.memory_space<vmem>>, vector<1x16x8xbf16>,
    %c1_19 = arith.constant 1 : index
    %c1_20 = arith.constant 1 : index
    %c0_21 = arith.constant 0 : index
    %16 = vector.load %arg10[%c1_19, %c1_20, %c0_21] : memref<18x18x8xbf16, #tpu.memory_space<vmem>>, vector<16x16x8xbf16>
    tpu.vector_store %arg10[%c1_19, %c1_20, %c0_21], %1 {strides = array<i32>} : memref<18x18x8xbf16, #tpu.memory_space<vmem>>, vector<16x16x8xbf16>,
    %17 = vector.shape_cast %11 : vector<16x8xbf16> to vector<1x16x8xbf16>
    %c17 = arith.constant 17 : index
    %c1_22 = arith.constant 1 : index
    %c0_23 = arith.constant 0 : index
    %18 = vector.load %arg10[%c17, %c1_22, %c0_23] : memref<18x18x8xbf16, #tpu.memory_space<vmem>>, vector<1x16x8xbf16>
    tpu.vector_store %arg10[%c17, %c1_22, %c0_23], %17 {strides = array<i32>} : memref<18x18x8xbf16, #tpu.memory_space<vmem>>, vector<1x16x8xbf16>,
    %c0_24 = arith.constant 0 : index
    %c0_25 = arith.constant 0 : index
    %c0_26 = arith.constant 0 : index
    %19 = vector.load %arg10[%c0_24, %c0_25, %c0_26] : memref<18x18x8xbf16, #tpu.memory_space<vmem>>, vector<16x16x8xbf16>
    %c0_27 = arith.constant 0 : index
    %c1_28 = arith.constant 1 : index
    %c0_29 = arith.constant 0 : index
    %20 = vector.load %arg10[%c0_27, %c1_28, %c0_29] : memref<18x18x8xbf16, #tpu.memory_space<vmem>>, vector<16x16x8xbf16>
    %c0_30 = arith.constant 0 : index
    %c2 = arith.constant 2 : index
    %c0_31 = arith.constant 0 : index
    %21 = vector.load %arg10[%c0_30, %c2, %c0_31] : memref<18x18x8xbf16, #tpu.memory_space<vmem>>, vector<16x16x8xbf16>
    %c1_32 = arith.constant 1 : index
    %c0_33 = arith.constant 0 : index
    %c0_34 = arith.constant 0 : index
    %22 = vector.load %arg10[%c1_32, %c0_33, %c0_34] : memref<18x18x8xbf16, #tpu.memory_space<vmem>>, vector<16x16x8xbf16>
    %c1_35 = arith.constant 1 : index
    %c1_36 = arith.constant 1 : index
    %c0_37 = arith.constant 0 : index
    %23 = vector.load %arg10[%c1_35, %c1_36, %c0_37] : memref<18x18x8xbf16, #tpu.memory_space<vmem>>, vector<16x16x8xbf16>
    %c1_38 = arith.constant 1 : index
    %c2_39 = arith.constant 2 : index
    %c0_40 = arith.constant 0 : index
    %24 = vector.load %arg10[%c1_38, %c2_39, %c0_40] : memref<18x18x8xbf16, #tpu.memory_space<vmem>>, vector<16x16x8xbf16>
    %c2_41 = arith.constant 2 : index
    %c0_42 = arith.constant 0 : index
    %c0_43 = arith.constant 0 : index
    %25 = vector.load %arg10[%c2_41, %c0_42, %c0_43] : memref<18x18x8xbf16, #tpu.memory_space<vmem>>, vector<16x16x8xbf16>
    %c2_44 = arith.constant 2 : index
    %c1_45 = arith.constant 1 : index
    %c0_46 = arith.constant 0 : index
    %26 = vector.load %arg10[%c2_44, %c1_45, %c0_46] : memref<18x18x8xbf16, #tpu.memory_space<vmem>>, vector<16x16x8xbf16>
    %c2_47 = arith.constant 2 : index
    %c2_48 = arith.constant 2 : index
    %c0_49 = arith.constant 0 : index
    %27 = vector.load %arg10[%c2_47, %c2_48, %c0_49] : memref<18x18x8xbf16, #tpu.memory_space<vmem>>, vector<16x16x8xbf16>
    %28 = tpu.concatenate %19, %20, %21, %22, %23, %24, %25, %26, %27 in 2 : vector<16x16x8xbf16>, vector<16x16x8xbf16>, vector<16x16x8xbf16>, vector<16x16x8xbf16>, vector<16x16x8xbf16>, vector<16x16x8xbf16>, vector<16x16x8xbf16>, vector<16x16x8xbf16>, vector<16x16x8xbf16> -> vector<16x16x72xbf16>
    %29 = vector.shape_cast %28 : vector<16x16x72xbf16> to vector<256x72xbf16>
    %c0_50 = arith.constant 0 : index
    %c0_51 = arith.constant 0 : index
    %30 = vector.load %arg5[%c0_50, %c0_51] : memref<72x8xbf16, #tpu.memory_space<vmem>>, vector<72x8xbf16>
    %cst_52 = arith.constant dense<0.000000e+00> : vector<256x8xf32>
    %31 = tpu.matmul %29, %30, %cst_52 {dimension_numbers = #tpu.dot_dimension_numbers<[1], [0], [0], [1], [0, 0, 1, 1], [], []>} : vector<256x72xbf16>, vector<72x8xbf16>, vector<256x8xf32> -> vector<256x8xf32>
    %32 = vector.shape_cast %1 : vector<16x16x8xbf16> to vector<256x8xbf16>
    %c0_53 = arith.constant 0 : index
    %c0_54 = arith.constant 0 : index
    %33 = vector.load %arg6[%c0_53, %c0_54] : memref<8x8xbf16, #tpu.memory_space<vmem>>, vector<8x8xbf16>
    %cst_55 = arith.constant dense<0.000000e+00> : vector<256x8xf32>
    %34 = tpu.matmul %32, %33, %cst_55 {dimension_numbers = #tpu.dot_dimension_numbers<[1], [0], [0], [1], [0, 0, 1, 1], [], []>} : vector<256x8xbf16>, vector<8x8xbf16>, vector<256x8xf32> -> vector<256x8xf32>
    %35 = arith.truncf %31 : vector<256x8xf32> to vector<256x8xbf16>
    %c0_56 = arith.constant 0 : index
    %c0_57 = arith.constant 0 : index
    %36 = vector.load %arg7[%c0_56, %c0_57] : memref<256x8xbf16, #tpu.memory_space<vmem>>, vector<256x8xbf16>
    tpu.vector_store %arg7[%c0_56, %c0_57], %35 {strides = array<i32>} : memref<256x8xbf16, #tpu.memory_space<vmem>>, vector<256x8xbf16>,
    %37 = arith.truncf %34 : vector<256x8xf32> to vector<256x8xbf16>
    %c0_58 = arith.constant 0 : index
    %c0_59 = arith.constant 0 : index
    %38 = vector.load %arg8[%c0_58, %c0_59] : memref<256x8xbf16, #tpu.memory_space<vmem>>, vector<256x8xbf16>
    tpu.vector_store %arg8[%c0_58, %c0_59], %37 {strides = array<i32>} : memref<256x8xbf16, #tpu.memory_space<vmem>>, vector<256x8xbf16>,
    %cst_60 = arith.constant dense<0.000000e+00> : vector<8xf32>
    %39 = vector.multi_reduction <add>, %31, %cst_60 [0] : vector<256x8xf32> to vector<8xf32>
    %40 = vector.shape_cast %39 : vector<8xf32> to vector<1x8xf32>
    %c0_61 = arith.constant 0 : index
    %c0_62 = arith.constant 0 : index
    %41 = vector.load %arg9[%c0_61, %c0_62] : memref<8x8xf32, #tpu.memory_space<vmem>>, vector<1x8xf32>
    tpu.vector_store %arg9[%c0_61, %c0_62], %40 {strides = array<i32>} : memref<8x8xf32, #tpu.memory_space<vmem>>, vector<1x8xf32>,
    %42 = arith.mulf %31, %31 : vector<256x8xf32>
    %cst_63 = arith.constant dense<0.000000e+00> : vector<8xf32>
    %43 = vector.multi_reduction <add>, %42, %cst_63 [0] : vector<256x8xf32> to vector<8xf32>
    %44 = vector.shape_cast %43 : vector<8xf32> to vector<1x8xf32>
    %c1_64 = arith.constant 1 : index
    %c0_65 = arith.constant 0 : index
    %45 = vector.load %arg9[%c1_64, %c0_65] : memref<8x8xf32, #tpu.memory_space<vmem>>, vector<1x8xf32>
    tpu.vector_store %arg9[%c1_64, %c0_65], %44 {strides = array<i32>} : memref<8x8xf32, #tpu.memory_space<vmem>>, vector<1x8xf32>,
    %cst_66 = arith.constant dense<0.000000e+00> : vector<8xf32>
    %46 = vector.multi_reduction <add>, %34, %cst_66 [0] : vector<256x8xf32> to vector<8xf32>
    %47 = vector.shape_cast %46 : vector<8xf32> to vector<1x8xf32>
    %c2_67 = arith.constant 2 : index
    %c0_68 = arith.constant 0 : index
    %48 = vector.load %arg9[%c2_67, %c0_68] : memref<8x8xf32, #tpu.memory_space<vmem>>, vector<1x8xf32>
    tpu.vector_store %arg9[%c2_67, %c0_68], %47 {strides = array<i32>} : memref<8x8xf32, #tpu.memory_space<vmem>>, vector<1x8xf32>,
    %49 = arith.mulf %34, %34 : vector<256x8xf32>
    %cst_69 = arith.constant dense<0.000000e+00> : vector<8xf32>
    %50 = vector.multi_reduction <add>, %49, %cst_69 [0] : vector<256x8xf32> to vector<8xf32>
    %51 = vector.shape_cast %50 : vector<8xf32> to vector<1x8xf32>
    %c3 = arith.constant 3 : index
    %c0_70 = arith.constant 0 : index
    %52 = vector.load %arg9[%c3, %c0_70] : memref<8x8xf32, #tpu.memory_space<vmem>>, vector<1x8xf32>
    tpu.vector_store %arg9[%c3, %c0_70], %51 {strides = array<i32>} : memref<8x8xf32, #tpu.memory_space<vmem>>, vector<1x8xf32>,
    return
  }
  func.func @transform_0(%arg0: i32, %arg1: i32) -> (i32, i32, i32, i32) {
    %c0_i32 = arith.constant 0 : i32
    %c0_i32_0 = arith.constant 0 : i32
    %c0_i32_1 = arith.constant 0 : i32
    return %arg0, %arg1, %c0_i32, %c0_i32_0 : i32, i32, i32, i32
  }
  func.func @transform_1(%arg0: i32, %arg1: i32) -> (i32, i32, i32, i32) {
    %c16_i32 = arith.constant 16 : i32
    %0 = arith.muli %arg1, %c16_i32 : i32
    %c1_i32 = arith.constant 1 : i32
    %1 = arith.subi %0, %c1_i32 : i32
    %c0_i32 = arith.constant 0 : i32
    %2 = arith.maxsi %1, %c0_i32 : i32
    %c0_i32_0 = arith.constant 0 : i32
    %c0_i32_1 = arith.constant 0 : i32
    %c0_i32_2 = arith.constant 0 : i32
    return %arg0, %2, %c0_i32_0, %c0_i32_1 : i32, i32, i32, i32
  }
  func.func @transform_2(%arg0: i32, %arg1: i32) -> (i32, i32, i32, i32) {
    %c1_i32 = arith.constant 1 : i32
    %0 = arith.addi %arg1, %c1_i32 : i32
    %c16_i32 = arith.constant 16 : i32
    %1 = arith.muli %0, %c16_i32 : i32
    %c15_i32 = arith.constant 15 : i32
    %2 = arith.minsi %1, %c15_i32 : i32
    %c0_i32 = arith.constant 0 : i32
    %c0_i32_0 = arith.constant 0 : i32
    %c0_i32_1 = arith.constant 0 : i32
    return %arg0, %2, %c0_i32, %c0_i32_0 : i32, i32, i32, i32
  }
  func.func @transform_3(%arg0: i32, %arg1: i32) -> (i32, i32) {
    %c0_i32 = arith.constant 0 : i32
    %c0_i32_0 = arith.constant 0 : i32
    %c0_i32_1 = arith.constant 0 : i32
    return %c0_i32, %c0_i32_0 : i32, i32
  }
  func.func @transform_4(%arg0: i32, %arg1: i32) -> (i32, i32) {
    %c0_i32 = arith.constant 0 : i32
    %c0_i32_0 = arith.constant 0 : i32
    %c0_i32_1 = arith.constant 0 : i32
    return %c0_i32, %c0_i32_0 : i32, i32
  }
  func.func @transform_5(%arg0: i32, %arg1: i32) -> (i32, i32) {
    %c1_i32 = arith.constant 1 : i32
    %0 = arith.muli %arg0, %c1_i32 : i32
    %1 = arith.addi %0, %arg1 : i32
    %c0_i32 = arith.constant 0 : i32
    %c0_i32_0 = arith.constant 0 : i32
    return %1, %c0_i32 : i32, i32
  }
  func.func @transform_6(%arg0: i32, %arg1: i32) -> (i32, i32) {
    %c1_i32 = arith.constant 1 : i32
    %0 = arith.muli %arg0, %c1_i32 : i32
    %1 = arith.addi %0, %arg1 : i32
    %c0_i32 = arith.constant 0 : i32
    %c0_i32_0 = arith.constant 0 : i32
    return %1, %c0_i32 : i32, i32
  }
  func.func @transform_7(%arg0: i32, %arg1: i32) -> (i32, i32) {
    %c1_i32 = arith.constant 1 : i32
    %0 = arith.muli %arg0, %c1_i32 : i32
    %1 = arith.addi %0, %arg1 : i32
    %c0_i32 = arith.constant 0 : i32
    %c0_i32_0 = arith.constant 0 : i32
    return %1, %c0_i32 : i32, i32
  }
}

module attributes {stable_mosaic.version = 11 : i64} {
  func.func @_rep_combine_residual_kernel(%arg0: i32, %arg1: memref<32x128xbf16, #tpu.memory_space<vmem>>, %arg2: memref<32x128xbf16, #tpu.memory_space<vmem>>, %arg3: memref<32x128xbf16, #tpu.memory_space<vmem>>, %arg4: memref<1x128xf32, #tpu.memory_space<vmem>>, %arg5: memref<1x128xf32, #tpu.memory_space<vmem>>, %arg6: memref<1x128xf32, #tpu.memory_space<vmem>>, %arg7: memref<1x128xf32, #tpu.memory_space<vmem>>, %arg8: memref<1x128xf32, #tpu.memory_space<vmem>>, %arg9: memref<1x128xf32, #tpu.memory_space<vmem>>, %arg10: memref<32x128xf32, #tpu.memory_space<vmem>>) attributes {dimension_semantics = [#tpu.dimension_semantics<parallel>], iteration_bounds = array<i64: 1>, scalar_prefetch = 0 : i64, scratch_operands = 0 : i64, tpu.core_type = #tpu.core_type<tc>, window_params = [{transform_indices = @transform_0, window_bounds = array<i64: 32, 128>}, {transform_indices = @transform_1, window_bounds = array<i64: 32, 128>}, {transform_indices = @transform_2, window_bounds = array<i64: 32, 128>}, {pipeline_mode = #tpu.pipeline_mode<synchronous>, transform_indices = @transform_3, window_bounds = array<i64: 1, 128>}, {pipeline_mode = #tpu.pipeline_mode<synchronous>, transform_indices = @transform_4, window_bounds = array<i64: 1, 128>}, {pipeline_mode = #tpu.pipeline_mode<synchronous>, transform_indices = @transform_5, window_bounds = array<i64: 1, 128>}, {pipeline_mode = #tpu.pipeline_mode<synchronous>, transform_indices = @transform_6, window_bounds = array<i64: 1, 128>}, {pipeline_mode = #tpu.pipeline_mode<synchronous>, transform_indices = @transform_7, window_bounds = array<i64: 1, 128>}, {pipeline_mode = #tpu.pipeline_mode<synchronous>, transform_indices = @transform_8, window_bounds = array<i64: 1, 128>}, {transform_indices = @transform_9, window_bounds = array<i64: 32, 128>}]} {
    %c0 = arith.constant 0 : index
    %c0_0 = arith.constant 0 : index
    %0 = vector.load %arg1[%c0, %c0_0] : memref<32x128xbf16, #tpu.memory_space<vmem>>, vector<32x128xbf16>
    %1 = arith.extf %0 : vector<32x128xbf16> to vector<32x128xf32>
    %c0_1 = arith.constant 0 : index
    %c0_2 = arith.constant 0 : index
    %2 = vector.load %arg4[%c0_1, %c0_2] : memref<1x128xf32, #tpu.memory_space<vmem>>, vector<1x128xf32>
    %3 = vector.broadcast %2 : vector<1x128xf32> to vector<32x128xf32>
    %4 = arith.mulf %1, %3 : vector<32x128xf32>
    %c0_3 = arith.constant 0 : index
    %c0_4 = arith.constant 0 : index
    %5 = vector.load %arg5[%c0_3, %c0_4] : memref<1x128xf32, #tpu.memory_space<vmem>>, vector<1x128xf32>
    %6 = vector.broadcast %5 : vector<1x128xf32> to vector<32x128xf32>
    %7 = arith.addf %4, %6 : vector<32x128xf32>
    %c0_5 = arith.constant 0 : index
    %c0_6 = arith.constant 0 : index
    %8 = vector.load %arg2[%c0_5, %c0_6] : memref<32x128xbf16, #tpu.memory_space<vmem>>, vector<32x128xbf16>
    %9 = arith.extf %8 : vector<32x128xbf16> to vector<32x128xf32>
    %c0_7 = arith.constant 0 : index
    %c0_8 = arith.constant 0 : index
    %10 = vector.load %arg6[%c0_7, %c0_8] : memref<1x128xf32, #tpu.memory_space<vmem>>, vector<1x128xf32>
    %11 = vector.broadcast %10 : vector<1x128xf32> to vector<32x128xf32>
    %12 = arith.mulf %9, %11 : vector<32x128xf32>
    %c0_9 = arith.constant 0 : index
    %c0_10 = arith.constant 0 : index
    %13 = vector.load %arg7[%c0_9, %c0_10] : memref<1x128xf32, #tpu.memory_space<vmem>>, vector<1x128xf32>
    %14 = vector.broadcast %13 : vector<1x128xf32> to vector<32x128xf32>
    %15 = arith.addf %12, %14 : vector<32x128xf32>
    %16 = arith.addf %7, %15 : vector<32x128xf32>
    %c0_11 = arith.constant 0 : index
    %c0_12 = arith.constant 0 : index
    %17 = vector.load %arg3[%c0_11, %c0_12] : memref<32x128xbf16, #tpu.memory_space<vmem>>, vector<32x128xbf16>
    %18 = arith.extf %17 : vector<32x128xbf16> to vector<32x128xf32>
    %c0_13 = arith.constant 0 : index
    %c0_14 = arith.constant 0 : index
    %19 = vector.load %arg8[%c0_13, %c0_14] : memref<1x128xf32, #tpu.memory_space<vmem>>, vector<1x128xf32>
    %20 = vector.broadcast %19 : vector<1x128xf32> to vector<32x128xf32>
    %21 = arith.mulf %18, %20 : vector<32x128xf32>
    %c0_15 = arith.constant 0 : index
    %c0_16 = arith.constant 0 : index
    %22 = vector.load %arg9[%c0_15, %c0_16] : memref<1x128xf32, #tpu.memory_space<vmem>>, vector<1x128xf32>
    %23 = vector.broadcast %22 : vector<1x128xf32> to vector<32x128xf32>
    %24 = arith.addf %21, %23 : vector<32x128xf32>
    %cst = arith.constant 0.000000e+00 : f32
    %25 = vector.broadcast %cst : f32 to vector<32x128xf32>
    %26 = arith.subf %25, %16 : vector<32x128xf32>
    %27 = math.exp %26 : vector<32x128xf32>
    %cst_17 = arith.constant 1.000000e+00 : f32
    %28 = vector.broadcast %cst_17 : f32 to vector<32x128xf32>
    %29 = arith.addf %28, %27 : vector<32x128xf32>
    %30 = tpu.reciprocal %29 {approx = true} : vector<32x128xf32> -> vector<32x128xf32>
    %31 = arith.mulf %16, %30 : vector<32x128xf32>
    %cst_18 = arith.constant 0.000000e+00 : f32
    %32 = vector.broadcast %cst_18 : f32 to vector<32x128xf32>
    %33 = arith.subf %32, %24 : vector<32x128xf32>
    %34 = math.exp %33 : vector<32x128xf32>
    %cst_19 = arith.constant 1.000000e+00 : f32
    %35 = vector.broadcast %cst_19 : f32 to vector<32x128xf32>
    %36 = arith.addf %35, %34 : vector<32x128xf32>
    %37 = tpu.reciprocal %36 {approx = true} : vector<32x128xf32> -> vector<32x128xf32>
    %38 = arith.mulf %24, %37 : vector<32x128xf32>
    %39 = arith.addf %31, %38 : vector<32x128xf32>
    %c0_20 = arith.constant 0 : index
    %c0_21 = arith.constant 0 : index
    %40 = vector.load %arg10[%c0_20, %c0_21] : memref<32x128xf32, #tpu.memory_space<vmem>>, vector<32x128xf32>
    tpu.vector_store %arg10[%c0_20, %c0_21], %39 {strides = array<i32>} : memref<32x128xf32, #tpu.memory_space<vmem>>, vector<32x128xf32>,
    return
  }
  func.func @transform_0(%arg0: i32) -> (i32, i32) {
    %c0_i32 = arith.constant 0 : i32
    %c0_i32_0 = arith.constant 0 : i32
    return %arg0, %c0_i32 : i32, i32
  }
  func.func @transform_1(%arg0: i32) -> (i32, i32) {
    %c0_i32 = arith.constant 0 : i32
    %c0_i32_0 = arith.constant 0 : i32
    return %arg0, %c0_i32 : i32, i32
  }
  func.func @transform_2(%arg0: i32) -> (i32, i32) {
    %c0_i32 = arith.constant 0 : i32
    %c0_i32_0 = arith.constant 0 : i32
    return %arg0, %c0_i32 : i32, i32
  }
  func.func @transform_3(%arg0: i32) -> (i32, i32) {
    %c0_i32 = arith.constant 0 : i32
    %c0_i32_0 = arith.constant 0 : i32
    %c0_i32_1 = arith.constant 0 : i32
    return %c0_i32, %c0_i32_0 : i32, i32
  }
  func.func @transform_4(%arg0: i32) -> (i32, i32) {
    %c0_i32 = arith.constant 0 : i32
    %c0_i32_0 = arith.constant 0 : i32
    %c0_i32_1 = arith.constant 0 : i32
    return %c0_i32, %c0_i32_0 : i32, i32
  }
  func.func @transform_5(%arg0: i32) -> (i32, i32) {
    %c0_i32 = arith.constant 0 : i32
    %c0_i32_0 = arith.constant 0 : i32
    %c0_i32_1 = arith.constant 0 : i32
    return %c0_i32, %c0_i32_0 : i32, i32
  }
  func.func @transform_6(%arg0: i32) -> (i32, i32) {
    %c0_i32 = arith.constant 0 : i32
    %c0_i32_0 = arith.constant 0 : i32
    %c0_i32_1 = arith.constant 0 : i32
    return %c0_i32, %c0_i32_0 : i32, i32
  }
  func.func @transform_7(%arg0: i32) -> (i32, i32) {
    %c0_i32 = arith.constant 0 : i32
    %c0_i32_0 = arith.constant 0 : i32
    %c0_i32_1 = arith.constant 0 : i32
    return %c0_i32, %c0_i32_0 : i32, i32
  }
  func.func @transform_8(%arg0: i32) -> (i32, i32) {
    %c0_i32 = arith.constant 0 : i32
    %c0_i32_0 = arith.constant 0 : i32
    %c0_i32_1 = arith.constant 0 : i32
    return %c0_i32, %c0_i32_0 : i32, i32
  }
  func.func @transform_9(%arg0: i32) -> (i32, i32) {
    %c0_i32 = arith.constant 0 : i32
    %c0_i32_0 = arith.constant 0 : i32
    return %arg0, %c0_i32 : i32, i32
  }
}

module attributes {stable_mosaic.version = 11 : i64} {
  func.func @_rep_combine_kernel(%arg0: i32, %arg1: memref<32x128xbf16, #tpu.memory_space<vmem>>, %arg2: memref<32x128xbf16, #tpu.memory_space<vmem>>, %arg3: memref<1x128xf32, #tpu.memory_space<vmem>>, %arg4: memref<1x128xf32, #tpu.memory_space<vmem>>, %arg5: memref<1x128xf32, #tpu.memory_space<vmem>>, %arg6: memref<1x128xf32, #tpu.memory_space<vmem>>, %arg7: memref<32x128xbf16, #tpu.memory_space<vmem>>) attributes {dimension_semantics = [#tpu.dimension_semantics<parallel>], iteration_bounds = array<i64: 1>, scalar_prefetch = 0 : i64, scratch_operands = 0 : i64, tpu.core_type = #tpu.core_type<tc>, window_params = [{transform_indices = @transform_0, window_bounds = array<i64: 32, 128>}, {transform_indices = @transform_1, window_bounds = array<i64: 32, 128>}, {pipeline_mode = #tpu.pipeline_mode<synchronous>, transform_indices = @transform_2, window_bounds = array<i64: 1, 128>}, {pipeline_mode = #tpu.pipeline_mode<synchronous>, transform_indices = @transform_3, window_bounds = array<i64: 1, 128>}, {pipeline_mode = #tpu.pipeline_mode<synchronous>, transform_indices = @transform_4, window_bounds = array<i64: 1, 128>}, {pipeline_mode = #tpu.pipeline_mode<synchronous>, transform_indices = @transform_5, window_bounds = array<i64: 1, 128>}, {transform_indices = @transform_6, window_bounds = array<i64: 32, 128>}]} {
    %c0 = arith.constant 0 : index
    %c0_0 = arith.constant 0 : index
    %0 = vector.load %arg1[%c0, %c0_0] : memref<32x128xbf16, #tpu.memory_space<vmem>>, vector<32x128xbf16>
    %1 = arith.extf %0 : vector<32x128xbf16> to vector<32x128xf32>
    %c0_1 = arith.constant 0 : index
    %c0_2 = arith.constant 0 : index
    %2 = vector.load %arg3[%c0_1, %c0_2] : memref<1x128xf32, #tpu.memory_space<vmem>>, vector<1x128xf32>
    %3 = vector.broadcast %2 : vector<1x128xf32> to vector<32x128xf32>
    %4 = arith.mulf %1, %3 : vector<32x128xf32>
    %c0_3 = arith.constant 0 : index
    %c0_4 = arith.constant 0 : index
    %5 = vector.load %arg4[%c0_3, %c0_4] : memref<1x128xf32, #tpu.memory_space<vmem>>, vector<1x128xf32>
    %6 = vector.broadcast %5 : vector<1x128xf32> to vector<32x128xf32>
    %7 = arith.addf %4, %6 : vector<32x128xf32>
    %c0_5 = arith.constant 0 : index
    %c0_6 = arith.constant 0 : index
    %8 = vector.load %arg2[%c0_5, %c0_6] : memref<32x128xbf16, #tpu.memory_space<vmem>>, vector<32x128xbf16>
    %9 = arith.extf %8 : vector<32x128xbf16> to vector<32x128xf32>
    %c0_7 = arith.constant 0 : index
    %c0_8 = arith.constant 0 : index
    %10 = vector.load %arg5[%c0_7, %c0_8] : memref<1x128xf32, #tpu.memory_space<vmem>>, vector<1x128xf32>
    %11 = vector.broadcast %10 : vector<1x128xf32> to vector<32x128xf32>
    %12 = arith.mulf %9, %11 : vector<32x128xf32>
    %c0_9 = arith.constant 0 : index
    %c0_10 = arith.constant 0 : index
    %13 = vector.load %arg6[%c0_9, %c0_10] : memref<1x128xf32, #tpu.memory_space<vmem>>, vector<1x128xf32>
    %14 = vector.broadcast %13 : vector<1x128xf32> to vector<32x128xf32>
    %15 = arith.addf %12, %14 : vector<32x128xf32>
    %16 = arith.addf %7, %15 : vector<32x128xf32>
    %cst = arith.constant 0.000000e+00 : f32
    %17 = vector.broadcast %cst : f32 to vector<32x128xf32>
    %18 = arith.subf %17, %16 : vector<32x128xf32>
    %19 = math.exp %18 : vector<32x128xf32>
    %cst_11 = arith.constant 1.000000e+00 : f32
    %20 = vector.broadcast %cst_11 : f32 to vector<32x128xf32>
    %21 = arith.addf %20, %19 : vector<32x128xf32>
    %22 = tpu.reciprocal %21 {approx = true} : vector<32x128xf32> -> vector<32x128xf32>
    %23 = arith.mulf %16, %22 : vector<32x128xf32>
    %24 = arith.truncf %23 : vector<32x128xf32> to vector<32x128xbf16>
    %c0_12 = arith.constant 0 : index
    %c0_13 = arith.constant 0 : index
    %25 = vector.load %arg7[%c0_12, %c0_13] : memref<32x128xbf16, #tpu.memory_space<vmem>>, vector<32x128xbf16>
    tpu.vector_store %arg7[%c0_12, %c0_13], %24 {strides = array<i32>} : memref<32x128xbf16, #tpu.memory_space<vmem>>, vector<32x128xbf16>,
    return
  }
  func.func @transform_0(%arg0: i32) -> (i32, i32) {
    %c0_i32 = arith.constant 0 : i32
    %c0_i32_0 = arith.constant 0 : i32
    return %arg0, %c0_i32 : i32, i32
  }
  func.func @transform_1(%arg0: i32) -> (i32, i32) {
    %c0_i32 = arith.constant 0 : i32
    %c0_i32_0 = arith.constant 0 : i32
    return %arg0, %c0_i32 : i32, i32
  }
  func.func @transform_2(%arg0: i32) -> (i32, i32) {
    %c0_i32 = arith.constant 0 : i32
    %c0_i32_0 = arith.constant 0 : i32
    %c0_i32_1 = arith.constant 0 : i32
    return %c0_i32, %c0_i32_0 : i32, i32
  }
  func.func @transform_3(%arg0: i32) -> (i32, i32) {
    %c0_i32 = arith.constant 0 : i32
    %c0_i32_0 = arith.constant 0 : i32
    %c0_i32_1 = arith.constant 0 : i32
    return %c0_i32, %c0_i32_0 : i32, i32
  }
  func.func @transform_4(%arg0: i32) -> (i32, i32) {
    %c0_i32 = arith.constant 0 : i32
    %c0_i32_0 = arith.constant 0 : i32
    %c0_i32_1 = arith.constant 0 : i32
    return %c0_i32, %c0_i32_0 : i32, i32
  }
  func.func @transform_5(%arg0: i32) -> (i32, i32) {
    %c0_i32 = arith.constant 0 : i32
    %c0_i32_0 = arith.constant 0 : i32
    %c0_i32_1 = arith.constant 0 : i32
    return %c0_i32, %c0_i32_0 : i32, i32
  }
  func.func @transform_6(%arg0: i32) -> (i32, i32) {
    %c0_i32 = arith.constant 0 : i32
    %c0_i32_0 = arith.constant 0 : i32
    return %arg0, %c0_i32 : i32, i32
  }
}

</mosaic_0001>

<bundles_post_ra>
// kernel: tile.88
= control target key start
LH: loop header
LB: loop body
LE: loop exit
PB: predicated region body
PF: predicated region fallthrough
CT: control target
= control target key end

     0   :  { %s28_s0 = inlined_call_operand.vmem [shape: f32[8], index: 0, kind: input, shape index: {}]   ;;  %s29_s1 = inlined_call_operand.vmem [shape: f32[16,8], index: 1, kind: output, shape index: {}]  }
   0x1   :  { %v4_v0 = vld [vmem:[%s28_s0] ss:$0 sm:$0xff] }
   0x2   :  { %5 = vst [vmem:[%s29_s1] sm:$0xff] %v4_v0  ;;  %8 = vst [vmem:[%s29_s1 + $0x8] sm:$0xff] %v4_v0 }

// kernel: tile.89
= control target key start
LH: loop header
LB: loop body
LE: loop exit
PB: predicated region body
PF: predicated region fallthrough
CT: control target
= control target key end

     0   :  { %s131_s10 = smov 120   ;;  %s132_s11 = smov 104   ;;  %vm3_vm0 = vcmask 64512   ;;  %vm9_vm1 = vcmask 1048512   ;;  %vm15_vm2 = vcmask 982912   ;;  %vm21_vm3 = vcmask 917312   ;;  %s207_s0 = inlined_call_operand.vmem [shape: f32[16,8], index: 0, kind: input, shape index: {}]   ;;  %s208_s1 = inlined_call_operand.vmem [shape: f32[1,128], index: 1, kind: output, shape index: {}]  }
   0x1   :  { %v101_v0 = vld [vmem:[%s207_s0 + $0xf] sm:$0x1]   ;;  %v103_v1 = vld [vmem:[%s207_s0 + $0xd] sm:$0x1]   ;;  %v102_v2 = vld [vmem:[%s207_s0 + $0xe] sm:$0x1]  }
   0x2   :  { %7 = vrot.lane.b32.xlu0 %v101_v0, %s131_s10  ;;  %19 = vrot.lane.b32.xlu1 %v103_v1, %s132_s11  ;;  %v104_v3 = vld [vmem:[%s207_s0 + $0xc] sm:$0x1]   ;;  %s133_s16 = smov 112   ;;  %s134_s17 = smov 96   ;;  %v105_v4 = vld [vmem:[%s207_s0 + $0xb] sm:$0x1]  }
   0x3   :  { %v106_v5 = vld [vmem:[%s207_s0 + $0xa] sm:$0x1]   ;;  %v2_v6 = vld [vmem:[%s207_s0] sm:$0x1]   ;;  %s135_s24 = smov 88   ;;  %s136_s25 = smov 80  }
   0x4   :  { %4 = vst.msk [vmem:[#allocation0] sm:$0x1] %vm3_vm0, %v2_v6   ;;  %v107_v7 = vld [vmem:[%s207_s0 + $0x9] sm:$0x1]   ;;  %v108_v8 = vld [vmem:[%s207_s0 + $0x8] sm:$0x1]  }
   0x5   :  { %s137_s30 = smov 72   ;;  %s138_s2 = smov 64   ;;  %v109_v9 = vld [vmem:[%s207_s0 + $0x7] sm:$0x1]   ;;  %v110_v10 = vld [vmem:[%s207_s0 + $0x6] sm:$0x1]  }
   0x6   :  { %13 = vrot.lane.b32.xlu0 %v102_v2, %s133_s16  ;;  %25 = vrot.lane.b32.xlu1 %v104_v3, %s134_s17  ;;  %s139_s7 = smov 56   ;;  %s140_s8 = smov 48   ;;  %v111_v11 = vld [vmem:[%s207_s0 + $0x5] sm:$0x1]   ;;  %v112_v12 = vld [vmem:[%s207_s0 + $0x4] sm:$0x1]  }
   0x7   :  { %s141_s13 = smov 40   ;;  %s142_s14 = smov 32   ;;  %v113_v13 = vld [vmem:[%s207_s0 + $0x3] sm:$0x1]   ;;  %v114_v14 = vld [vmem:[%s207_s0 + $0x2] sm:$0x1]  }
   0x8   :  { %s143_s19 = smov 24   ;;  %s144_s20 = smov 16   ;;  %v115_v15 = vld [vmem:[%s207_s0 + $0x1] sm:$0x1]   ;;  %vm27_vm4 = vcmask 851712   ;;  %vm33_vm5 = vcmask 786112  }
   0x9   :  { %s145_s0 = smov 8   ;;  %vm39_vm6 = vcmask 720512   ;;  %vm45_vm7 = vcmask 654912   ;;  %vm51_vm8 = vcmask 589312   ;;  %vm57_vm9 = vcmask 523712  }
   0xa   :  { %31 = vrot.lane.b32.xlu0 %v105_v4, %s135_s24  ;;  %37 = vrot.lane.b32.xlu1 %v106_v5, %s136_s25  ;;  %vm63_vm10 = vcmask 458112   ;;  %vm69_vm11 = vcmask 392512   ;;  %vm75_vm12 = vcmask 326912   ;;  %vm81_vm13 = vcmask 261312  }
   0xb   :  { %vm87_vm14 = vcmask 195712   ;;  %vm93_vm15 = vcmask 130112  }
   0xe   :  { %43 = vrot.lane.b32.xlu0 %v107_v7, %s137_s30  ;;  %49 = vrot.lane.b32.xlu1 %v108_v8, %s138_s2 }
  0x12   :  { %55 = vrot.lane.b32.xlu0 %v109_v9, %s139_s7  ;;  %61 = vrot.lane.b32.xlu1 %v110_v10, %s140_s8 }
  0x16   :  { %67 = vrot.lane.b32.xlu0 %v111_v11, %s141_s13  ;;  %73 = vrot.lane.b32.xlu1 %v112_v12, %s142_s14 }
  0x1a   :  { %79 = vrot.lane.b32.xlu0 %v113_v13, %s143_s19  ;;  %85 = vrot.lane.b32.xlu1 %v114_v14, %s144_s20 }
  0x1e   :  { %91 = vrot.lane.b32.xlu0 %v115_v15, %s145_s0 }
  0x74   :  { %v8_v16 = vpop.permute.xlu0 %7   ;;  %v20_v17 = vpop.permute.xlu1 %19  }
  0x75   :  { %10 = vst.msk [vmem:[#allocation0] sm:$0x1] %vm9_vm1, %v8_v16  }
  0x78   :  { %v14_v18 = vpop.permute.xlu0 %13   ;;  %v26_v19 = vpop.permute.xlu1 %25  }
  0x79   :  { %16 = vst.msk [vmem:[#allocation0] sm:$0x1] %vm15_vm2, %v14_v18  }
  0x7a   :  { %22 = vst.msk [vmem:[#allocation0] sm:$0x1] %vm21_vm3, %v20_v17  }
  0x7b   :  { %28 = vst.msk [vmem:[#allocation0] sm:$0x1] %vm27_vm4, %v26_v19  }
  0x7c   :  { %v32_v20 = vpop.permute.xlu0 %31   ;;  %v38_v21 = vpop.permute.xlu1 %37  }
  0x7d   :  { %34 = vst.msk [vmem:[#allocation0] sm:$0x1] %vm33_vm5, %v32_v20  }
  0x7e   :  { %40 = vst.msk [vmem:[#allocation0] sm:$0x1] %vm39_vm6, %v38_v21  }
  0x80   :  { %v44_v22 = vpop.permute.xlu0 %43   ;;  %v50_v23 = vpop.permute.xlu1 %49  }
  0x81   :  { %46 = vst.msk [vmem:[#allocation0] sm:$0x1] %vm45_vm7, %v44_v22  }
  0x82   :  { %52 = vst.msk [vmem:[#allocation0] sm:$0x1] %vm51_vm8, %v50_v23  }
  0x84   :  { %v56_v24 = vpop.permute.xlu0 %55   ;;  %v62_v25 = vpop.permute.xlu1 %61  }
  0x85   :  { %58 = vst.msk [vmem:[#allocation0] sm:$0x1] %vm57_vm9, %v56_v24  }
  0x86   :  { %64 = vst.msk [vmem:[#allocation0] sm:$0x1] %vm63_vm10, %v62_v25  }
  0x88   :  { %v68_v26 = vpop.permute.xlu0 %67   ;;  %v74_v27 = vpop.permute.xlu1 %73  }
  0x89   :  { %70 = vst.msk [vmem:[#allocation0] sm:$0x1] %vm69_vm11, %v68_v26  }
  0x8a   :  { %76 = vst.msk [vmem:[#allocation0] sm:$0x1] %vm75_vm12, %v74_v27  }
  0x8c   :  { %v80_v28 = vpop.permute.xlu0 %79   ;;  %v86_v29 = vpop.permute.xlu1 %85  }
  0x8d   :  { %82 = vst.msk [vmem:[#allocation0] sm:$0x1] %vm81_vm13, %v80_v28  }
  0x8e   :  { %88 = vst.msk [vmem:[#allocation0] sm:$0x1] %vm87_vm14, %v86_v29  }
  0x90   :  { %v92_v30 = vpop.permute.xlu0 %91  }
  0x91   :  { %94 = vst.msk [vmem:[#allocation0] sm:$0x1] %vm93_vm15, %v92_v30  }
  0x98   :  { %v98_v31 = vld [vmem:[#allocation0] sm:$0x1] }
  0x99   :  { %100 = vst [vmem:[%s208_s1] sm:$0x1] %v98_v31 }

// kernel: repc3_forward.9
= control target key start
LH: loop header
LB: loop body
LE: loop exit
PB: predicated region body
PF: predicated region fallthrough
CT: control target
= control target key end

     0   :  { %s176_s0 = inlined_call_operand.vmem [shape: bf16[32,128], index: 0, kind: input, shape index: {}]   ;;  %s177_s1 = inlined_call_operand.vmem [shape: f32[1,128], index: 1, kind: input, shape index: {}]   ;;  %s178_s2 = inlined_call_operand.vmem [shape: f32[1,128], index: 2, kind: input, shape index: {}]   ;;  %s179_s3 = inlined_call_operand.vmem [shape: bf16[32,128], index: 3, kind: output, shape index: {}]  }
   0x1   :  { %v103_v0 = vld [vmem:[%s176_s0] sm:$0xff]   ;;  %v120_v4 = vld [vmem:[%s176_s0 + $0x8] sm:$0xff]  }
   0x2   :  { %v92_v1 = vld [vmem:[%s177_s1] ss:$0 sm:$0xff]  ;;  %v104_v2 = vunpack.c.l.bf16 %v103_v0  ;;  %v105_v3 = vunpack.c.h.bf16 %v103_v0  ;;  %v108_v6 = vunpack.c.l.bf16 %v120_v4  ;;  %v109_v7 = vunpack.c.h.bf16 %v120_v4 }
   0x3   :  { %v93_v5 = vld [vmem:[%s178_s2] ss:$0 sm:$0xff] }
   0x4   :  { %v29_v8 = vmul.f32 %v104_v2, %v92_v1  ;;  %v30_v9 = vmul.f32 %v105_v3, %v92_v1  ;;  %v31_v10 = vmul.f32 %v108_v6, %v92_v1  ;;  %v32_v11 = vmul.f32 %v109_v7, %v92_v1 }
   0x6   :  { %v40_v12 = vadd.f32 %v93_v5, %v29_v8  ;;  %v41_v13 = vadd.f32 %v93_v5, %v30_v9  ;;  %v42_v14 = vadd.f32 %v93_v5, %v31_v10  ;;  %v43_v15 = vadd.f32 %v93_v5, %v32_v11 }
   0x8   :  { %v44_v16 = vsub.f32 0.0, %v40_v12  ;;  %v45_v17 = vsub.f32 0.0, %v41_v13  ;;  %v46_v18 = vsub.f32 0.0, %v42_v14  ;;  %v47_v19 = vsub.f32 0.0, %v43_v15 }
   0xa   :  { %v48_v20 = vmul.f32 1.442695, %v44_v16  ;;  %v50_v21 = vmul.f32 1.442695, %v45_v17  ;;  %v52_v22 = vmul.f32 1.442695, %v46_v18 }
   0xb   :  { %v54_v23 = vmul.f32 1.442695, %v47_v19 }
   0xc   :  { %122 = vpow2.f32 %v48_v20 }
   0xd   :  { %124 = vpow2.f32 %v50_v21 }
   0xe   :  { %126 = vpow2.f32 %v52_v22 }
   0xf   :  { %128 = vpow2.f32 %v54_v23 }
  0x16   :  { %v123_v24 = vpop.eup %122 }
  0x17   :  { %v125_v25 = vpop.eup %124  ;;  %v56_v26 = vadd.f32 1.0, %v123_v24 }
  0x18   :  { %v127_v27 = vpop.eup %126  ;;  %v57_v28 = vadd.f32 1.0, %v125_v25 }
  0x19   :  { %v129_v29 = vpop.eup %128  ;;  %130 = vrcp.f32 %v56_v26  ;;  %v58_v30 = vadd.f32 1.0, %v127_v27 }
  0x1a   :  { %132 = vrcp.f32 %v57_v28  ;;  %v59_v31 = vadd.f32 1.0, %v129_v29 }
  0x1b   :  { %134 = vrcp.f32 %v58_v30 }
  0x1c   :  { %136 = vrcp.f32 %v59_v31 }
  0x23   :  { %v131_v32 = vpop.eup %130 }
  0x24   :  { %v133_v33 = vpop.eup %132  ;;  %v64_v34 = vmul.f32 %v131_v32, %v40_v12 }
  0x25   :  { %v135_v35 = vpop.eup %134  ;;  %v65_v36 = vmul.f32 %v133_v33, %v41_v13 }
  0x26   :  { %v137_v37 = vpop.eup %136  ;;  %v66_v38 = vmul.f32 %v135_v35, %v42_v14 }
  0x27   :  { %v113_v39 = vpack.c.bf16 %v65_v36, %v64_v34  ;;  %v67_v40 = vmul.f32 %v137_v37, %v43_v15 }
  0x29   :  { %114 = vst [vmem:[%s179_s3] sm:$0xff] %v113_v39   ;;  %v118_v41 = vpack.c.bf16 %v67_v40, %v66_v38 }
  0x2b   :  { %121 = vst [vmem:[%s179_s3 + $0x8] sm:$0xff] %v118_v41  }

// kernel: repc3_forward.8
= control target key start
LH: loop header
LB: loop body
LE: loop exit
PB: predicated region body
PF: predicated region fallthrough
CT: control target
= control target key end

     0   :  { %s1361_s15 = smov 0   ;;  %s1851_s0 = inlined_call_operand.vmem [shape: bf16[512,4], index: 0, kind: input, shape index: {}]   ;;  %s1852_s1 = inlined_call_operand.vmem [shape: bf16[4,16], index: 1, kind: input, shape index: {}]   ;;  %s1853_s2 = inlined_call_operand.vmem [shape: bf16[512,8], index: 2, kind: output, shape index: {0}]   ;;  %s1854_s3 = inlined_call_operand.vmem [shape: bf16[512,8], index: 3, kind: output, shape index: {1}]   ;;  %s1855_s4 = inlined_call_operand.vmem [shape: f32[16,16], index: 4, kind: output, shape index: {2}]  }
   0x1 LB: > { %s1367_s16 = sadd.s32 4294967295, %s1333_s15   ;;  %p1141_p0 = scmp.ge.s32.totalorder %s1333_s15, 1  ;;  %s1333_s15 = sphi %s1361_s15, %s15_s15  }
   0x2   : > { %p168_p1 = scmp.lt.s32.totalorder %s1333_s15, 3 }
   0x4   : > { %p169_p2 = pnand %p1141_p0, %p168_p1 }
   0x5   : > { %v258_v0 = vld [vmem:[%s1852_s1] sm:$0x3] (!%p169_p2)  ;;  %vm388_vm0 = vcmask (!%p169_p2), 1041408   ;;  %s1142_s19 = sshll.u32 (!%p169_p2), %s1367_s16, 5  ;;  %vm339_vm1 = vcmask (!%p169_p2), 31744   ;;  %vm681_vm2 = vcmask (!%p169_p2), 60416  }
   0x6   : > { %172 = sbr.rel (%p169_p2) target bundleno = 409 (0x199), region = 28  ;;  %1300 = vmatprep.subr.msk.bf16.mxu0 (!%p169_p2), %vm388_vm0, %v258_v0  ;;  %1301 = vmatprep.subr.msk.bf16.mxu1 (!%p169_p2), %vm388_vm0, %v258_v0  ;;  %v390_v1 = vsel (!%p169_p2), %vm388_vm0, %v258_v0, 0  ;;  %p204_p3 = scmp.lt.s32.totalorder (!%p169_p2), %s1142_s19, 63  ;;  %vm842_vm3 = vcmask (!%p169_p2), 130048   ;;  %vm912_vm4 = vcmask (!%p169_p2), 122880  }
   0x7   : > { %1265 = vmatpush3.bf16.msra.mxu0 (!%p169_p2), %v390_v1  ;;  %1299 = vmatpush3.bf16.msra.mxu1 (!%p169_p2), %v390_v1  ;;  %s1335_s27 = smov (!%p169_p2), 120   ;;  %p221_p4 = scmp.lt.s32.totalorder (!%p169_p2), %s1367_s16, 1 }
   0xd   : > { %s1857_s19 = smov (!%p204_p3, %s1142_s19), 63  ;;  %s1859_s16 = smov (!%p221_p4, %s1367_s16), 1 }
   0xe   : > { %s1375_s20 = sshll.u32 %s1857_s19, 2  ;;  %s1148_s28 = sshll.u32 %s1859_s16, 3 }
   0xf   : > { %s1381_s23 = scalar_lea.vmem %s1851_s0, %s1375_s20  ;;  %s1419_s26 = scalar_lea.vmem %s1853_s2, %s1375_s20 }
  0x10   : > { %v1311_v2 = vld [vmem:[%s1381_s23] sm:$0xff]   ;;  %v1313_v4 = vld [vmem:[%s1381_s23 + $0x8] sm:$0xff]   ;;  %v1315_v6 = vld [vmem:[%s1381_s23 + $0x10] sm:$0xff]   ;;  %s224_s5 = scalar_lea.vmem %s1855_s4, %s1148_s28  ;;  %s1782_s8 = scalar_lea.vmem %s1854_s3, %s1375_s20 }
  0x11   : > { %v1312_v3 = vld [vmem:[%s1381_s23 + $0x40] sm:$0xff]   ;;  %1266 = vmatprep.mubr.msk.bf16.mxu0 %vm339_vm1, %v1311_v2  ;;  %v1314_v5 = vld [vmem:[%s1381_s23 + $0x48] sm:$0xff]   ;;  %v1317_v7 = vld [vmem:[%s1381_s23 + $0x50] sm:$0xff]  }
  0x12   : > { %1282 = vmatprep.mubr.msk.bf16.mxu1 %vm339_vm1, %v1312_v3  ;;  %1267 = vmatmul.mubr.msk.bf16.vlgmr.msra.gmra.mrb[0].mxu0 %vm339_vm1, %v1313_v4  ;;  %v1316_v8 = vld [vmem:[%s1381_s23 + $0x18] sm:$0xff]   ;;  %v1318_v9 = vld [vmem:[%s1381_s23 + $0x20] sm:$0xff]   ;;  %v1320_v12 = vld [vmem:[%s1381_s23 + $0x28] sm:$0xff]  }
  0x13   : > { %1283 = vmatmul.mubr.msk.bf16.vlgmr.msra.gmra.mrb[0].mxu1 %vm339_vm1, %v1314_v5  ;;  %1270 = vmatprep.mubr.msk.bf16.mxu0 %vm339_vm1, %v1315_v6  ;;  %v1319_v10 = vld [vmem:[%s1381_s23 + $0x58] sm:$0xff]   ;;  %v1323_v11 = vld [vmem:[%s1381_s23 + $0x60] sm:$0xff]   ;;  %v1321_v13 = vld [vmem:[%s1381_s23 + $0x30] sm:$0xff]  }
  0x14   : > { %1286 = vmatprep.mubr.msk.bf16.mxu1 %vm339_vm1, %v1317_v7  ;;  %v1324_v14 = vld [vmem:[%s1381_s23 + $0x68] sm:$0xff]   ;;  %v1325_v15 = vld [vmem:[%s1381_s23 + $0x70] sm:$0xff]   ;;  %v1322_v16 = vld [vmem:[%s1381_s23 + $0x38] sm:$0xff]  }
  0x15   : > { %v1326_v17 = vld [vmem:[%s1381_s23 + $0x78] sm:$0xff]  }
  0x1a   : > { %1271 = vmatmul.mubr.msk.bf16.gmra.mrb[4].mxu0 %vm339_vm1, %v1316_v8 }
  0x1b   : > { %1274 = vmatprep.mubr.msk.bf16.mxu0 %vm339_vm1, %v1318_v9  ;;  %1287 = vmatmul.mubr.msk.bf16.gmra.mrb[4].mxu1 %vm339_vm1, %v1319_v10 }
  0x1c   : > { %1290 = vmatprep.mubr.msk.bf16.mxu1 %vm339_vm1, %v1323_v11 }
  0x22   : > { %1275 = vmatmul.mubr.msk.bf16.gmra.mrb[8].mxu0 %vm339_vm1, %v1320_v12 }
  0x23   : > { %1278 = vmatprep.mubr.msk.bf16.mxu0 %vm339_vm1, %v1321_v13  ;;  %1291 = vmatmul.mubr.msk.bf16.gmra.mrb[8].mxu1 %vm339_vm1, %v1324_v14 }
  0x24   : > { %1294 = vmatprep.mubr.msk.bf16.mxu1 %vm339_vm1, %v1325_v15 }
  0x2a   : > { %1279 = vmatmul.mubr.msk.bf16.gmra.mrb[12].mxu0 %vm339_vm1, %v1322_v16 }
  0x2b   : > { %1295 = vmatmul.mubr.msk.bf16.gmra.mrb[12].mxu1 %vm339_vm1, %v1326_v17 }
  0xe5   : > { %v1268_v18 = vpop.f32.mrb[0].mxu0 }
  0xe6   : > { %v1421_v19 = vpop.f32.mrb[0].mxu1  ;;  %v426_v20 = vpop.f32.mrb[1].mxu0  ;;  %v1217_v21 = vpack.c.bf16 %v1268_v18, %v1268_v18  ;;  %v916_v35 = vmul.f32 %v1268_v18, %v1268_v18  ;;  %v846_v45 = vsel %vm842_vm3, %v1268_v18, 0.0 }
  0xe7   : > { %v1215_v22 = vpack.c.bf16 %v426_v20, %v426_v20  ;;  %v1423_v23 = vpop.f32.mrb[1].mxu1  ;;  %v1269_v24 = vpop.f32.mrb[2].mxu0  ;;  %v914_v31 = vmul.f32 %v426_v20, %v426_v20  ;;  %v1233_v32 = vpack.c.bf16 %v1421_v19, %v1421_v19  ;;  %v843_v36 = vsel %vm842_vm3, %v426_v20, 0.0 }
  0xe8   : > { %v1427_v25 = vpack.c.bf16 %v1423_v23, %v1423_v23  ;;  %v1429_v26 = vpop.f32.mrb[2].mxu1  ;;  %718 = vrot.lane.b32.xlu1 %v1217_v21, %s1335_s27  ;;  %684 = vst.msk [vmem:[%s1419_s26 + $0x8] sm:$0xf] %vm681_vm2, %v1217_v21  ;;  %v429_v27 = vpop.f32.mrb[3].mxu0  ;;  %v1218_v28 = vpack.c.bf16 %v1269_v24, %v1269_v24  ;;  %v917_v40 = vmul.f32 %v1269_v24, %v1269_v24  ;;  %v949_v57 = vsel %vm842_vm3, %v916_v35, 0.0 }
  0xe9   : > { %682 = vst.msk [vmem:[%s1419_s26] sm:$0xf] %vm681_vm2, %v1215_v22  ;;  %v1436_v29 = vpop.f32.mrb[3].mxu1  ;;  %v1234_v30 = vpack.c.bf16 %v1429_v26, %v1429_v26  ;;  %v1451_v34 = vpack.c.bf16 %v429_v27, %v429_v27  ;;  %750 = vrot.lane.b32.xlu0 %v1233_v32, %s1335_s27  ;;  %700 = vst.msk [vmem:[%s1419_s26 + $0x48] sm:$0xf] %vm681_vm2, %v1233_v32  ;;  %v844_v37 = vsel %vm842_vm3, %v429_v27, 0.0 }
  0xea   : > { %698 = vst.msk [vmem:[%s1419_s26 + $0x40] sm:$0xf] %vm681_vm2, %v1427_v25  ;;  %685 = vst.msk [vmem:[%s1419_s26 + $0xc] sm:$0xf] %vm681_vm2, %v1218_v28  ;;  %v1232_v33 = vpack.c.bf16 %v1436_v29, %v1436_v29  ;;  %v915_v38 = vmul.f32 %v429_v27, %v429_v27  ;;  %v845_v41 = vadd.f32 %v844_v37, %v843_v36  ;;  %v946_v46 = vsel %vm842_vm3, %v914_v31, 0.0 }
  0xeb   : > { %701 = vst.msk [vmem:[%s1419_s26 + $0x4c] sm:$0xf] %vm681_vm2, %v1234_v30  ;;  %683 = vst.msk [vmem:[%s1419_s26 + $0x4] sm:$0xf] %vm681_vm2, %v1451_v34  ;;  %v848_v58 = vsel %vm842_vm3, %v1269_v24, 0.0  ;;  %v951_v62 = vsel %vm842_vm3, %v917_v40, 0.0 }
  0xec   : > { %720 = vrot.lane.b32.xlu1 %v1218_v28, %s1335_s27  ;;  %699 = vst.msk [vmem:[%s1419_s26 + $0x44] sm:$0xf] %vm681_vm2, %v1232_v33  ;;  %v947_v47 = vsel %vm842_vm3, %v915_v38, 0.0  ;;  %v847_v51 = vadd.f32 %v846_v45, %v845_v41 }
  0xed   : > { %v1272_v39 = vpop.f32.mrb[4].mxu0  ;;  %v948_v52 = vadd.f32 %v947_v47, %v946_v46  ;;  %714 = vrot.lane.b32.xlu0 %v1215_v22, %s1335_s27 }
  0xee   : > { %v1464_v42 = vpack.c.bf16 %v1272_v39, %v1272_v39  ;;  %v442_v43 = vpop.f32.mrb[5].mxu0  ;;  %v1466_v44 = vpop.f32.mrb[4].mxu1  ;;  %v920_v0 = vmul.f32 %v1272_v39, %v1272_v39  ;;  %v849_v1 = vadd.f32 %v848_v58, %v847_v51  ;;  %v854_v9 = vsel %vm842_vm3, %v1272_v39, 0.0 }
  0xef   : > { %v1471_v48 = vpack.c.bf16 %v442_v43, %v442_v43  ;;  %v1273_v49 = vpop.f32.mrb[6].mxu0  ;;  %v1473_v50 = vpop.f32.mrb[5].mxu1  ;;  %v918_v53 = vmul.f32 %v442_v43, %v442_v43  ;;  %v850_v59 = vsel %vm842_vm3, %v442_v43, 0.0  ;;  %v950_v63 = vadd.f32 %v949_v57, %v948_v52 }
  0xf0   : > { %688 = vst.msk [vmem:[%s1419_s26 + $0x18] sm:$0xf] %vm681_vm2, %v1464_v42  ;;  %v1222_v54 = vpack.c.bf16 %v1273_v49, %v1273_v49  ;;  %752 = vrot.lane.b32.xlu1 %v1234_v30, %s1335_s27  ;;  %v445_v55 = vpop.f32.mrb[7].mxu0  ;;  %v1479_v56 = vpop.f32.mrb[6].mxu1  ;;  %v1502_v5 = vpack.c.bf16 %v1466_v44, %v1466_v44  ;;  %v851_v6 = vadd.f32 %v850_v59, %v849_v1  ;;  %v957_v20 = vsel %vm842_vm3, %v920_v0, 0.0 }
  0xf1   : > { %686 = vst.msk [vmem:[%s1419_s26 + $0x10] sm:$0xf] %vm681_vm2, %v1471_v48  ;;  %v1488_v60 = vpack.c.bf16 %v445_v55, %v445_v55  ;;  %v1490_v61 = vpop.f32.mrb[7].mxu1  ;;  %v953_v2 = vsel %vm842_vm3, %v918_v53, 0.0  ;;  %v852_v3 = vsel %vm842_vm3, %v445_v55, 0.0  ;;  %v919_v4 = vmul.f32 %v445_v55, %v445_v55  ;;  %746 = vrot.lane.b32.xlu0 %v1427_v25, %s1335_s27 }
  0xf2   : > { %689 = vst.msk [vmem:[%s1419_s26 + $0x1c] sm:$0xf] %vm681_vm2, %v1222_v54  ;;  %v952_v7 = vadd.f32 %v951_v62, %v950_v63  ;;  %v1507_v8 = vpack.c.bf16 %v1473_v50, %v1473_v50  ;;  %v921_v10 = vmul.f32 %v1273_v49, %v1273_v49  ;;  %704 = vst.msk [vmem:[%s1419_s26 + $0x58] sm:$0xf] %vm681_vm2, %v1502_v5  ;;  %v856_v21 = vsel %vm842_vm3, %v1273_v49, 0.0 }
  0xf3   : > { %687 = vst.msk [vmem:[%s1419_s26 + $0x14] sm:$0xf] %vm681_vm2, %v1488_v60  ;;  %v955_v11 = vsel %vm842_vm3, %v919_v4, 0.0  ;;  %v1238_v13 = vpack.c.bf16 %v1479_v56, %v1479_v56  ;;  %v853_v15 = vadd.f32 %v852_v3, %v851_v6 }
  0xf4   : > { %748 = vrot.lane.b32.xlu1 %v1232_v33, %s1335_s27  ;;  %v954_v14 = vadd.f32 %v953_v2, %v952_v7  ;;  %702 = vst.msk [vmem:[%s1419_s26 + $0x50] sm:$0xf] %vm681_vm2, %v1507_v8  ;;  %v959_v33 = vsel %vm842_vm3, %v921_v10, 0.0 }
  0xf5   : > { %v1276_v12 = vpop.f32.mrb[8].mxu0  ;;  %705 = vst.msk [vmem:[%s1419_s26 + $0x5c] sm:$0xf] %vm681_vm2, %v1238_v13  ;;  %v855_v27 = vadd.f32 %v854_v9, %v853_v15  ;;  %716 = vrot.lane.b32.xlu0 %v1451_v34, %s1335_s27  ;;  %v1236_v34 = vpack.c.bf16 %v1490_v61, %v1490_v61 }
  0xf6   : > { %v1518_v16 = vpack.c.bf16 %v1276_v12, %v1276_v12  ;;  %v458_v17 = vpop.f32.mrb[9].mxu0  ;;  %v1523_v18 = vpop.f32.mrb[8].mxu1  ;;  %v956_v28 = vadd.f32 %v955_v11, %v954_v14  ;;  %v924_v40 = vmul.f32 %v1276_v12, %v1276_v12  ;;  %v862_v43 = vsel %vm842_vm3, %v1276_v12, 0.0 }
  0xf7   : > { %v1527_v22 = vpack.c.bf16 %v458_v17, %v458_v17  ;;  %v1277_v24 = vpop.f32.mrb[10].mxu0  ;;  %v1531_v25 = vpop.f32.mrb[9].mxu1  ;;  %v922_v30 = vmul.f32 %v458_v17, %v458_v17  ;;  %v858_v35 = vsel %vm842_vm3, %v458_v17, 0.0  ;;  %v857_v39 = vadd.f32 %v856_v21, %v855_v27  ;;  %703 = vst.msk [vmem:[%s1419_s26 + $0x54] sm:$0xf] %vm681_vm2, %v1236_v34 }
  0xf8   : > { %692 = vst.msk [vmem:[%s1419_s26 + $0x28] sm:$0xf] %vm681_vm2, %v1518_v16  ;;  %728 = vrot.lane.b32.xlu1 %v1222_v54, %s1335_s27  ;;  %v461_v31 = vpop.f32.mrb[11].mxu0  ;;  %v1537_v32 = vpop.f32.mrb[10].mxu1  ;;  %v1546_v36 = vpack.c.bf16 %v1277_v24, %v1277_v24  ;;  %v958_v38 = vadd.f32 %v957_v20, %v956_v28  ;;  %v925_v49 = vmul.f32 %v1277_v24, %v1277_v24  ;;  %v864_v63 = vsel %vm842_vm3, %v1277_v24, 0.0 }
  0xf9   : > { %690 = vst.msk [vmem:[%s1419_s26 + $0x20] sm:$0xf] %vm681_vm2, %v1527_v22  ;;  %v1548_v37 = vpop.f32.mrb[11].mxu1  ;;  %v961_v41 = vsel %vm842_vm3, %v922_v30, 0.0  ;;  %v859_v45 = vadd.f32 %v858_v35, %v857_v39  ;;  %v1557_v47 = vpack.c.bf16 %v461_v31, %v461_v31  ;;  %726 = vrot.lane.b32.xlu0 %v1464_v42, %s1335_s27  ;;  %v860_v51 = vsel %vm842_vm3, %v461_v31, 0.0 }
  0xfa   : > { %693 = vst.msk [vmem:[%s1419_s26 + $0x2c] sm:$0xf] %vm681_vm2, %v1546_v36  ;;  %v960_v46 = vadd.f32 %v959_v33, %v958_v38  ;;  %v923_v52 = vmul.f32 %v461_v31, %v461_v31  ;;  %v1567_v54 = vpack.c.bf16 %v1523_v18, %v1523_v18  ;;  %v965_v42 = vsel %vm842_vm3, %v924_v40, 0.0 }
  0xfb   : > { %691 = vst.msk [vmem:[%s1419_s26 + $0x24] sm:$0xf] %vm681_vm2, %v1557_v47  ;;  %v861_v57 = vadd.f32 %v860_v51, %v859_v45  ;;  %v967_v11 = vsel %vm842_vm3, %v925_v49, 0.0  ;;  %v1617_v30 = vpack.c.bf16 %v1531_v25, %v1531_v25  ;;  %v1242_v38 = vpack.c.bf16 %v1537_v32, %v1537_v32 }
  0xfc   : > { %760 = vrot.lane.b32.xlu1 %v1238_v13, %s1335_s27  ;;  %v962_v55 = vadd.f32 %v961_v41, %v960_v46  ;;  %v963_v0 = vsel %vm842_vm3, %v923_v52, 0.0  ;;  %708 = vst.msk [vmem:[%s1419_s26 + $0x68] sm:$0xf] %vm681_vm2, %v1567_v54  ;;  %v930_v49 = vmul.f32 %v1423_v23, %v1423_v23 }
  0xfd   : > { %v1280_v53 = vpop.f32.mrb[12].mxu0  ;;  %v863_v4 = vadd.f32 %v862_v43, %v861_v57  ;;  %758 = vrot.lane.b32.xlu0 %v1502_v5, %s1335_s27  ;;  %706 = vst.msk [vmem:[%s1419_s26 + $0x60] sm:$0xf] %vm681_vm2, %v1617_v30  ;;  %709 = vst.msk [vmem:[%s1419_s26 + $0x6c] sm:$0xf] %vm681_vm2, %v1242_v38  ;;  %v931_v57 = vmul.f32 %v1436_v29, %v1436_v29 }
  0xfe   : > { %v1572_v58 = vpack.c.bf16 %v1280_v53, %v1280_v53  ;;  %v474_v59 = vpop.f32.mrb[13].mxu0  ;;  %v1574_v62 = vpop.f32.mrb[12].mxu1  ;;  %v964_v6 = vadd.f32 %v963_v0, %v962_v55  ;;  %v928_v20 = vmul.f32 %v1280_v53, %v1280_v53  ;;  %v870_v31 = vsel %vm842_vm3, %v1280_v53, 0.0 }
  0xff   : > { %v1579_v1 = vpack.c.bf16 %v474_v59, %v474_v59  ;;  %v1281_v2 = vpop.f32.mrb[14].mxu0  ;;  %v1584_v3 = vpop.f32.mrb[13].mxu1  ;;  %v926_v7 = vmul.f32 %v474_v59, %v474_v59  ;;  %v866_v12 = vsel %vm842_vm3, %v474_v59, 0.0  ;;  %v1638_v46 = vpack.c.bf16 %v1574_v62, %v1574_v62 }
 0x100   : > { %696 = vst.msk [vmem:[%s1419_s26 + $0x38] sm:$0xf] %vm681_vm2, %v1572_v58  ;;  %724 = vrot.lane.b32.xlu1 %v1488_v60, %s1335_s27  ;;  %v477_v9 = vpop.f32.mrb[15].mxu0  ;;  %v1591_v10 = vpop.f32.mrb[14].mxu1  ;;  %v1600_v13 = vpack.c.bf16 %v1281_v2, %v1281_v2  ;;  %v966_v15 = vadd.f32 %v965_v42, %v964_v6  ;;  %v865_v60 = vadd.f32 %v864_v63, %v863_v4  ;;  %v973_v41 = vsel %vm842_vm3, %v928_v20, 0.0 }
 0x101   : > { %694 = vst.msk [vmem:[%s1419_s26 + $0x30] sm:$0xf] %vm681_vm2, %v1579_v1  ;;  %v1602_v14 = vpop.f32.mrb[15].mxu1  ;;  %v1604_v17 = vpack.c.bf16 %v477_v9, %v477_v9  ;;  %v969_v21 = vsel %vm842_vm3, %v926_v7, 0.0  ;;  %v868_v5 = vsel %vm842_vm3, %v477_v9, 0.0  ;;  %v927_v24 = vmul.f32 %v477_v9, %v477_v9  ;;  %722 = vrot.lane.b32.xlu0 %v1471_v48, %s1335_s27 }
 0x102   : > { %697 = vst.msk [vmem:[%s1419_s26 + $0x3c] sm:$0xf] %vm681_vm2, %v1600_v13  ;;  %v867_v27 = vadd.f32 %v866_v12, %v865_v60  ;;  %v968_v28 = vadd.f32 %v967_v11, %v966_v15  ;;  %v929_v33 = vmul.f32 %v1281_v2, %v1281_v2  ;;  %v1240_v48 = vpack.c.bf16 %v1548_v37, %v1548_v37 }
 0x103   : > { %695 = vst.msk [vmem:[%s1419_s26 + $0x34] sm:$0xf] %vm681_vm2, %v1604_v17  ;;  %v971_v35 = vsel %vm842_vm3, %v927_v24, 0.0  ;;  %v1649_v52 = vpack.c.bf16 %v1584_v3, %v1584_v3  ;;  %712 = vst.msk [vmem:[%s1419_s26 + $0x78] sm:$0xf] %vm681_vm2, %v1638_v46  ;;  %v874_v55 = vsel %vm842_vm3, %v1423_v23, 0.0  ;;  %v1244_v63 = vpack.c.bf16 %v1602_v14, %v1602_v14 }
 0x104   : > { %756 = vrot.lane.b32.xlu1 %v1236_v34, %s1335_s27  ;;  %v970_v39 = vadd.f32 %v969_v21, %v968_v28  ;;  %v869_v40 = vadd.f32 %v868_v5, %v867_v27  ;;  %v872_v34 = vsel %vm842_vm3, %v1281_v2, 0.0  ;;  %v975_v51 = vsel %vm842_vm3, %v929_v33, 0.0  ;;  %707 = vst.msk [vmem:[%s1419_s26 + $0x64] sm:$0xf] %vm681_vm2, %v1240_v48 }
 0x105   : > { %754 = vrot.lane.b32.xlu0 %v1507_v8, %s1335_s27  ;;  %710 = vst.msk [vmem:[%s1419_s26 + $0x70] sm:$0xf] %vm681_vm2, %v1649_v52  ;;  %v1663_v8 = vpack.c.bf16 %v1591_v10, %v1591_v10  ;;  %v932_v23 = vmul.f32 %v1421_v19, %v1421_v19  ;;  %v977_v0 = vsel %vm842_vm3, %v930_v49, 0.0  ;;  %v876_v2 = vsel %vm842_vm3, %v1436_v29, 0.0  ;;  %711 = vst.msk [vmem:[%s1419_s26 + $0x74] sm:$0xf] %vm681_vm2, %v1244_v63 }
 0x106   : > { %v871_v43 = vadd.f32 %v870_v31, %v869_v40  ;;  %v972_v45 = vadd.f32 %v971_v35, %v970_v39  ;;  %v878_v7 = vsel %vm842_vm3, %v1421_v19, 0.0  ;;  %v933_v9 = vmul.f32 %v1429_v26, %v1429_v26 }
 0x107   : > { %713 = vst.msk [vmem:[%s1419_s26 + $0x7c] sm:$0xf] %vm681_vm2, %v1663_v8  ;;  %v979_v11 = vsel %vm842_vm3, %v931_v57, 0.0  ;;  %v880_v15 = vsel %vm842_vm3, %v1429_v26, 0.0  ;;  %v934_v60 = vmul.f32 %v1473_v50, %v1473_v50  ;;  %v882_v5 = vsel %vm842_vm3, %v1473_v50, 0.0 }
 0x108   : > { %736 = vrot.lane.b32.xlu1 %v1546_v36, %s1335_s27  ;;  %v873_v36 = vadd.f32 %v872_v34, %v871_v43  ;;  %v974_v53 = vadd.f32 %v973_v41, %v972_v45  ;;  %v983_v21 = vsel %vm842_vm3, %v933_v9, 0.0  ;;  %v936_v26 = vmul.f32 %v1466_v44, %v1466_v44 }
 0x109   : > { %734 = vrot.lane.b32.xlu0 %v1518_v16, %s1335_s27  ;;  %v981_v16 = vsel %vm842_vm3, %v932_v23, 0.0  ;;  %v985_v28 = vsel %vm842_vm3, %v934_v60, 0.0  ;;  %v886_v33 = vsel %vm842_vm3, %v1466_v44, 0.0  ;;  %v937_v35 = vmul.f32 %v1479_v56, %v1479_v56 }
 0x10a   : > { %v875_v59 = vadd.f32 %v874_v55, %v873_v36  ;;  %v976_v42 = vadd.f32 %v975_v51, %v974_v53  ;;  %v938_v41 = vmul.f32 %v1531_v25, %v1531_v25  ;;  %v890_v43 = vsel %vm842_vm3, %v1531_v25, 0.0 }
 0x10b   : > { %v892_v51 = vsel %vm842_vm3, %v1548_v37, 0.0  ;;  %v894_v53 = vsel %vm842_vm3, %v1523_v18, 0.0  ;;  %v941_v55 = vmul.f32 %v1537_v32, %v1537_v32 }
 0x10c   : > { %768 = vrot.lane.b32.xlu1 %v1242_v38, %s1335_s27  ;;  %v877_v4 = vadd.f32 %v876_v2, %v875_v59  ;;  %v978_v6 = vadd.f32 %v977_v0, %v976_v42  ;;  %v898_v2 = vsel %vm842_vm3, %v1584_v3, 0.0 }
 0x10d   : > { %766 = vrot.lane.b32.xlu0 %v1567_v54, %s1335_s27  ;;  %v884_v54 = vsel %vm842_vm3, %v1490_v61, 0.0  ;;  %v999_v0 = vsel %vm842_vm3, %v941_v55, 0.0 }
 0x10e   : > { %v879_v12 = vadd.f32 %v878_v7, %v877_v4  ;;  %v980_v29 = vadd.f32 %v979_v11, %v978_v6  ;;  %v900_v7 = vsel %vm842_vm3, %v1602_v14, 0.0  ;;  %v902_v11 = vsel %vm842_vm3, %v1574_v62, 0.0 }
 0x110   : > { %732 = vrot.lane.b32.xlu1 %v1557_v47, %s1335_s27  ;;  %v982_v19 = vadd.f32 %v981_v16, %v980_v29  ;;  %v881_v20 = vadd.f32 %v880_v15, %v879_v12  ;;  %v935_v47 = vmul.f32 %v1490_v61, %v1490_v61  ;;  %v989_v61 = vsel %vm842_vm3, %v936_v26, 0.0 }
 0x111   : > { %730 = vrot.lane.b32.xlu0 %v1527_v22, %s1335_s27  ;;  %v888_v22 = vsel %vm842_vm3, %v1479_v56, 0.0  ;;  %v940_v56 = vmul.f32 %v1523_v18, %v1523_v18 }
 0x112   : > { %v883_v24 = vadd.f32 %v882_v5, %v881_v20  ;;  %v984_v27 = vadd.f32 %v983_v21, %v982_v19  ;;  %v987_v38 = vsel %vm842_vm3, %v935_v47, 0.0 }
 0x113   : > { %v997_v42 = vsel %vm842_vm3, %v940_v56, 0.0 }
 0x114   : > { %764 = vrot.lane.b32.xlu1 %v1240_v48, %s1335_s27  ;;  %v885_v31 = vadd.f32 %v884_v54, %v883_v24  ;;  %v986_v50 = vadd.f32 %v985_v28, %v984_v27  ;;  %v991_v48 = vsel %vm842_vm3, %v937_v35, 0.0 }
 0x115   : > { %762 = vrot.lane.b32.xlu0 %v1617_v30, %s1335_s27  ;;  %v993_v30 = vsel %vm842_vm3, %v938_v41, 0.0 }
 0x116   : > { %v887_v39 = vadd.f32 %v886_v33, %v885_v31  ;;  %v988_v40 = vadd.f32 %v987_v38, %v986_v50 }
 0x118   : > { %744 = vrot.lane.b32.xlu1 %v1600_v13, %s1335_s27  ;;  %v889_v44 = vadd.f32 %v888_v22, %v887_v39  ;;  %v990_v34 = vadd.f32 %v989_v61, %v988_v40  ;;  %v939_v13 = vmul.f32 %v1548_v37, %v1548_v37  ;;  %v896_v37 = vsel %vm842_vm3, %v1537_v32, 0.0 }
 0x119   : > { %742 = vrot.lane.b32.xlu0 %v1572_v58, %s1335_s27  ;;  %v942_v58 = vmul.f32 %v1584_v3, %v1584_v3  ;;  %v944_v32 = vmul.f32 %v1574_v62, %v1574_v62 }
 0x11a   : > { %v891_v45 = vadd.f32 %v890_v43, %v889_v44  ;;  %v992_v49 = vadd.f32 %v991_v48, %v990_v34 }
 0x11b   : > { %v1005_v15 = vsel %vm842_vm3, %v944_v32, 0.0 }
 0x11c   : > { %740 = vrot.lane.b32.xlu1 %v1604_v17, %s1335_s27  ;;  %v994_v25 = vadd.f32 %v993_v30, %v992_v49  ;;  %v893_v36 = vadd.f32 %v892_v51, %v891_v45  ;;  %v995_v17 = vsel %vm842_vm3, %v939_v13, 0.0 }
 0x11d   : > { %738 = vrot.lane.b32.xlu0 %v1579_v1, %s1335_s27  ;;  %v1001_v1 = vsel %vm842_vm3, %v942_v58, 0.0 }
 0x11e   : > { %v895_v57 = vadd.f32 %v894_v53, %v893_v36  ;;  %v996_v59 = vadd.f32 %v995_v17, %v994_v25 }
 0x120   : > { %772 = vrot.lane.b32.xlu1 %v1244_v63, %s1335_s27  ;;  %v998_v18 = vadd.f32 %v997_v42, %v996_v59  ;;  %v897_v23 = vadd.f32 %v896_v37, %v895_v57  ;;  %v943_v63 = vmul.f32 %v1602_v14, %v1602_v14  ;;  %v904_v14 = vsel %vm842_vm3, %v1591_v10, 0.0 }
 0x121   : > { %770 = vrot.lane.b32.xlu0 %v1649_v52, %s1335_s27 }
 0x122   : > { %v899_v4 = vadd.f32 %v898_v2, %v897_v23  ;;  %v1000_v6 = vadd.f32 %v999_v0, %v998_v18  ;;  %v1003_v12 = vsel %vm842_vm3, %v943_v63, 0.0 }
 0x124   : > { %776 = vrot.lane.b32.xlu1 %v1663_v8, %s1335_s27  ;;  %v1002_v3 = vadd.f32 %v1001_v1, %v1000_v6  ;;  %v901_v9 = vadd.f32 %v900_v7, %v899_v4  ;;  %v945_v8 = vmul.f32 %v1591_v10, %v1591_v10 }
 0x125   : > { %774 = vrot.lane.b32.xlu0 %v1638_v46, %s1335_s27 }
 0x126   : > { %v903_v29 = vadd.f32 %v902_v11, %v901_v9  ;;  %v1004_v16 = vadd.f32 %v1003_v12, %v1002_v3  ;;  %v1007_v62 = vsel %vm842_vm3, %v945_v8, 0.0 }
 0x128   : > { %v905_v52 = vadd.f32 %v904_v14, %v903_v29  ;;  %v1006_v60 = vadd.f32 %v1005_v15, %v1004_v16 }
 0x12a   : > { %v906_v19 = vrot.slane %v905_v52, 4  ;;  %v1008_v20 = vadd.f32 %v1007_v62, %v1006_v60 }
 0x12c   : > { %v907_v21 = vadd.f32 %v906_v19, %v905_v52  ;;  %v1009_v5 = vrot.slane %v1008_v20, 4 }
 0x12e   : > { %v908_v47 = vrot.slane %v907_v21, 2  ;;  %v1010_v24 = vadd.f32 %v1009_v5, %v1008_v20 }
 0x130   : > { %v909_v27 = vadd.f32 %v908_v47, %v907_v21  ;;  %v1011_v26 = vrot.slane %v1010_v24, 2 }
 0x132   : > { %v910_v10 = vrot.slane %v909_v27, 1  ;;  %v1012_v28 = vadd.f32 %v1011_v26, %v1010_v24 }
 0x134   : > { %v911_v46 = vadd.f32 %v910_v10, %v909_v27  ;;  %v1013_v54 = vrot.slane %v1012_v28, 1 }
 0x136   : > { %913 = vst.msk [vmem:[%s224_s5] sm:$0x1] %vm912_vm4, %v911_v46  ;;  %v1014_v31 = vadd.f32 %v1013_v54, %v1012_v28 }
 0x138   : > { %1015 = vst.msk [vmem:[%s224_s5 + $0x1] sm:$0x1] %vm912_vm4, %v1014_v31 }
 0x15a   : > { %v719_v50 = vpop.permute.xlu1 %718 }
 0x15b   : > { %812 = vst.msk [vmem:[%s1782_s8 + $0x8] sm:$0xf] %vm681_vm2, %v719_v50  ;;  %v751_v35 = vpop.permute.xlu0 %750 }
 0x15c   : > { %828 = vst.msk [vmem:[%s1782_s8 + $0x48] sm:$0xf] %vm681_vm2, %v751_v35 }
 0x15e   : > { %v721_v33 = vpop.permute.xlu1 %720 }
 0x15f   : > { %813 = vst.msk [vmem:[%s1782_s8 + $0xc] sm:$0xf] %vm681_vm2, %v721_v33  ;;  %v715_v39 = vpop.permute.xlu0 %714 }
 0x160   : > { %810 = vst.msk [vmem:[%s1782_s8] sm:$0xf] %vm681_vm2, %v715_v39 }
 0x162   : > { %v753_v38 = vpop.permute.xlu1 %752 }
 0x163   : > { %829 = vst.msk [vmem:[%s1782_s8 + $0x4c] sm:$0xf] %vm681_vm2, %v753_v38  ;;  %v747_v61 = vpop.permute.xlu0 %746 }
 0x164   : > { %826 = vst.msk [vmem:[%s1782_s8 + $0x40] sm:$0xf] %vm681_vm2, %v747_v61 }
 0x166   : > { %v749_v40 = vpop.permute.xlu1 %748 }
 0x167   : > { %827 = vst.msk [vmem:[%s1782_s8 + $0x44] sm:$0xf] %vm681_vm2, %v749_v40  ;;  %v717_v41 = vpop.permute.xlu0 %716 }
 0x168   : > { %811 = vst.msk [vmem:[%s1782_s8 + $0x4] sm:$0xf] %vm681_vm2, %v717_v41 }
 0x16a   : > { %v729_v22 = vpop.permute.xlu1 %728 }
 0x16b   : > { %817 = vst.msk [vmem:[%s1782_s8 + $0x1c] sm:$0xf] %vm681_vm2, %v729_v22  ;;  %v727_v34 = vpop.permute.xlu0 %726 }
 0x16c   : > { %816 = vst.msk [vmem:[%s1782_s8 + $0x18] sm:$0xf] %vm681_vm2, %v727_v34 }
 0x16e   : > { %v761_v44 = vpop.permute.xlu1 %760 }
 0x16f   : > { %833 = vst.msk [vmem:[%s1782_s8 + $0x5c] sm:$0xf] %vm681_vm2, %v761_v44  ;;  %v759_v43 = vpop.permute.xlu0 %758 }
 0x170   : > { %832 = vst.msk [vmem:[%s1782_s8 + $0x58] sm:$0xf] %vm681_vm2, %v759_v43 }
 0x172   : > { %v725_v48 = vpop.permute.xlu1 %724 }
 0x173   : > { %815 = vst.msk [vmem:[%s1782_s8 + $0x14] sm:$0xf] %vm681_vm2, %v725_v48  ;;  %v723_v45 = vpop.permute.xlu0 %722 }
 0x174   : > { %814 = vst.msk [vmem:[%s1782_s8 + $0x10] sm:$0xf] %vm681_vm2, %v723_v45 }
 0x176   : > { %v757_v13 = vpop.permute.xlu1 %756 }
 0x177   : > { %831 = vst.msk [vmem:[%s1782_s8 + $0x54] sm:$0xf] %vm681_vm2, %v757_v13  ;;  %v755_v56 = vpop.permute.xlu0 %754 }
 0x178   : > { %830 = vst.msk [vmem:[%s1782_s8 + $0x50] sm:$0xf] %vm681_vm2, %v755_v56 }
 0x17a   : > { %v737_v49 = vpop.permute.xlu1 %736 }
 0x17b   : > { %821 = vst.msk [vmem:[%s1782_s8 + $0x2c] sm:$0xf] %vm681_vm2, %v737_v49  ;;  %v735_v51 = vpop.permute.xlu0 %734 }
 0x17c   : > { %820 = vst.msk [vmem:[%s1782_s8 + $0x28] sm:$0xf] %vm681_vm2, %v735_v51 }
 0x17e   : > { %v769_v30 = vpop.permute.xlu1 %768 }
 0x17f   : > { %837 = vst.msk [vmem:[%s1782_s8 + $0x6c] sm:$0xf] %vm681_vm2, %v769_v30  ;;  %v767_v36 = vpop.permute.xlu0 %766 }
 0x180   : > { %836 = vst.msk [vmem:[%s1782_s8 + $0x68] sm:$0xf] %vm681_vm2, %v767_v36 }
 0x182   : > { %v733_v25 = vpop.permute.xlu1 %732 }
 0x183   : > { %819 = vst.msk [vmem:[%s1782_s8 + $0x24] sm:$0xf] %vm681_vm2, %v733_v25  ;;  %v731_v55 = vpop.permute.xlu0 %730 }
 0x184   : > { %818 = vst.msk [vmem:[%s1782_s8 + $0x20] sm:$0xf] %vm681_vm2, %v731_v55 }
 0x186   : > { %v765_v53 = vpop.permute.xlu1 %764 }
 0x187   : > { %835 = vst.msk [vmem:[%s1782_s8 + $0x64] sm:$0xf] %vm681_vm2, %v765_v53  ;;  %v763_v57 = vpop.permute.xlu0 %762 }
 0x188   : > { %834 = vst.msk [vmem:[%s1782_s8 + $0x60] sm:$0xf] %vm681_vm2, %v763_v57 }
 0x18a   : > { %v745_v17 = vpop.permute.xlu1 %744 }
 0x18b   : > { %825 = vst.msk [vmem:[%s1782_s8 + $0x3c] sm:$0xf] %vm681_vm2, %v745_v17  ;;  %v743_v42 = vpop.permute.xlu0 %742 }
 0x18c   : > { %824 = vst.msk [vmem:[%s1782_s8 + $0x38] sm:$0xf] %vm681_vm2, %v743_v42 }
 0x18e   : > { %v741_v59 = vpop.permute.xlu1 %740 }
 0x18f   : > { %823 = vst.msk [vmem:[%s1782_s8 + $0x34] sm:$0xf] %vm681_vm2, %v741_v59  ;;  %v739_v58 = vpop.permute.xlu0 %738 }
 0x190   : > { %822 = vst.msk [vmem:[%s1782_s8 + $0x30] sm:$0xf] %vm681_vm2, %v739_v58 }
 0x192   : > { %v773_v37 = vpop.permute.xlu1 %772 }
 0x193   : > { %839 = vst.msk [vmem:[%s1782_s8 + $0x74] sm:$0xf] %vm681_vm2, %v773_v37  ;;  %v771_v23 = vpop.permute.xlu0 %770 }
 0x194   : > { %838 = vst.msk [vmem:[%s1782_s8 + $0x70] sm:$0xf] %vm681_vm2, %v771_v23 }
 0x196   : > { %v777_v18 = vpop.permute.xlu1 %776 }
 0x197   : > { %841 = vst.msk [vmem:[%s1782_s8 + $0x7c] sm:$0xf] %vm681_vm2, %v777_v18  ;;  %v775_v0 = vpop.permute.xlu0 %774 }
 0x198   : > { %840 = vst.msk [vmem:[%s1782_s8 + $0x78] sm:$0xf] %vm681_vm2, %v775_v0 }
 0x199 PF: > { %s15_s15 = sadd.s32 1, %s1333_s15  }
 0x19a   : > { %p12_p5 = scmp.ge.s32.totalorder %s15_s15, 4  }
 0x19c   :  { %14 = sbr.rel (!%p12_p5) target bundleno = 1 (0x1), region = 82 }

// kernel: repc3_forward.15
= control target key start
LH: loop header
LB: loop body
LE: loop exit
PB: predicated region body
PF: predicated region fallthrough
CT: control target
= control target key end

     0   :  { %s373_s0 = inlined_call_operand.vmem [shape: bf16[32,128], index: 0, kind: input, shape index: {}]   ;;  %s374_s1 = inlined_call_operand.vmem [shape: bf16[32,128], index: 1, kind: input, shape index: {}]   ;;  %s375_s2 = inlined_call_operand.vmem [shape: bf16[32,128], index: 2, kind: input, shape index: {}]   ;;  %s376_s3 = inlined_call_operand.vmem [shape: f32[1,128], index: 3, kind: input, shape index: {}]   ;;  %s377_s4 = inlined_call_operand.vmem [shape: f32[1,128], index: 4, kind: input, shape index: {}]   ;;  %s378_s5 = inlined_call_operand.vmem [shape: f32[1,128], index: 5, kind: input, shape index: {}]   ;;  %s379_s7 = inlined_call_operand.vmem [shape: f32[1,128], index: 7, kind: input, shape index: {}]   ;;  %s380_s6 = inlined_call_operand.vmem [shape: f32[1,128], index: 6, kind: input, shape index: {}]   ;;  %s381_s8 = inlined_call_operand.vmem [shape: f32[1,128], index: 8, kind: input, shape index: {}]   ;;  %s382_s9 = inlined_call_operand.vmem [shape: f32[32,128], index: 9, kind: output, shape index: {}]  }
   0x1   :  { %v193_v0 = vld [vmem:[%s373_s0] sm:$0xff]   ;;  %v216_v16 = vld [vmem:[%s373_s0 + $0x8] sm:$0xff]  }
   0x2   :  { %v186_v1 = vld [vmem:[%s376_s3] ss:$0 sm:$0xff]  ;;  %v194_v2 = vunpack.c.l.bf16 %v193_v0  ;;  %v195_v5 = vunpack.c.h.bf16 %v193_v0  ;;  %v217_v17 = vld [vmem:[%s374_s1 + $0x8] sm:$0xff]   ;;  %v198_v21 = vunpack.c.l.bf16 %v216_v16  ;;  %v199_v35 = vunpack.c.h.bf16 %v216_v16 }
   0x3   :  { %v201_v3 = vld [vmem:[%s374_s1] sm:$0xff]   ;;  %v206_v22 = vunpack.c.l.bf16 %v217_v17  ;;  %v218_v23 = vld [vmem:[%s375_s2 + $0x8] sm:$0xff]   ;;  %v207_v47 = vunpack.c.h.bf16 %v217_v17 }
   0x4   :  { %v188_v4 = vld [vmem:[%s378_s5] ss:$0 sm:$0xff]  ;;  %v202_v7 = vunpack.c.l.bf16 %v201_v3  ;;  %v203_v10 = vunpack.c.h.bf16 %v201_v3  ;;  %v47_v11 = vmul.f32 %v194_v2, %v186_v1  ;;  %v48_v14 = vmul.f32 %v195_v5, %v186_v1 }
   0x5   :  { %v187_v6 = vld [vmem:[%s377_s4] ss:$0 sm:$0xff]  ;;  %v49_v30 = vmul.f32 %v198_v21, %v186_v1  ;;  %v79_v31 = vmul.f32 %v206_v22, %v188_v4  ;;  %v214_v34 = vunpack.c.l.bf16 %v218_v23  ;;  %v50_v43 = vmul.f32 %v199_v35, %v186_v1 }
   0x6   :  { %v209_v8 = vld [vmem:[%s375_s2] sm:$0xff]   ;;  %v77_v18 = vmul.f32 %v202_v7, %v188_v4  ;;  %v78_v20 = vmul.f32 %v203_v10, %v188_v4  ;;  %v58_v24 = vadd.f32 %v187_v6, %v47_v11  ;;  %v59_v26 = vadd.f32 %v187_v6, %v48_v14 }
   0x7   :  { %v190_v9 = vld [vmem:[%s379_s7] ss:$0 sm:$0xff]  ;;  %v210_v13 = vunpack.c.l.bf16 %v209_v8  ;;  %v211_v15 = vunpack.c.h.bf16 %v209_v8  ;;  %v60_v38 = vadd.f32 %v187_v6, %v49_v30  ;;  %v61_v51 = vadd.f32 %v187_v6, %v50_v43 }
   0x8   :  { %v189_v12 = vld [vmem:[%s380_s6] ss:$0 sm:$0xff]  ;;  %v113_v42 = vmul.f32 %v214_v34, %v190_v9  ;;  %v80_v55 = vmul.f32 %v207_v47, %v188_v4  ;;  %v215_v57 = vunpack.c.h.bf16 %v218_v23 }
   0x9   :  { %v191_v19 = vld [vmem:[%s381_s8] ss:$0 sm:$0xff]  ;;  %v111_v25 = vmul.f32 %v210_v13, %v190_v9  ;;  %v112_v27 = vmul.f32 %v211_v15, %v190_v9  ;;  %v88_v28 = vadd.f32 %v189_v12, %v77_v18  ;;  %v89_v29 = vadd.f32 %v189_v12, %v78_v20 }
   0xa   :  { %v90_v39 = vadd.f32 %v189_v12, %v79_v31  ;;  %v351_v50 = vadd.f32 %v191_v19, %v113_v42  ;;  %v91_v59 = vadd.f32 %v189_v12, %v80_v55  ;;  %v114_v61 = vmul.f32 %v215_v57, %v190_v9 }
   0xb   :  { %v337_v32 = vadd.f32 %v191_v19, %v111_v25  ;;  %v339_v33 = vadd.f32 %v191_v19, %v112_v27  ;;  %v341_v36 = vadd.f32 %v88_v28, %v58_v24  ;;  %v343_v37 = vadd.f32 %v89_v29, %v59_v26 }
   0xc   :  { %v349_v46 = vadd.f32 %v90_v39, %v60_v38  ;;  %v152_v56 = vsub.f32 0.0, %v351_v50  ;;  %v95_v62 = vadd.f32 %v91_v59, %v61_v51  ;;  %v125_v63 = vadd.f32 %v191_v19, %v114_v61 }
   0xd   :  { %v150_v40 = vsub.f32 0.0, %v337_v32  ;;  %v151_v41 = vsub.f32 0.0, %v339_v33  ;;  %v126_v44 = vsub.f32 0.0, %v341_v36  ;;  %v127_v45 = vsub.f32 0.0, %v343_v37 }
   0xe   :  { %v128_v54 = vsub.f32 0.0, %v349_v46  ;;  %v158_v60 = vmul.f32 1.442695, %v152_v56  ;;  %v129_v0 = vsub.f32 0.0, %v95_v62  ;;  %v153_v1 = vsub.f32 0.0, %v125_v63 }
   0xf   :  { %v154_v48 = vmul.f32 1.442695, %v150_v40  ;;  %v156_v49 = vmul.f32 1.442695, %v151_v41  ;;  %v130_v52 = vmul.f32 1.442695, %v126_v44 }
  0x10   :  { %v132_v53 = vmul.f32 1.442695, %v127_v45  ;;  %v134_v58 = vmul.f32 1.442695, %v128_v54  ;;  %v136_v2 = vmul.f32 1.442695, %v129_v0 }
  0x11   :  { %219 = vpow2.f32 %v154_v48  ;;  %v160_v3 = vmul.f32 1.442695, %v153_v1 }
  0x12   :  { %221 = vpow2.f32 %v130_v52 }
  0x13   :  { %223 = vpow2.f32 %v132_v53 }
  0x14   :  { %225 = vpow2.f32 %v156_v49 }
  0x15   :  { %227 = vpow2.f32 %v134_v58 }
  0x16   :  { %229 = vpow2.f32 %v158_v60 }
  0x17   :  { %231 = vpow2.f32 %v136_v2 }
  0x18   :  { %233 = vpow2.f32 %v160_v3 }
  0x1b   :  { %v220_v4 = vpop.eup %219 }
  0x1c   :  { %v222_v5 = vpop.eup %221  ;;  %v162_v6 = vadd.f32 1.0, %v220_v4 }
  0x1d   :  { %v224_v7 = vpop.eup %223  ;;  %v138_v8 = vadd.f32 1.0, %v222_v5 }
  0x1e   :  { %v226_v10 = vpop.eup %225  ;;  %235 = vrcp.f32 %v162_v6  ;;  %v139_v11 = vadd.f32 1.0, %v224_v7 }
  0x1f   :  { %v228_v9 = vpop.eup %227  ;;  %237 = vrcp.f32 %v138_v8  ;;  %v163_v12 = vadd.f32 1.0, %v226_v10 }
  0x20   :  { %v230_v13 = vpop.eup %229  ;;  %239 = vrcp.f32 %v139_v11  ;;  %v140_v14 = vadd.f32 1.0, %v228_v9 }
  0x21   :  { %241 = vrcp.f32 %v163_v12  ;;  %v164_v15 = vadd.f32 1.0, %v230_v13  ;;  %v232_v16 = vpop.eup %231 }
  0x22   :  { %243 = vrcp.f32 %v140_v14  ;;  %v234_v17 = vpop.eup %233  ;;  %v141_v18 = vadd.f32 1.0, %v232_v16 }
  0x23   :  { %245 = vrcp.f32 %v164_v15  ;;  %v165_v19 = vadd.f32 1.0, %v234_v17 }
  0x24   :  { %247 = vrcp.f32 %v141_v18 }
  0x25   :  { %249 = vrcp.f32 %v165_v19 }
  0x28   :  { %v236_v20 = vpop.eup %235 }
  0x29   :  { %v238_v21 = vpop.eup %237  ;;  %v170_v22 = vmul.f32 %v236_v20, %v337_v32 }
  0x2a   :  { %v240_v23 = vpop.eup %239  ;;  %v146_v24 = vmul.f32 %v238_v21, %v341_v36 }
  0x2b   :  { %v242_v25 = vpop.eup %241  ;;  %v147_v26 = vmul.f32 %v240_v23, %v343_v37 }
  0x2c   :  { %v244_v27 = vpop.eup %243  ;;  %v174_v28 = vadd.f32 %v170_v22, %v146_v24  ;;  %v171_v29 = vmul.f32 %v242_v25, %v339_v33 }
  0x2d   :  { %v246_v30 = vpop.eup %245  ;;  %v148_v31 = vmul.f32 %v244_v27, %v349_v46 }
  0x2e   :  { %178 = vst [vmem:[%s382_s9] sm:$0xff] %v174_v28  ;;  %v175_v34 = vadd.f32 %v171_v29, %v147_v26  ;;  %v172_v32 = vmul.f32 %v246_v30, %v351_v50  ;;  %v248_v36 = vpop.eup %247 }
  0x2f   :  { %v250_v37 = vpop.eup %249  ;;  %v149_v33 = vmul.f32 %v248_v36, %v95_v62 }
  0x30   :  { %179 = vst [vmem:[%s382_s9 + $0x8] sm:$0xff] %v175_v34  ;;  %v176_v35 = vadd.f32 %v172_v32, %v148_v31  ;;  %v173_v38 = vmul.f32 %v250_v37, %v125_v63 }
  0x32   :  { %180 = vst [vmem:[%s382_s9 + $0x10] sm:$0xff] %v176_v35  ;;  %v177_v39 = vadd.f32 %v173_v38, %v149_v33 }
  0x34   :  { %181 = vst [vmem:[%s382_s9 + $0x18] sm:$0xff] %v177_v39 }

// kernel: repc3_forward.11
= control target key start
LH: loop header
LB: loop body
LE: loop exit
PB: predicated region body
PF: predicated region fallthrough
CT: control target
= control target key end

     0   :  { %s257_s0 = inlined_call_operand.vmem [shape: bf16[32,128], index: 0, kind: input, shape index: {}]   ;;  %s258_s1 = inlined_call_operand.vmem [shape: bf16[32,128], index: 1, kind: input, shape index: {}]   ;;  %s259_s2 = inlined_call_operand.vmem [shape: f32[1,128], index: 2, kind: input, shape index: {}]   ;;  %s260_s3 = inlined_call_operand.vmem [shape: f32[1,128], index: 3, kind: input, shape index: {}]   ;;  %s261_s4 = inlined_call_operand.vmem [shape: f32[1,128], index: 4, kind: input, shape index: {}]   ;;  %s262_s5 = inlined_call_operand.vmem [shape: f32[1,128], index: 5, kind: input, shape index: {}]   ;;  %s263_s6 = inlined_call_operand.vmem [shape: bf16[32,128], index: 6, kind: output, shape index: {}]  }
   0x1   :  { %v148_v0 = vld [vmem:[%s257_s0] sm:$0xff]   ;;  %v173_v9 = vld [vmem:[%s257_s0 + $0x8] sm:$0xff]  }
   0x2   :  { %v135_v1 = vld [vmem:[%s259_s2] ss:$0 sm:$0xff]  ;;  %v149_v2 = vunpack.c.l.bf16 %v148_v0  ;;  %v150_v3 = vunpack.c.h.bf16 %v148_v0  ;;  %v174_v10 = vld [vmem:[%s258_s1 + $0x8] sm:$0xff]   ;;  %v153_v14 = vunpack.c.l.bf16 %v173_v9  ;;  %v154_v15 = vunpack.c.h.bf16 %v173_v9 }
   0x3   :  { %v156_v4 = vld [vmem:[%s258_s1] sm:$0xff]   ;;  %v161_v18 = vunpack.c.l.bf16 %v174_v10  ;;  %v162_v19 = vunpack.c.h.bf16 %v174_v10 }
   0x4   :  { %v137_v5 = vld [vmem:[%s261_s4] ss:$0 sm:$0xff]  ;;  %v157_v7 = vunpack.c.l.bf16 %v156_v4  ;;  %v158_v8 = vunpack.c.h.bf16 %v156_v4  ;;  %v38_v11 = vmul.f32 %v149_v2, %v135_v1  ;;  %v39_v12 = vmul.f32 %v150_v3, %v135_v1 }
   0x5   :  { %v136_v6 = vld [vmem:[%s260_s3] ss:$0 sm:$0xff]  ;;  %v40_v22 = vmul.f32 %v153_v14, %v135_v1  ;;  %v41_v23 = vmul.f32 %v154_v15, %v135_v1  ;;  %v70_v26 = vmul.f32 %v161_v18, %v137_v5  ;;  %v71_v27 = vmul.f32 %v162_v19, %v137_v5 }
   0x6   :  { %v138_v13 = vld [vmem:[%s262_s5] ss:$0 sm:$0xff]  ;;  %v68_v16 = vmul.f32 %v157_v7, %v137_v5  ;;  %v69_v17 = vmul.f32 %v158_v8, %v137_v5  ;;  %v49_v20 = vadd.f32 %v136_v6, %v38_v11  ;;  %v50_v21 = vadd.f32 %v136_v6, %v39_v12 }
   0x7   :  { %v51_v28 = vadd.f32 %v136_v6, %v40_v22  ;;  %v52_v29 = vadd.f32 %v136_v6, %v41_v23  ;;  %v81_v32 = vadd.f32 %v138_v13, %v70_v26  ;;  %v82_v33 = vadd.f32 %v138_v13, %v71_v27 }
   0x8   :  { %v79_v24 = vadd.f32 %v138_v13, %v68_v16  ;;  %v80_v25 = vadd.f32 %v138_v13, %v69_v17 }
   0x9   :  { %v85_v36 = vadd.f32 %v81_v32, %v51_v28  ;;  %v86_v37 = vadd.f32 %v82_v33, %v52_v29 }
   0xa   :  { %v83_v30 = vadd.f32 %v79_v24, %v49_v20  ;;  %v84_v31 = vadd.f32 %v80_v25, %v50_v21 }
   0xb   :  { %v89_v40 = vsub.f32 0.0, %v85_v36  ;;  %v90_v41 = vsub.f32 0.0, %v86_v37 }
   0xc   :  { %v87_v34 = vsub.f32 0.0, %v83_v30  ;;  %v88_v35 = vsub.f32 0.0, %v84_v31 }
   0xd   :  { %v95_v42 = vmul.f32 1.442695, %v89_v40  ;;  %v97_v43 = vmul.f32 1.442695, %v90_v41 }
   0xe   :  { %v91_v38 = vmul.f32 1.442695, %v87_v34  ;;  %v93_v39 = vmul.f32 1.442695, %v88_v35 }
  0x10   :  { %176 = vpow2.f32 %v91_v38 }
  0x11   :  { %178 = vpow2.f32 %v93_v39 }
  0x12   :  { %180 = vpow2.f32 %v95_v42 }
  0x13   :  { %182 = vpow2.f32 %v97_v43 }
  0x1a   :  { %v177_v44 = vpop.eup %176 }
  0x1b   :  { %v179_v45 = vpop.eup %178  ;;  %v99_v46 = vadd.f32 1.0, %v177_v44 }
  0x1c   :  { %v181_v47 = vpop.eup %180  ;;  %v100_v48 = vadd.f32 1.0, %v179_v45 }
  0x1d   :  { %v183_v49 = vpop.eup %182  ;;  %184 = vrcp.f32 %v99_v46  ;;  %v101_v50 = vadd.f32 1.0, %v181_v47 }
  0x1e   :  { %186 = vrcp.f32 %v100_v48  ;;  %v102_v51 = vadd.f32 1.0, %v183_v49 }
  0x1f   :  { %188 = vrcp.f32 %v101_v50 }
  0x20   :  { %190 = vrcp.f32 %v102_v51 }
  0x27   :  { %v185_v52 = vpop.eup %184 }
  0x28   :  { %v187_v53 = vpop.eup %186  ;;  %v107_v54 = vmul.f32 %v185_v52, %v83_v30 }
  0x29   :  { %v189_v55 = vpop.eup %188  ;;  %v108_v56 = vmul.f32 %v187_v53, %v84_v31 }
  0x2a   :  { %v191_v57 = vpop.eup %190  ;;  %v109_v58 = vmul.f32 %v189_v55, %v85_v36 }
  0x2b   :  { %v166_v59 = vpack.c.bf16 %v108_v56, %v107_v54  ;;  %v110_v60 = vmul.f32 %v191_v57, %v86_v37 }
  0x2d   :  { %167 = vst [vmem:[%s263_s6] sm:$0xff] %v166_v59   ;;  %v171_v61 = vpack.c.bf16 %v110_v60, %v109_v58 }
  0x2f   :  { %175 = vst [vmem:[%s263_s6 + $0x8] sm:$0xff] %v171_v61  }

// kernel: repc3_forward.10
= control target key start
LH: loop header
LB: loop body
LE: loop exit
PB: predicated region body
PF: predicated region fallthrough
CT: control target
= control target key end

     0   :  { %s5159_s24 = smov 0   ;;  %s5161_s1 = smov 0   ;;  %s6908_s0 = inlined_call_operand.vmem [shape: bf16[2,16,16,8], index: 0, kind: input, shape index: {}, may-alias: {0,1,2}]   ;;  %s6909_s1 = inlined_call_operand.vmem [shape: bf16[2,16,16,8], index: 1, kind: input, shape index: {}, may-alias: {0,1,2}]   ;;  %s6910_s2 = inlined_call_operand.vmem [shape: bf16[2,16,16,8], index: 2, kind: input, shape index: {}, may-alias: {0,1,2}]   ;;  %s6911_s3 = inlined_call_operand.vmem [shape: bf16[72,8], index: 3, kind: input, shape index: {}]   ;;  %s6912_s4 = inlined_call_operand.vmem [shape: bf16[8,8], index: 4, kind: input, shape index: {}]   ;;  %s6913_s5 = inlined_call_operand.vmem [shape: bf16[512,8], index: 5, kind: output, shape index: {0}]   ;;  %s6914_s6 = inlined_call_operand.vmem [shape: bf16[512,8], index: 6, kind: output, shape index: {1}]   ;;  %s6915_s7 = inlined_call_operand.vmem [shape: f32[16,8], index: 7, kind: output, shape index: {2}]  }
   0x1   :  { %s5163_s2 = smov 0  }
   0x2 LB: > { %s30_s25 = sadd.s32 1, %s5104_s1  ;;  %p4419_p0 = scmp.ge.s32.totalorder %s5108_s2, 1  ;;  %s5108_s2 = sphi %s5163_s2, %s18_s2   ;;  %s5104_s1 = sphi %s5161_s1, %s6928_s1   ;;  %s5100_s24 = sphi %s5159_s24, %s6927_s24  }
   0x3   : > { %p32_p1 = scmp.ge.s32.totalorder %s30_s25, 2  ;;  %p332_p2 = scmp.lt.s32.totalorder %s5108_s2, 3 }
   0x5   : > { %s6930_s25 = smov (%p32_p1, %s30_s25), 0  ;;  %p333_p3 = pnand %p4419_p0, %p332_p2 }
   0x6   : > { %vm519_vm0 = vcmask (!%p333_p3), 60416   ;;  %vm6916_vm1 = vcmask (!%p333_p3), 57344   ;;  %vm575_vm2 = vsmask.f32 (!%p333_p3), 256  ;;  %v5110_v0 = vmov (!%p333_p3), 0   ;;  %p408_p4 = scmp.lt.s32.totalorder (!%p333_p3), %s5100_s24, 1 }
   0x7   : > { %336 = sbr.rel (%p333_p3) target bundleno = 656 (0x290), region = 40  ;;  %520 = vst.msk [vmem:[#allocation2] sm:$0xf] (!%p333_p3), %vm519_vm0, %v5110_v0  ;;  %521 = vst.msk [vmem:[#allocation2 + $0x4] sm:$0xf] (!%p333_p3), %vm519_vm0, %v5110_v0  ;;  %v5182_v1 = vrot.slane (!%p333_p3), %v5110_v0, 7 }
   0x8   : > { %523 = vst.msk [vmem:[#allocation2 + $0x8] sm:$0x1] (!%p333_p3), %vm6916_vm1, %v5110_v0  ;;  %vm576_vm3 = vsmask.f32 (!%p333_p3), 4368  ;;  %526 = vst.msk [vmem:[#allocation2 + $0x14] sm:$0x1] (!%p333_p3), %vm6916_vm1, %v5110_v0 }
   0x9   : > { %524 = vst.msk [vmem:[#allocation2 + $0xc] sm:$0xf] (!%p333_p3), %vm519_vm0, %v5110_v0  ;;  %525 = vst.msk [vmem:[#allocation2 + $0x10] sm:$0xf] (!%p333_p3), %vm519_vm0, %v5110_v0  ;;  %v5243_v3 = vrot.slane (!%p333_p3), %v5182_v1, 4  ;;  %vm1665_vm8 = vcmask (!%p333_p3), 1046528  }
   0xa   : > { %527 = vst.msk [vmem:[#allocation2 + $0x18] sm:$0xf] (!%p333_p3), %vm519_vm0, %v5110_v0  ;;  %528 = vst.msk [vmem:[#allocation2 + $0x1c] sm:$0xf] (!%p333_p3), %vm519_vm0, %v5110_v0  ;;  %vm599_vm5 = vsmask.f32 (!%p333_p3), 7938 }
   0xb   : > { %529 = vst.msk [vmem:[#allocation2 + $0x20] sm:$0x1] (!%p333_p3), %vm6916_vm1, %v5110_v0  ;;  %532 = vst.msk [vmem:[#allocation2 + $0x2c] sm:$0x1] (!%p333_p3), %vm6916_vm1, %v5110_v0  ;;  %vm1392_vm9 = vsmask.f32 (!%p333_p3), 7424 }
   0xc   : > { %530 = vst.msk [vmem:[#allocation2 + $0x24] sm:$0xf] (!%p333_p3), %vm519_vm0, %v5110_v0  ;;  %531 = vst.msk [vmem:[#allocation2 + $0x28] sm:$0xf] (!%p333_p3), %vm519_vm0, %v5110_v0  ;;  %s5111_s8 = smov (!%p333_p3), 16   ;;  %s5112_s9 = smov (!%p333_p3), 24  }
   0xd   : > { %533 = vst.msk [vmem:[#allocation2 + $0x30] sm:$0xf] (!%p333_p3), %vm519_vm0, %v5110_v0  ;;  %534 = vst.msk [vmem:[#allocation2 + $0x34] sm:$0xf] (!%p333_p3), %vm519_vm0, %v5110_v0  ;;  %s5113_s10 = smov (!%p333_p3), 48   ;;  %s5114_s13 = smov (!%p333_p3), 8  }
   0xe   : > { %535 = vst.msk [vmem:[#allocation2 + $0x38] sm:$0x1] %vm6916_vm1, %v5110_v0  ;;  %538 = vst.msk [vmem:[#allocation2 + $0x44] sm:$0x1] %vm6916_vm1, %v5110_v0  ;;  %s5246_s26 = scalar_select %p408_p4, %s5100_s24, 1  ;;  %vm3103_vm10 = vcmask 1043456  }
   0xf   : > { %536 = vst.msk [vmem:[#allocation2 + $0x3c] sm:$0xf] %vm519_vm0, %v5110_v0  ;;  %537 = vst.msk [vmem:[#allocation2 + $0x40] sm:$0xf] %vm519_vm0, %v5110_v0  ;;  %v601_v7 = vld [vmem:[#allocation2] sm:$0xf] }
  0x10   : > { %539 = vst.msk [vmem:[#allocation2 + $0x48] sm:$0xf] %vm519_vm0, %v5110_v0  ;;  %540 = vst.msk [vmem:[#allocation2 + $0x4c] sm:$0xf] %vm519_vm0, %v5110_v0  ;;  %s4694_s27 = sshll.u32 %s5246_s26, 7  ;;  %s5115_s16 = smov 40  }
  0x11   : > { %541 = vst.msk [vmem:[#allocation2 + $0x50] sm:$0x1] %vm6916_vm1, %v5110_v0  ;;  %544 = vst.msk [vmem:[#allocation2 + $0x5c] sm:$0x1] %vm6916_vm1, %v5110_v0  ;;  %s5269_s30 = scalar_lea.vmem %s6908_s0, %s4694_s27  ;;  %v607_v8 = vld [vmem:[#allocation2 + $0x8] sm:$0x1] }
  0x12   : > { %542 = vst.msk [vmem:[#allocation2 + $0x54] sm:$0xf] %vm519_vm0, %v5110_v0  ;;  %543 = vst.msk [vmem:[#allocation2 + $0x58] sm:$0xf] %vm519_vm0, %v5110_v0  ;;  %v475_v9 = vld [vmem:[%s5269_s30] sm:$0xf] }
  0x13   : > { %545 = vst.msk [vmem:[#allocation2 + $0x60] sm:$0xf] %vm519_vm0, %v5110_v0  ;;  %546 = vst.msk [vmem:[#allocation2 + $0x64] sm:$0xf] %vm519_vm0, %v5110_v0  ;;  %v476_v12 = vld [vmem:[%s5269_s30 + $0x4] sm:$0xf] }
  0x14   : > { %547 = vst.msk [vmem:[#allocation2 + $0x68] sm:$0x1] %vm6916_vm1, %v5110_v0  ;;  %550 = vst.msk [vmem:[#allocation2 + $0x74] sm:$0x1] %vm6916_vm1, %v5110_v0  ;;  %v611_v13 = vshrl.u32 %v475_v9, 16  ;;  %v614_v14 = vshll.u32 %v475_v9, 16 }
  0x15   : > { %548 = vst.msk [vmem:[#allocation2 + $0x6c] sm:$0xf] %vm519_vm0, %v5110_v0  ;;  %549 = vst.msk [vmem:[#allocation2 + $0x70] sm:$0xf] %vm519_vm0, %v5110_v0  ;;  %v619_v15 = vshrl.u32 %v476_v12, 16  ;;  %v622_v16 = vshll.u32 %v476_v12, 16 }
  0x16   : > { %551 = vst.msk [vmem:[#allocation2 + $0x78] sm:$0xf] %vm519_vm0, %v5110_v0  ;;  %552 = vst.msk [vmem:[#allocation2 + $0x7c] sm:$0xf] %vm519_vm0, %v5110_v0  ;;  %v477_v17 = vld [vmem:[%s5269_s30 + $0x8] sm:$0xf] }
  0x17   : > { %553 = vst.msk [vmem:[#allocation2 + $0x80] sm:$0x1] %vm6916_vm1, %v5110_v0  ;;  %556 = vst.msk [vmem:[#allocation2 + $0x8c] sm:$0x1] %vm6916_vm1, %v5110_v0  ;;  %v478_v18 = vld [vmem:[%s5269_s30 + $0xc] sm:$0xf] }
  0x18   : > { %554 = vst.msk [vmem:[#allocation2 + $0x84] sm:$0xf] %vm519_vm0, %v5110_v0  ;;  %555 = vst.msk [vmem:[#allocation2 + $0x88] sm:$0xf] %vm519_vm0, %v5110_v0  ;;  %v613_v19 = vrot.slane %v611_v13, 7  ;;  %v628_v21 = vshrl.u32 %v477_v17, 16 }
  0x19   : > { %557 = vst.msk [vmem:[#allocation2 + $0x90] sm:$0xf] %vm519_vm0, %v5110_v0  ;;  %558 = vst.msk [vmem:[#allocation2 + $0x94] sm:$0xf] %vm519_vm0, %v5110_v0  ;;  %v931_v20 = vld [vmem:[#allocation2 + $0xc] sm:$0xf] }
  0x1a   : > { %559 = vst.msk [vmem:[#allocation2 + $0x98] sm:$0x1] %vm6916_vm1, %v5110_v0  ;;  %562 = vst.msk [vmem:[#allocation2 + $0xa4] sm:$0x1] %vm6916_vm1, %v5110_v0  ;;  %v631_v22 = vshll.u32 %v477_v17, 16  ;;  %v636_v23 = vshrl.u32 %v478_v18, 16  ;;  %v616_v28 = vor.u32 %v614_v14, %v613_v19 }
  0x1b   : > { %560 = vst.msk [vmem:[#allocation2 + $0x9c] sm:$0xf] %vm519_vm0, %v5110_v0  ;;  %561 = vst.msk [vmem:[#allocation2 + $0xa0] sm:$0xf] %vm519_vm0, %v5110_v0  ;;  %v621_v24 = vrot.slane %v619_v15, 7  ;;  %v639_v25 = vshll.u32 %v478_v18, 16 }
  0x1c   : > { %563 = vst.msk [vmem:[#allocation2 + $0xa8] sm:$0xf] %vm519_vm0, %v5110_v0  ;;  %564 = vst.msk [vmem:[#allocation2 + $0xac] sm:$0xf] %vm519_vm0, %v5110_v0  ;;  %v479_v26 = vld [vmem:[%s5269_s30 + $0x10] sm:$0xf] }
  0x1d   : > { %565 = vst.msk [vmem:[#allocation2 + $0xb0] sm:$0x1] %vm6916_vm1, %v5110_v0  ;;  %568 = vst.msk [vmem:[#allocation2 + $0xbc] sm:$0x1] %vm6916_vm1, %v5110_v0  ;;  %v480_v27 = vld [vmem:[%s5269_s30 + $0x14] sm:$0xf]  ;;  %v624_v32 = vor.u32 %v622_v16, %v621_v24 }
  0x1e   : > { %566 = vst.msk [vmem:[#allocation2 + $0xb4] sm:$0xf] %vm519_vm0, %v5110_v0  ;;  %567 = vst.msk [vmem:[#allocation2 + $0xb8] sm:$0xf] %vm519_vm0, %v5110_v0  ;;  %v617_v29 = vrot.slane %v613_v19, 4  ;;  %v630_v30 = vrot.slane %v628_v21, 7 }
  0x1f   : > { %569 = vst.msk [vmem:[#allocation2 + $0xc0] sm:$0xf] %vm519_vm0, %v5110_v0  ;;  %570 = vst.msk [vmem:[#allocation2 + $0xc4] sm:$0xf] %vm519_vm0, %v5110_v0  ;;  %v638_v31 = vrot.slane %v636_v23, 7  ;;  %v645_v34 = vshrl.u32 %v479_v26, 16 }
  0x20   : > { %571 = vst.msk [vmem:[#allocation2 + $0xc8] sm:$0x1] %vm6916_vm1, %v5110_v0  ;;  %574 = vst.msk [vmem:[#allocation2 + $0xd4] sm:$0x1] %vm6916_vm1, %v5110_v0  ;;  %v938_v33 = vld [vmem:[#allocation2 + $0x18] sm:$0xf]  ;;  %v633_v39 = vor.u32 %v631_v22, %v630_v30 }
  0x21   : > { %572 = vst.msk [vmem:[#allocation2 + $0xcc] sm:$0xf] %vm519_vm0, %v5110_v0  ;;  %573 = vst.msk [vmem:[#allocation2 + $0xd0] sm:$0xf] %vm519_vm0, %v5110_v0  ;;  %v648_v35 = vshll.u32 %v479_v26, 16  ;;  %v653_v36 = vshrl.u32 %v480_v27, 16  ;;  %v641_v41 = vor.u32 %v639_v25, %v638_v31 }
  0x22   : > { %vm5237_vm4 = vmor %vm575_vm2, %vm576_vm3  ;;  %v634_v40 = vrot.slane %v630_v30, 4  ;;  %v945_v42 = vld [vmem:[#allocation2 + $0x24] sm:$0xf]  ;;  %v647_v44 = vrot.slane %v645_v34, 7  ;;  %v656_v46 = vshll.u32 %v480_v27, 16  ;;  %v626_v59 = vrot.slane %v621_v24, 4 }
  0x23   : > { %v593_v4 = vsel %vm5237_vm4, %v5243_v3, %v5182_v1  ;;  %vm5254_vm6 = vmand %vm6916_vm1, %vm575_vm2  ;;  %v625_v43 = vsel %vm5237_vm4, %v617_v29, %v624_v32  ;;  %v655_v45 = vrot.slane %v653_v36, 7  ;;  %v935_v47 = vld [vmem:[#allocation2 + $0x14] sm:$0x1]  ;;  %v942_v57 = vld [vmem:[#allocation2 + $0x20] sm:$0x1]  ;;  %v643_v60 = vrot.slane %v638_v31, 4 }
  0x24   : > { %vm5259_vm7 = vmand %vm519_vm0, %vm599_vm5  ;;  %604 = vst.msk [vmem:[#allocation2 + $0x4] sm:$0xf] %vm519_vm0, %v593_v4  ;;  %v608_v11 = vsel %vm5254_vm6, %v5243_v3, %v607_v8  ;;  %v642_v50 = vsel %vm5237_vm4, %v634_v40, %v641_v41  ;;  %v650_v55 = vor.u32 %v648_v35, %v647_v44  ;;  %v651_v56 = vrot.slane %v647_v44, 4  ;;  %v949_v62 = vld [vmem:[#allocation2 + $0x2c] sm:$0x1]  ;;  %s5116_s19 = smov 64  }
  0x25   : > { %1067 = vst.msk [vmem:[#allocation2 + $0xd0] sm:$0xf] %vm519_vm0, %v593_v4  ;;  %v602_v10 = vsel %vm5259_vm7, %v5182_v1, %v601_v7  ;;  %609 = vst [vmem:[#allocation2 + $0x8] sm:$0x1] %v608_v11  ;;  %v932_v38 = vsel %vm5259_vm7, %v616_v28, %v931_v20  ;;  %v939_v51 = vsel %vm5259_vm7, %v633_v39, %v938_v33  ;;  %v660_v61 = vrot.slane %v655_v45, 4  ;;  %s5117_s22 = smov 32  }
  0x26   : > { %603 = vst [vmem:[#allocation2] sm:$0xf] %v602_v10  ;;  %933 = vst [vmem:[#allocation2 + $0xc] sm:$0xf] %v932_v38  ;;  %v658_v58 = vor.u32 %v656_v46, %v655_v45  ;;  %v946_v4 = vsel %vm5259_vm7, %v650_v55, %v945_v42  ;;  %v936_v9 = vsel %vm5254_vm6, %v626_v59, %v935_v47  ;;  %v5310_v14 = vld [vmem:[%s5269_s30 + $0x18] sm:$0xf] }
  0x27   : > { %934 = vst.msk [vmem:[#allocation2 + $0x10] sm:$0xf] %vm519_vm0, %v625_v43  ;;  %940 = vst [vmem:[#allocation2 + $0x18] sm:$0xf] %v939_v51  ;;  %v943_v12 = vsel %vm5254_vm6, %v643_v60, %v942_v57  ;;  %v950_v13 = vsel %vm5254_vm6, %v660_v61, %v949_v62  ;;  %v662_v36 = vshrl.u32 %v5310_v14, 16  ;;  %s5118_s23 = smov 56  }
  0x28   : > { %941 = vst.msk [vmem:[#allocation2 + $0x1c] sm:$0xf] %vm519_vm0, %v642_v50  ;;  %v659_v7 = vsel %vm5237_vm4, %v651_v56, %v658_v58  ;;  %947 = vst [vmem:[#allocation2 + $0x24] sm:$0xf] %v946_v4  ;;  %vm2770_vm11 = vcmask 64512   ;;  %vm2803_vm12 = vcmask 130048  }
  0x29   : > { %948 = vst.msk [vmem:[#allocation2 + $0x28] sm:$0xf] %vm519_vm0, %v659_v7  ;;  %937 = vst [vmem:[#allocation2 + $0x14] sm:$0x1] %v936_v9  ;;  %vm2836_vm13 = vcmask 195584   ;;  %vm2869_vm14 = vcmask 261120  }
  0x2a   : > { %944 = vst [vmem:[#allocation2 + $0x20] sm:$0x1] %v943_v12  ;;  %951 = vst [vmem:[#allocation2 + $0x2c] sm:$0x1] %v950_v13  ;;  %vm2902_vm15 = vcmask 326656   ;;  %vm2935_vm2 = vcmask 392192  }
  0x2b   : > { %v1072_v37 = vld [vmem:[#allocation2 + $0x4] sm:$0xf]  ;;  %vm3001_vm3 = vcmask 523264   ;;  %vm2968_vm5 = vcmask 457728   ;;  %vm3070_vm1 = vcmask 588800   ;;  %s4430_s15 = sshll.u32 %s5246_s26, 3 }
  0x2c   : > { %v4911_v52 = vld [vmem:[#allocation2 + $0x8] ss:$0 sps:$4 sm:$0x11]   ;;  %s6841_s18 = scalar_lea.vmem %s6915_s7, %s4430_s15 }
  0x2d   : > { %v1119_v48 = vld [vmem:[#allocation2] sm:$0xe]  ;;  %v1667_v0 = vrot.slane %v4911_v52, 1  ;;  %v1135_v15 = vld [vmem:[#allocation2 + $0xc] sm:$0xf]  ;;  %v1401_v18 = vshll.u32 %v4911_v52, 16 }
  0x2e   : > { %v1071_v49 = vld [vmem:[#allocation2] sm:$0xf]  ;;  %v4463_v53 = vcombine.low %v1119_v48, %v1072_v37  ;;  %v1183_v16 = vld [vmem:[#allocation2 + $0xc] sm:$0xe]  ;;  %v1136_v19 = vld [vmem:[#allocation2 + $0x10] sm:$0xf] }
  0x2f   : > { %v5292_v54 = vcombine.low %v1071_v49, %v1072_v37  ;;  %v1074_v20 = vld [vmem:[#allocation2 + $0x10] sm:$0xf]  ;;  %v1120_v21 = vld [vmem:[#allocation2 + $0xc] sm:$0xe]  ;;  %v5313_v22 = vcombine.low %v1135_v15, %v1136_v19  ;;  %v4511_v23 = vcombine.low %v1183_v16, %v1136_v19  ;;  %v1137_v24 = vld [vmem:[#allocation2 + $0x18] sm:$0xf] }
  0x30   : > { %v1666_v63 = vrot.slane %v4463_v53, 1  ;;  %v1138_v25 = vld [vmem:[#allocation2 + $0x1c] sm:$0xf]  ;;  %v1184_v26 = vld [vmem:[#allocation2 + $0x18] sm:$0xe]  ;;  %v4464_v27 = vcombine.low %v1120_v21, %v1074_v20  ;;  %v1403_v35 = vrot.slane %v1401_v18, 1 }
  0x31   : > { %v1396_v8 = vshll.u32 %v5292_v54, 16  ;;  %v1394_v11 = vshrl.u32 %v5292_v54, 16  ;;  %v4480_v28 = vcombine.low %v1137_v24, %v1138_v25  ;;  %v4512_v29 = vcombine.low %v1184_v26, %v1138_v25  ;;  %v1200_v30 = vld [vmem:[#allocation2 + $0x18] sm:$0xf]  ;;  %v1201_v31 = vld [vmem:[#allocation2 + $0x1c] sm:$0xf]  ;;  %1826 = vrot.lane.b32.xlu0 %v5313_v22, %s5112_s9 }
  0x32   : > { %v1668_v10 = vsel %vm1665_vm8, %v1666_v63, %v1667_v0  ;;  %v1248_v32 = vld [vmem:[#allocation2 + $0x18] sm:$0xe]  ;;  %v5317_v33 = vcombine.low %v1200_v30, %v1201_v31  ;;  %v1909_v37 = vshll.u32 %v5313_v22, 16  ;;  %v1202_v39 = vld [vmem:[#allocation2 + $0x24] sm:$0xf]  ;;  %v1669_v43 = vrot.slane %v4464_v27, 1 }
  0x33   : > { %1714 = vrot.lane.b32.xlu1 %v1668_v10, %s5111_s8  ;;  %v1398_v17 = vrot.slane %v1396_v8, 1  ;;  %v4559_v34 = vcombine.low %v1248_v32, %v1201_v31  ;;  %v1921_v38 = vshll.u32 %v4480_v28, 16  ;;  %v1073_v41 = vld [vmem:[#allocation2 + $0xc] sm:$0xf]  ;;  %v5322_v42 = vld [vmem:[#allocation2 + $0x28] sm:$0xf] }
  0x34   : > { %v2178_v44 = vrot.slane %v4511_v23, 1  ;;  %v4528_v45 = vcombine.low %v1202_v39, %v5322_v42  ;;  %v4922_v46 = vld [vmem:[#allocation2 + $0x14] ss:$0 sps:$4 sm:$0x11]   ;;  %v2181_v47 = vrot.slane %v4512_v29, 1  ;;  %v5327_v48 = vcombine.low %v1073_v41, %v1074_v20  ;;  %v4987_v63 = vld [vmem:[%s6911_s3] sm:$0xff]  }
  0x35   : > { %v1399_v40 = vor.u32 %v1398_v17, %v1394_v11  ;;  %2338 = vrot.lane.b32.xlu0 %v5317_v33, %s5113_s10  ;;  %v4925_v49 = vld [vmem:[#allocation2 + $0x14] ss:$0 sps:$4 sm:$0x11]   ;;  %v2690_v50 = vrot.slane %v4559_v34, 1  ;;  %v1670_v53 = vrot.slane %v4922_v46, 1  ;;  %v1919_v56 = vshrl.u32 %v4480_v28, 16  ;;  %4800 = vmatprep.subr.bf16.mxu0 %v4987_v63 }
  0x36   : > { %v2433_v51 = vshll.u32 %v4528_v45, 16  ;;  %v4926_v55 = vld [vmem:[#allocation2 + $0x20] ss:$0 sps:$4 sm:$0x11]   ;;  %v2179_v57 = vrot.slane %v4925_v49, 1  ;;  %v1923_v61 = vrot.slane %v1921_v38, 1  ;;  %4801 = vmatpush3.bf16.msra.mxu0 %v4987_v63 }
  0x37   : > { %1828 = vrot.lane.b32.xlu1 %v4480_v28, %s5112_s9  ;;  %v1404_v52 = vsel %vm1392_vm9, %v1399_v40, %v1403_v35  ;;  %v5331_v58 = vld [vmem:[#allocation2 + $0x20] ss:$0 sps:$4 sm:$0x11]   ;;  %v1671_v59 = vsel %vm1665_vm8, %v1669_v43, %v1670_v53  ;;  %v2182_v60 = vrot.slane %v4926_v55, 1  ;;  %v1926_v62 = vshll.u32 %v4926_v55, 16  ;;  %v4989_v26 = vld [vmem:[%s6911_s3 + $0x8] sm:$0xff]  }
  0x38   : > { %v2691_v0 = vrot.slane %v5331_v58, 1  ;;  %v1406_v4 = vshrl.u32 %v5327_v48, 16  ;;  %v1408_v7 = vshll.u32 %v5327_v48, 16  ;;  %v5341_v8 = vld [vmem:[#allocation2 + $0x2c] ss:$0 sps:$4 sm:$0x11]   ;;  %v2180_v10 = vsel %vm1665_vm8, %v2178_v44, %v2179_v57  ;;  %4802 = vmatprep.subr.bf16.mxu0 %v4989_v26 }
  0x39   : > { %1585 = vrot.lane.b32.xlu0 %v1404_v52, %s5114_s13  ;;  %v1075_v9 = vld [vmem:[#allocation2 + $0x18] sm:$0xf]  ;;  %v2183_v11 = vsel %vm1665_vm8, %v2181_v47, %v2182_v60  ;;  %v1928_v12 = vrot.slane %v1926_v62, 1  ;;  %v1413_v13 = vshll.u32 %v4922_v46, 16  ;;  %v5346_v15 = vld [vmem:[#allocation2 + $0x1c] sm:$0xf]  ;;  %v1924_v16 = vor.u32 %v1923_v61, %v1919_v56 }
  0x3a   : > { %v1410_v17 = vrot.slane %v1408_v7, 1  ;;  %v2431_v18 = vshrl.u32 %v4528_v45, 16  ;;  %v2435_v19 = vrot.slane %v2433_v51, 1  ;;  %v5348_v20 = vld [vmem:[#allocation2 + $0x20] ss:$0 sps:$4 sm:$0x11]   ;;  %v2692_v30 = vsel %vm1665_vm8, %v2690_v50, %v2691_v0  ;;  %4803 = vmatpush3.bf16.msra.mxu0 %v4989_v26 }
  0x3b   : > { %2340 = vrot.lane.b32.xlu1 %v4528_v45, %s5113_s10  ;;  %v2421_v21 = vshll.u32 %v5317_v33, 16  ;;  %v1249_v23 = vld [vmem:[#allocation2 + $0x24] sm:$0xe]  ;;  %v2438_v24 = vshll.u32 %v5341_v8, 16  ;;  %v1907_v25 = vshrl.u32 %v5313_v22, 16  ;;  %v1911_v27 = vrot.slane %v1909_v37, 1 }
  0x3c   : > { %v1914_v28 = vshll.u32 %v4925_v49, 16  ;;  %v1077_v29 = vld [vmem:[#allocation2 + $0x24] sm:$0xf]  ;;  %v1411_v31 = vor.u32 %v1410_v17, %v1406_v4  ;;  %v1415_v32 = vrot.slane %v1413_v13, 1  ;;  %v5360_v34 = vcombine.low %v1075_v9, %v5346_v15  ;;  %v1078_v22 = vld [vmem:[#allocation2 + $0x28] sm:$0xf] }
  0x3d   : > { %2226 = vrot.lane.b32.xlu0 %v2180_v10, %s5115_s16  ;;  %v5362_v35 = vld [vmem:[#allocation2 + $0x2c] ss:$0 sps:$4 sm:$0x11]   ;;  %v1929_v38 = vsel %vm1392_vm9, %v1924_v16, %v1928_v12  ;;  %v2436_v39 = vor.u32 %v2435_v19, %v2431_v18  ;;  %v2440_v40 = vrot.slane %v2438_v24, 1  ;;  %v1425_v37 = vshll.u32 %v5348_v20, 16  ;;  %v4993_v46 = vld [vmem:[%s6911_s3 + $0x10] sm:$0xff]  }
  0x3e   : > { %v1912_v41 = vor.u32 %v1911_v27, %v1907_v25  ;;  %v1916_v43 = vrot.slane %v1914_v28, 1  ;;  %v1418_v44 = vshrl.u32 %v5360_v34, 16  ;;  %v1420_v45 = vshll.u32 %v5360_v34, 16  ;;  %v1122_v52 = vld [vmem:[#allocation2 + $0x24] sm:$0xe]  ;;  %v4997_v53 = vld [vmem:[%s6911_s3 + $0x18] sm:$0xff]   ;;  %4804 = vmatprep.subr.bf16.mxu0 %v4993_v46 }
  0x3f   : > { %1716 = vrot.lane.b32.xlu1 %v1671_v59, %s5111_s8  ;;  %v4560_v47 = vcombine.low %v1249_v23, %v5322_v42  ;;  %v2419_v49 = vshrl.u32 %v5317_v33, 16  ;;  %v2423_v50 = vrot.slane %v2421_v21, 1  ;;  %v5374_v51 = vcombine.low %v1077_v29, %v1078_v22  ;;  %4805 = vmatpush3.bf16.msra.mxu0 %v4993_v46  ;;  %v1121_v4 = vld [vmem:[#allocation2 + $0x18] sm:$0xe]  ;;  %v482_v7 = vld [vmem:[%s5269_s30 + $0x1c] sm:$0xf] }
  0x40   : > { %v1416_v55 = vsel %vm1392_vm9, %v1411_v31, %v1415_v32  ;;  %v1422_v42 = vrot.slane %v1420_v45, 1  ;;  %v2426_v56 = vshll.u32 %v5331_v58, 16  ;;  %v1437_v57 = vshll.u32 %v5362_v35, 16  ;;  %4806 = vmatprep.subr.bf16.mxu0 %v4997_v53  ;;  %v1139_v12 = vld [vmem:[#allocation2 + $0x24] sm:$0xf] }
  0x41   : > { %2738 = vrot.lane.b32.xlu0 %v2692_v30, %s5116_s19  ;;  %v2441_v33 = vsel %vm1392_vm9, %v2436_v39, %v2440_v40  ;;  %v1427_v59 = vrot.slane %v1425_v37, 1  ;;  %v1430_v60 = vshrl.u32 %v5374_v51, 16  ;;  %v1432_v61 = vshll.u32 %v5374_v51, 16  ;;  %v5394_v19 = vld [vmem:[#allocation2 + $0x28] sm:$0xf] }
  0x42   : > { %v1917_v62 = vsel %vm1392_vm9, %v1912_v41, %v1916_v43  ;;  %v1423_v63 = vor.u32 %v1422_v42, %v1418_v44  ;;  %v4466_v0 = vcombine.low %v1122_v52, %v1078_v22  ;;  %v2424_v58 = vor.u32 %v2423_v50, %v2419_v49  ;;  %v952_v25 = vld [vmem:[#allocation2 + $0x30] sm:$0xf]  ;;  %v956_v31 = vld [vmem:[#allocation2 + $0x38] sm:$0x1]  ;;  %v483_v32 = vld [vmem:[%s5269_s30 + $0x20] sm:$0xf] }
  0x43   : > { %2228 = vrot.lane.b32.xlu1 %v2183_v11, %s5115_s16  ;;  %v1434_v9 = vrot.slane %v1432_v61, 1  ;;  %v2693_v10 = vrot.slane %v4560_v47, 1  ;;  %v2694_v11 = vrot.slane %v5341_v8, 1  ;;  %v2428_v13 = vrot.slane %v2426_v56, 1  ;;  %4807 = vmatpush3.bf16.msra.mxu0 %v4997_v53  ;;  %v484_v39 = vld [vmem:[%s5269_s30 + $0x24] sm:$0xf] }
  0x44   : > { %v1439_v16 = vrot.slane %v1437_v57, 1  ;;  %v664_v17 = vrot.slane %v662_v36, 7  ;;  %v665_v18 = vshll.u32 %v5310_v14, 16  ;;  %v1428_v21 = vsel %vm1392_vm9, %v1423_v63, %v1427_v59  ;;  %v485_v44 = vld [vmem:[%s5269_s30 + $0x28] sm:$0xf] }
  0x45   : > { %1587 = vrot.lane.b32.xlu0 %v1416_v55, %s5114_s13  ;;  %v1435_v23 = vor.u32 %v1434_v9, %v1430_v60  ;;  %v1676_v24 = vrot.slane %v5362_v35, 1  ;;  %v670_v8 = vshrl.u32 %v482_v7, 16  ;;  %v1675_v26 = vrot.slane %v4466_v0, 1  ;;  %v486_v50 = vld [vmem:[%s5269_s30 + $0x2c] sm:$0xf] }
  0x46   : > { %v4465_v27 = vcombine.low %v1121_v4, %v5346_v15  ;;  %v667_v28 = vor.u32 %v665_v18, %v664_v17  ;;  %v673_v29 = vshll.u32 %v482_v7, 16  ;;  %v668_v14 = vrot.slane %v664_v17, 4  ;;  %v959_v60 = vld [vmem:[#allocation2 + $0x3c] sm:$0xf]  ;;  %v1185_v18 = vld [vmem:[#allocation2 + $0x24] sm:$0xe] }
  0x47   : > { %2100 = vrot.lane.b32.xlu1 %v1929_v38, %s5117_s22  ;;  %v672_v36 = vrot.slane %v670_v8, 7  ;;  %v5401_v30 = vcombine.low %v1139_v12, %v5394_v19  ;;  %v2429_v22 = vsel %vm1392_vm9, %v2424_v58, %v2428_v13  ;;  %v2695_v35 = vsel %vm1665_vm8, %v2693_v10, %v2694_v11  ;;  %v5409_v38 = vld [vmem:[#allocation2 + $0x2c] ss:$0 sps:$4 sm:$0x11]   ;;  %v963_v58 = vld [vmem:[#allocation2 + $0x44] sm:$0x1] }
  0x48   : > { %v953_v15 = vsel %vm5259_vm7, %v667_v28, %v952_v25  ;;  %v1440_v40 = vsel %vm1392_vm9, %v1435_v23, %v1439_v16  ;;  %v1673_v37 = vrot.slane %v5348_v20, 1  ;;  %v1677_v45 = vsel %vm1665_vm8, %v1675_v26, %v1676_v24  ;;  %v966_v16 = vld [vmem:[#allocation2 + $0x48] sm:$0xf]  ;;  %v970_v28 = vld [vmem:[#allocation2 + $0x50] sm:$0x1] }
  0x49   : > { %2098 = vrot.lane.b32.xlu0 %v1917_v62, %s5117_s22  ;;  %v675_v41 = vor.u32 %v673_v29, %v672_v36  ;;  %954 = vst [vmem:[#allocation2 + $0x30] sm:$0xf] %v953_v15  ;;  %v677_v43 = vrot.slane %v672_v36, 4  ;;  %v1672_v46 = vrot.slane %v4465_v27, 1  ;;  %v679_v47 = vshrl.u32 %v483_v32, 16 }
  0x4a   : > { %v682_v49 = vshll.u32 %v483_v32, 16  ;;  %v1933_v53 = vshll.u32 %v5401_v30, 16  ;;  %v687_v55 = vshrl.u32 %v484_v39, 16  ;;  %v1931_v42 = vshrl.u32 %v5401_v30, 16 }
  0x4b   : > { %2612 = vrot.lane.b32.xlu1 %v2441_v33, %s5118_s23  ;;  %v676_v52 = vsel %vm5237_vm4, %v668_v14, %v675_v41  ;;  %v957_v20 = vsel %vm5254_vm6, %v677_v43, %v956_v31  ;;  %v681_v56 = vrot.slane %v679_v47, 7  ;;  %v690_v57 = vshll.u32 %v484_v39, 16 }
  0x4c   : > { %955 = vst.msk [vmem:[#allocation2 + $0x34] sm:$0xf] %vm519_vm0, %v676_v52  ;;  %958 = vst [vmem:[#allocation2 + $0x38] sm:$0x1] %v957_v20  ;;  %v696_v33 = vshrl.u32 %v485_v44, 16  ;;  %v689_v59 = vrot.slane %v687_v55, 7  ;;  %v1674_v17 = vsel %vm1665_vm8, %v1672_v46, %v1673_v37 }
  0x4d   : > { %2610 = vrot.lane.b32.xlu0 %v2429_v22, %s5118_s23  ;;  %v699_v61 = vshll.u32 %v485_v44, 16  ;;  %v704_v62 = vshrl.u32 %v486_v50, 16  ;;  %v707_v63 = vshll.u32 %v486_v50, 16  ;;  %v1938_v0 = vshll.u32 %v5409_v38, 16 }
  0x4e   : > { %v684_v4 = vor.u32 %v682_v49, %v681_v56  ;;  %v685_v7 = vrot.slane %v681_v56, 4  ;;  %v698_v9 = vrot.slane %v696_v33, 7  ;;  %v1935_v10 = vrot.slane %v1933_v53, 1 }
  0x4f   : > { %1589 = vrot.lane.b32.xlu1 %v1428_v21, %s5114_s13  ;;  %v692_v11 = vor.u32 %v690_v57, %v689_v59  ;;  %v694_v12 = vrot.slane %v689_v59, 4  ;;  %v706_v13 = vrot.slane %v704_v62, 7  ;;  %v1940_v14 = vrot.slane %v1938_v0, 1 }
  0x50   : > { %v960_v21 = vsel %vm5259_vm7, %v684_v4, %v959_v60  ;;  %v701_v23 = vor.u32 %v699_v61, %v698_v9  ;;  %v1141_v24 = vld [vmem:[#allocation2 + $0x30] sm:$0xf]  ;;  %v702_v36 = vrot.slane %v698_v9, 4  ;;  %v1936_v15 = vor.u32 %v1935_v10, %v1931_v42 }
  0x51   : > { %2740 = vrot.lane.b32.xlu0 %v2695_v35, %s5116_s19  ;;  %v693_v8 = vsel %vm5237_vm4, %v685_v7, %v692_v11  ;;  %961 = vst [vmem:[#allocation2 + $0x3c] sm:$0xf] %v960_v21  ;;  %v1204_v25 = vld [vmem:[#allocation2 + $0x30] sm:$0xf]  ;;  %v964_v26 = vsel %vm5254_vm6, %v694_v12, %v963_v58  ;;  %v709_v27 = vor.u32 %v707_v63, %v706_v13  ;;  %v711_v32 = vrot.slane %v706_v13, 4 }
  0x52   : > { %v1186_v29 = vld [vmem:[#allocation2 + $0x30] sm:$0xe]  ;;  %962 = vst.msk [vmem:[#allocation2 + $0x40] sm:$0xf] %vm519_vm0, %v693_v8  ;;  %965 = vst [vmem:[#allocation2 + $0x44] sm:$0x1] %v964_v26  ;;  %v967_v31 = vsel %vm5259_vm7, %v701_v23, %v966_v16  ;;  %v4513_v35 = vcombine.low %v1185_v18, %v5394_v19  ;;  %v1941_v52 = vsel %vm1392_vm9, %v1936_v15, %v1940_v14 }
  0x53   : > { %1591 = vrot.lane.b32.xlu1 %v1440_v40, %s5114_s13  ;;  %v1142_v22 = vld [vmem:[#allocation2 + $0x34] sm:$0xf]  ;;  %968 = vst [vmem:[#allocation2 + $0x48] sm:$0xf] %v967_v31  ;;  %v1079_v44 = vld [vmem:[#allocation2 + $0x30] sm:$0xf]  ;;  %v710_v46 = vsel %vm5237_vm4, %v702_v36, %v709_v27  ;;  %v971_v47 = vsel %vm5254_vm6, %v711_v32, %v970_v28 }
  0x54   : > { %v5441_v39 = vld [vmem:[#allocation2 + $0x34] sm:$0xf]  ;;  %v4482_v40 = vcombine.low %v1141_v24, %v1142_v22  ;;  %v4939_v37 = vld [vmem:[#allocation2 + $0x38] ss:$0 sps:$4 sm:$0x11]   ;;  %v4514_v43 = vcombine.low %v1186_v29, %v1142_v22  ;;  %v2184_v53 = vrot.slane %v4513_v35, 1 }
  0x55   : > { %1718 = vrot.lane.b32.xlu0 %v1674_v17, %s5111_s8  ;;  %v5444_v41 = vcombine.low %v1204_v25, %v5441_v39  ;;  %v1950_v50 = vshll.u32 %v4939_v37, 16  ;;  %969 = vst.msk [vmem:[#allocation2 + $0x4c] sm:$0xf] %vm519_vm0, %v710_v46  ;;  %972 = vst [vmem:[#allocation2 + $0x50] sm:$0x1] %v971_v47  ;;  %v2185_v20 = vrot.slane %v5409_v38, 1 }
  0x56   : > { %v1945_v19 = vshll.u32 %v4482_v40, 16  ;;  %v1943_v49 = vshrl.u32 %v4482_v40, 16  ;;  %v5458_v55 = vld [vmem:[#allocation2 + $0x38] ss:$0 sps:$4 sm:$0x11]   ;;  %v2187_v61 = vrot.slane %v4514_v43, 1 }
  0x57   : > { %1720 = vrot.lane.b32.xlu1 %v1677_v45, %s5111_s8  ;;  %v5446_v45 = vld [vmem:[#allocation2 + $0x34] sm:$0xf]  ;;  %v1952_v56 = vrot.slane %v1950_v50, 1  ;;  %v2445_v33 = vshll.u32 %v5444_v41, 16  ;;  %v487_v60 = vld [vmem:[%s5269_s30 + $0x30] sm:$0xf]  ;;  %v2186_v58 = vsel %vm1665_vm8, %v2184_v53, %v2185_v20 }
  0x58   : > { %v1947_v42 = vrot.slane %v1945_v19, 1  ;;  %v1206_v57 = vld [vmem:[#allocation2 + $0x3c] sm:$0xf]  ;;  %v5462_v59 = vcombine.low %v1079_v44, %v5446_v45  ;;  %v2188_v62 = vrot.slane %v4939_v37, 1  ;;  %v1250_v4 = vld [vmem:[#allocation2 + $0x30] sm:$0xe] }
  0x59   : > { %1830 = vrot.lane.b32.xlu0 %v5401_v30, %s5112_s9  ;;  %v1207_v63 = vld [vmem:[#allocation2 + $0x40] sm:$0xf]  ;;  %v5465_v7 = vld [vmem:[#allocation2 + $0x44] ss:$0 sps:$4 sm:$0x11]   ;;  %v2443_v38 = vshrl.u32 %v5444_v41, 16  ;;  %v4561_v27 = vcombine.low %v1250_v4, %v5441_v39 }
  0x5a   : > { %v1948_v30 = vor.u32 %v1947_v42, %v1943_v49  ;;  %v4530_v0 = vcombine.low %v1206_v57, %v1207_v63  ;;  %v2450_v9 = vshll.u32 %v5458_v55, 16  ;;  %v5471_v10 = vld [vmem:[#allocation2 + $0x38] ss:$0 sps:$4 sm:$0x11]   ;;  %v1081_v11 = vld [vmem:[#allocation2 + $0x3c] sm:$0xf]  ;;  %v2189_v21 = vsel %vm1665_vm8, %v2187_v61, %v2188_v62 }
  0x5b   : > { %1832 = vrot.lane.b32.xlu1 %v4482_v40, %s5112_s9  ;;  %v2447_v16 = vrot.slane %v2445_v33, 1  ;;  %v1444_v17 = vshll.u32 %v5462_v59, 16  ;;  %v5475_v18 = vld [vmem:[#allocation2 + $0x40] sm:$0xf]  ;;  %v713_v23 = vshrl.u32 %v487_v60, 16  ;;  %v2462_v25 = vshll.u32 %v5465_v7, 16 }
  0x5c   : > { %v1953_v12 = vsel %vm1392_vm9, %v1948_v30, %v1952_v56  ;;  %v2457_v13 = vshll.u32 %v4530_v0, 16  ;;  %v2455_v24 = vshrl.u32 %v4530_v0, 16  ;;  %v5481_v26 = vcombine.low %v1081_v11, %v5475_v18  ;;  %v1251_v29 = vld [vmem:[#allocation2 + $0x3c] sm:$0xe]  ;;  %v1123_v46 = vld [vmem:[#allocation2 + $0x30] sm:$0xe] }
  0x5d   : > { %2102 = vrot.lane.b32.xlu0 %v1941_v52, %s5117_s22  ;;  %v2452_v28 = vrot.slane %v2450_v9, 1  ;;  %v2448_v14 = vor.u32 %v2447_v16, %v2443_v38  ;;  %v1442_v36 = vshrl.u32 %v5462_v59, 16  ;;  %v1446_v31 = vrot.slane %v1444_v17, 1  ;;  %v5488_v22 = vld [vmem:[#allocation2 + $0x44] ss:$0 sps:$4 sm:$0x11]  }
  0x5e   : > { %v2459_v8 = vrot.slane %v2457_v13, 1  ;;  %v1449_v32 = vshll.u32 %v5471_v10, 16  ;;  %v5490_v35 = vrot.slane %v713_v23, 7  ;;  %v2464_v40 = vrot.slane %v2462_v25, 1  ;;  %v1124_v52 = vld [vmem:[#allocation2 + $0x3c] sm:$0xe] }
  0x5f   : > { %2104 = vrot.lane.b32.xlu1 %v1953_v12, %s5117_s22  ;;  %v1456_v37 = vshll.u32 %v5481_v26, 16  ;;  %v716_v39 = vshll.u32 %v487_v60, 16  ;;  %v4562_v43 = vcombine.low %v1251_v29, %v1207_v63  ;;  %v2696_v44 = vrot.slane %v4561_v27, 1  ;;  %v488_v53 = vld [vmem:[%s5269_s30 + $0x34] sm:$0xf] }
  0x60   : > { %v2460_v15 = vor.u32 %v2459_v8, %v2455_v24  ;;  %v2453_v47 = vsel %vm1392_vm9, %v2448_v14, %v2452_v28  ;;  %v1447_v19 = vor.u32 %v1446_v31, %v1442_v36  ;;  %v1451_v49 = vrot.slane %v1449_v32, 1  ;;  %v1143_v42 = vld [vmem:[#allocation2 + $0x3c] sm:$0xf]  ;;  %v5500_v56 = vld [vmem:[#allocation2 + $0x40] sm:$0xf] }
  0x61   : > { %2230 = vrot.lane.b32.xlu0 %v2186_v58, %s5115_s16  ;;  %v2697_v50 = vrot.slane %v5458_v55, 1  ;;  %v1461_v20 = vshll.u32 %v5488_v22, 16  ;;  %v1458_v33 = vrot.slane %v1456_v37, 1  ;;  %v1145_v60 = vld [vmem:[#allocation2 + $0x48] sm:$0xf]  ;;  %v718_v62 = vor.u32 %v716_v39, %v5490_v35 }
  0x62   : > { %v2465_v57 = vsel %vm1392_vm9, %v2460_v15, %v2464_v40  ;;  %v5504_v61 = vld [vmem:[#allocation2 + $0x4c] sm:$0xf]  ;;  %v2699_v55 = vrot.slane %v4562_v43, 1  ;;  %v4467_v63 = vcombine.low %v1123_v46, %v5446_v45  ;;  %v973_v30 = vld [vmem:[#allocation2 + $0x54] sm:$0xf]  ;;  %v2700_v38 = vrot.slane %v5465_v7, 1 }
  0x63   : > { %2232 = vrot.lane.b32.xlu1 %v2189_v21, %s5115_s16  ;;  %v2698_v4 = vsel %vm1665_vm8, %v2696_v44, %v2697_v50  ;;  %v5513_v58 = vcombine.low %v1143_v42, %v5500_v56  ;;  %v1463_v9 = vrot.slane %v1461_v20, 1  ;;  %v4468_v11 = vcombine.low %v1124_v52, %v5475_v18  ;;  %v1188_v16 = vld [vmem:[#allocation2 + $0x48] sm:$0xe]  ;;  %v977_v23 = vld [vmem:[#allocation2 + $0x5c] sm:$0x1] }
  0x64   : > { %v5518_v12 = vcombine.low %v1145_v60, %v5504_v61  ;;  %v721_v13 = vshrl.u32 %v488_v53, 16  ;;  %v719_v17 = vrot.slane %v5490_v35, 4  ;;  %v724_v21 = vshll.u32 %v488_v53, 16  ;;  %v5524_v24 = vld [vmem:[#allocation2 + $0x44] ss:$0 sps:$4 sm:$0x11]  }
  0x65   : > { %2342 = vrot.lane.b32.xlu0 %v5444_v41, %s5113_s10  ;;  %v1454_v41 = vshrl.u32 %v5481_v26, 16  ;;  %v974_v7 = vsel %vm5259_vm7, %v718_v62, %v973_v30  ;;  %v2701_v18 = vsel %vm1665_vm8, %v2699_v55, %v2700_v38  ;;  %v1678_v25 = vrot.slane %v4467_v63, 1  ;;  %v5529_v29 = vld [vmem:[#allocation2 + $0x50] ss:$0 sps:$4 sm:$0x11]  }
  0x66   : > { %v723_v8 = vrot.slane %v721_v13, 7  ;;  %975 = vst [vmem:[#allocation2 + $0x54] sm:$0xf] %v974_v7  ;;  %v1679_v27 = vrot.slane %v5471_v10, 1  ;;  %v1957_v28 = vshll.u32 %v5513_v58, 16  ;;  %v1681_v32 = vrot.slane %v4468_v11, 1 }
  0x67   : > { %2344 = vrot.lane.b32.xlu1 %v4530_v0, %s5113_s10  ;;  %v1452_v0 = vsel %vm1392_vm9, %v1447_v19, %v1451_v49  ;;  %v1459_v45 = vor.u32 %v1458_v33, %v1454_v41  ;;  %v1682_v35 = vrot.slane %v5488_v22, 1  ;;  %v1969_v15 = vshll.u32 %v5518_v12, 16  ;;  %v489_v40 = vld [vmem:[%s5269_s30 + $0x38] sm:$0xf]  ;;  %v1187_v37 = vld [vmem:[#allocation2 + $0x3c] sm:$0xe] }
  0x68   : > { %v726_v14 = vor.u32 %v724_v21, %v723_v8  ;;  %v728_v36 = vrot.slane %v723_v8, 4  ;;  %v4516_v10 = vcombine.low %v1188_v16, %v5504_v61  ;;  %v1962_v39 = vshll.u32 %v5524_v24, 16  ;;  %v490_v46 = vld [vmem:[%s5269_s30 + $0x3c] sm:$0xf]  ;;  %v491_v50 = vld [vmem:[%s5269_s30 + $0x40] sm:$0xf] }
  0x69   : > { %2614 = vrot.lane.b32.xlu0 %v2453_v47, %s5118_s23  ;;  %v1464_v31 = vsel %vm1392_vm9, %v1459_v45, %v1463_v9  ;;  %v1680_v22 = vsel %vm1665_vm8, %v1678_v25, %v1679_v27  ;;  %v1974_v47 = vshll.u32 %v5529_v29, 16  ;;  %v1955_v19 = vshrl.u32 %v5513_v58, 16  ;;  %v1208_v52 = vld [vmem:[#allocation2 + $0x48] sm:$0xf]  ;;  %v5550_v53 = vld [vmem:[#allocation2 + $0x4c] sm:$0xf] }
  0x6a   : > { %v727_v43 = vsel %vm5237_vm4, %v719_v17, %v726_v14  ;;  %v978_v44 = vsel %vm5254_vm6, %v728_v36, %v977_v23  ;;  %v1959_v49 = vrot.slane %v1957_v28, 1  ;;  %v730_v20 = vshrl.u32 %v489_v40, 16  ;;  %v980_v38 = vld [vmem:[#allocation2 + $0x60] sm:$0xf]  ;;  %v1083_v23 = vld [vmem:[#allocation2 + $0x48] sm:$0xf] }
  0x6b   : > { %2616 = vrot.lane.b32.xlu1 %v2465_v57, %s5118_s23  ;;  %976 = vst.msk [vmem:[#allocation2 + $0x58] sm:$0xf] %vm519_vm0, %v727_v43  ;;  %979 = vst [vmem:[#allocation2 + $0x5c] sm:$0x1] %v978_v44  ;;  %v733_v42 = vshll.u32 %v489_v40, 16  ;;  %v1683_v57 = vsel %vm1665_vm8, %v1681_v32, %v1682_v35  ;;  %v4515_v41 = vcombine.low %v1187_v37, %v5500_v56  ;;  %v1967_v33 = vshrl.u32 %v5518_v12, 16 }
  0x6c   : > { %v1971_v60 = vrot.slane %v1969_v15, 1  ;;  %v1964_v61 = vrot.slane %v1962_v39, 1  ;;  %v2193_v62 = vrot.slane %v4516_v10, 1  ;;  %v732_v55 = vrot.slane %v730_v20, 7  ;;  %v5561_v8 = vld [vmem:[#allocation2 + $0x4c] sm:$0xf] }
  0x6d   : > { %2742 = vrot.lane.b32.xlu0 %v2698_v4, %s5116_s19  ;;  %v738_v63 = vshrl.u32 %v490_v46, 16  ;;  %v1960_v30 = vor.u32 %v1959_v49, %v1955_v19  ;;  %v741_v4 = vshll.u32 %v490_v46, 16  ;;  %v747_v9 = vshrl.u32 %v491_v50, 16  ;;  %v1210_v56 = vld [vmem:[#allocation2 + $0x54] sm:$0xf] }
  0x6e   : > { %v1976_v11 = vrot.slane %v1974_v47, 1  ;;  %v735_v13 = vor.u32 %v733_v42, %v732_v55  ;;  %v736_v45 = vrot.slane %v732_v55, 4  ;;  %v1972_v17 = vor.u32 %v1971_v60, %v1967_v33  ;;  %v5576_v32 = vld [vmem:[#allocation2 + $0x50] ss:$0 sps:$4 sm:$0x11]  }
  0x6f   : > { %1593 = vrot.lane.b32.xlu1 %v1452_v0, %s5114_s13  ;;  %v5557_v0 = vcombine.low %v1208_v52, %v5550_v53  ;;  %v740_v16 = vrot.slane %v738_v63, 7  ;;  %v2190_v21 = vrot.slane %v4515_v41, 1  ;;  %v2191_v7 = vrot.slane %v5524_v24, 1  ;;  %v1085_v10 = vld [vmem:[#allocation2 + $0x54] sm:$0xf] }
  0x70   : > { %v981_v27 = vsel %vm5259_vm7, %v735_v13, %v980_v38  ;;  %v5569_v28 = vrot.slane %v747_v9, 7  ;;  %v750_v14 = vshll.u32 %v491_v50, 16  ;;  %v1965_v36 = vsel %vm1392_vm9, %v1960_v30, %v1964_v61  ;;  %v984_v46 = vld [vmem:[#allocation2 + $0x68] sm:$0x1]  ;;  %v987_v47 = vld [vmem:[#allocation2 + $0x6c] sm:$0xf] }
  0x71   : > { %2744 = vrot.lane.b32.xlu0 %v2701_v18, %s5116_s19  ;;  %v743_v25 = vor.u32 %v741_v4, %v740_v16  ;;  %v2469_v24 = vshll.u32 %v5557_v0, 16  ;;  %982 = vst [vmem:[#allocation2 + $0x60] sm:$0xf] %v981_v27  ;;  %v2194_v35 = vrot.slane %v5529_v29, 1  ;;  %v5585_v40 = vcombine.low %v1083_v23, %v5561_v8  ;;  %v1252_v29 = vld [vmem:[#allocation2 + $0x48] sm:$0xe] }
  0x72   : > { %v5565_v18 = vld [vmem:[#allocation2 + $0x58] sm:$0xf]  ;;  %v5582_v15 = vld [vmem:[#allocation2 + $0x5c] ss:$0 sps:$4 sm:$0x11]   ;;  %v1977_v39 = vsel %vm1392_vm9, %v1972_v17, %v1976_v11  ;;  %v2192_v19 = vsel %vm1665_vm8, %v2190_v21, %v2191_v7  ;;  %v2467_v49 = vshrl.u32 %v5557_v0, 16  ;;  %v4563_v30 = vcombine.low %v1252_v29, %v5550_v53 }
  0x73   : > { %1595 = vrot.lane.b32.xlu1 %v1464_v31, %s5114_s13  ;;  %v5573_v31 = vcombine.low %v1210_v56, %v5565_v18  ;;  %v744_v37 = vsel %vm5237_vm4, %v736_v45, %v743_v25  ;;  %v5591_v44 = vld [vmem:[#allocation2 + $0x58] sm:$0xf]  ;;  %v2471_v50 = vrot.slane %v2469_v24, 1  ;;  %v2474_v52 = vshll.u32 %v5576_v32, 16  ;;  %v1253_v38 = vld [vmem:[#allocation2 + $0x54] sm:$0xe] }
  0x74   : > { %983 = vst.msk [vmem:[#allocation2 + $0x64] sm:$0xf] %vm519_vm0, %v744_v37  ;;  %v5599_v20 = vld [vmem:[#allocation2 + $0x50] ss:$0 sps:$4 sm:$0x11]   ;;  %v2195_v42 = vsel %vm1665_vm8, %v2193_v62, %v2194_v35  ;;  %v5605_v41 = vcombine.low %v1085_v10, %v5591_v44  ;;  %v2486_v55 = vshll.u32 %v5582_v15, 16 }
  0x75   : > { %1722 = vrot.lane.b32.xlu0 %v1680_v22, %s5111_s8  ;;  %v2481_v43 = vshll.u32 %v5573_v31, 16  ;;  %v752_v22 = vor.u32 %v750_v14, %v5569_v28  ;;  %v2479_v60 = vshrl.u32 %v5573_v31, 16  ;;  %v2472_v9 = vor.u32 %v2471_v50, %v2467_v49  ;;  %v5617_v13 = vld [vmem:[#allocation2 + $0x5c] ss:$0 sps:$4 sm:$0x11]  }
  0x76   : > { %v2476_v11 = vrot.slane %v2474_v52, 1  ;;  %v1473_v56 = vshll.u32 %v5599_v20, 16  ;;  %v1480_v45 = vshll.u32 %v5605_v41, 16  ;;  %v2488_v21 = vrot.slane %v2486_v55, 1  ;;  %v1125_v14 = vld [vmem:[#allocation2 + $0x48] sm:$0xe] }
  0x77   : > { %1724 = vrot.lane.b32.xlu1 %v1683_v57, %s5111_s8  ;;  %v1468_v57 = vshll.u32 %v5585_v40, 16  ;;  %v2483_v61 = vrot.slane %v2481_v43, 1  ;;  %v988_v4 = vsel %vm5259_vm7, %v752_v22, %v987_v47  ;;  %v1466_v7 = vshrl.u32 %v5585_v40, 16  ;;  %v991_v24 = vld [vmem:[#allocation2 + $0x74] sm:$0x1] }
  0x78   : > { %989 = vst [vmem:[#allocation2 + $0x6c] sm:$0xf] %v988_v4  ;;  %v2702_v25 = vrot.slane %v4563_v30, 1  ;;  %v2703_v27 = vrot.slane %v5576_v32, 1  ;;  %v2477_v35 = vsel %vm1392_vm9, %v2472_v9, %v2476_v11  ;;  %v1147_v10 = vld [vmem:[#allocation2 + $0x54] sm:$0xf] }
  0x79   : > { %1834 = vrot.lane.b32.xlu0 %v5513_v58, %s5112_s9  ;;  %v492_v58 = vld [vmem:[%s5269_s30 + $0x44] sm:$0xf]  ;;  %v2484_v17 = vor.u32 %v2483_v61, %v2479_v60  ;;  %v1470_v23 = vrot.slane %v1468_v57, 1  ;;  %v1148_v37 = vld [vmem:[#allocation2 + $0x58] sm:$0xf]  ;;  %v1478_v43 = vshrl.u32 %v5605_v41, 16 }
  0x7a   : > { %v755_v33 = vshrl.u32 %v492_v58, 16  ;;  %v758_v62 = vshll.u32 %v492_v58, 16  ;;  %v4564_v58 = vcombine.low %v1253_v38, %v5565_v18  ;;  %v1126_v32 = vld [vmem:[#allocation2 + $0x54] sm:$0xe]  ;;  %v1149_v22 = vld [vmem:[#allocation2 + $0x60] sm:$0xf]  ;;  %v5641_v49 = vcombine.low %v1147_v10, %v1148_v37 }
  0x7b   : > { %1836 = vrot.lane.b32.xlu1 %v5518_v12, %s5112_s9  ;;  %v745_v12 = vrot.slane %v740_v16, 4  ;;  %v753_v16 = vrot.slane %v5569_v28, 4  ;;  %v1475_v28 = vrot.slane %v1473_v56, 1  ;;  %v2489_v18 = vsel %vm1392_vm9, %v2484_v17, %v2488_v21  ;;  %v5634_v47 = vld [vmem:[#allocation2 + $0x64] sm:$0xf] }
  0x7c   : > { %v757_v53 = vrot.slane %v755_v33, 7  ;;  %v2704_v50 = vsel %vm1665_vm8, %v2702_v25, %v2703_v27  ;;  %v2705_v52 = vrot.slane %v4564_v58, 1  ;;  %v4470_v57 = vcombine.low %v1126_v32, %v5591_v44  ;;  %v1212_v11 = vld [vmem:[#allocation2 + $0x60] sm:$0xf]  ;;  %v5660_v56 = vld [vmem:[#allocation2 + $0x64] sm:$0xf] }
  0x7d   : > { %2106 = vrot.lane.b32.xlu0 %v1965_v36, %s5117_s22  ;;  %v985_v63 = vsel %vm5254_vm6, %v745_v12, %v984_v46  ;;  %v1485_v12 = vshll.u32 %v5617_v13, 16  ;;  %v1471_v46 = vor.u32 %v1470_v23, %v1466_v7  ;;  %v5648_v33 = vcombine.low %v1149_v22, %v5634_v47  ;;  %v1190_v27 = vld [vmem:[#allocation2 + $0x60] sm:$0xe]  ;;  %v5683_v22 = vld [vmem:[#allocation2 + $0x64] sm:$0xf] }
  0x7e   : > { %986 = vst [vmem:[#allocation2 + $0x68] sm:$0x1] %v985_v63  ;;  %v760_v36 = vor.u32 %v758_v62, %v757_v53  ;;  %v1189_v63 = vld [vmem:[#allocation2 + $0x54] sm:$0xe]  ;;  %v1981_v30 = vshll.u32 %v5641_v49, 16  ;;  %v1687_v44 = vrot.slane %v4470_v57, 1 }
  0x7f   : > { %2108 = vrot.lane.b32.xlu1 %v1977_v39, %s5117_s22  ;;  %v762_v39 = vrot.slane %v757_v53, 4  ;;  %v1476_v60 = vsel %vm1392_vm9, %v1471_v46, %v1475_v28  ;;  %v1487_v55 = vrot.slane %v1485_v12, 1  ;;  %v5654_v62 = vld [vmem:[#allocation2 + $0x5c] ss:$0 sps:$4 sm:$0x11]   ;;  %v1685_v38 = vrot.slane %v5599_v20, 1 }
  0x80   : > { %v761_v29 = vsel %vm5237_vm4, %v753_v16, %v760_v36  ;;  %v1993_v9 = vshll.u32 %v5648_v33, 16  ;;  %v1688_v53 = vrot.slane %v5617_v13, 1  ;;  %v4517_v17 = vcombine.low %v1189_v63, %v1148_v37  ;;  %v1214_v37 = vld [vmem:[#allocation2 + $0x6c] sm:$0xf]  ;;  %v1087_v46 = vld [vmem:[#allocation2 + $0x60] sm:$0xf] }
  0x81   : > { %2234 = vrot.lane.b32.xlu0 %v2192_v19, %s5115_s16  ;;  %990 = vst.msk [vmem:[#allocation2 + $0x70] sm:$0xf] %vm519_vm0, %v761_v29  ;;  %v4469_v19 = vcombine.low %v1125_v14, %v5561_v8  ;;  %v493_v8 = vld [vmem:[%s5269_s30 + $0x48] sm:$0xf]  ;;  %v1979_v20 = vshrl.u32 %v5641_v49, 16  ;;  %v1983_v7 = vrot.slane %v1981_v30, 1  ;;  %v5671_v14 = vcombine.low %v1212_v11, %v5660_v56 }
  0x82   : > { %v1986_v23 = vshll.u32 %v5654_v62, 16  ;;  %v1991_v13 = vshrl.u32 %v5648_v33, 16  ;;  %v1995_v36 = vrot.slane %v1993_v9, 1  ;;  %v2196_v10 = vrot.slane %v4517_v17, 1  ;;  %v998_v63 = vld [vmem:[#allocation2 + $0x80] sm:$0x1] }
  0x83   : > { %2236 = vrot.lane.b32.xlu1 %v2195_v42, %s5115_s16  ;;  %v2706_v42 = vrot.slane %v5582_v15, 1  ;;  %v1684_v4 = vrot.slane %v4469_v19, 1  ;;  %v767_v29 = vshll.u32 %v493_v8, 16  ;;  %v2491_v11 = vshrl.u32 %v5671_v14, 16 }
  0x84   : > { %v1988_v12 = vrot.slane %v1986_v23, 1  ;;  %v1996_v19 = vor.u32 %v1995_v36, %v1991_v13 }
  0x85   : > { %2346 = vrot.lane.b32.xlu0 %v5557_v0, %s5113_s10  ;;  %v1482_v0 = vrot.slane %v1480_v45, 1  ;;  %v2707_v15 = vsel %vm1665_vm8, %v2705_v52, %v2706_v42  ;;  %v764_v45 = vshrl.u32 %v493_v8, 16  ;;  %v5664_v21 = vld [vmem:[#allocation2 + $0x68] ss:$0 sps:$4 sm:$0x11]   ;;  %v1686_v25 = vsel %vm1665_vm8, %v1684_v4, %v1685_v38 }
  0x86   : > { %v1998_v28 = vshll.u32 %v5664_v21, 16  ;;  %v495_v38 = vld [vmem:[%s5269_s30 + $0x50] sm:$0xf]  ;;  %v2200_v9 = vrot.slane %v5664_v21, 1 }
  0x87   : > { %2348 = vrot.lane.b32.xlu1 %v5573_v31, %s5113_s10  ;;  %v992_v31 = vsel %vm5254_vm6, %v762_v39, %v991_v24  ;;  %v1483_v61 = vor.u32 %v1482_v0, %v1478_v43  ;;  %v494_v24 = vld [vmem:[%s5269_s30 + $0x4c] sm:$0xf]  ;;  %v766_v58 = vrot.slane %v764_v45, 7  ;;  %v994_v39 = vld [vmem:[#allocation2 + $0x78] sm:$0xf]  ;;  %v4518_v43 = vcombine.low %v1190_v27, %v5634_v47 }
  0x88   : > { %993 = vst [vmem:[#allocation2 + $0x74] sm:$0x1] %v992_v31  ;;  %v1984_v0 = vor.u32 %v1983_v7, %v1979_v20  ;;  %v5680_v32 = vld [vmem:[#allocation2 + $0x70] sm:$0xf]  ;;  %v772_v31 = vshrl.u32 %v494_v24, 16  ;;  %v775_v42 = vshll.u32 %v494_v24, 16 }
  0x89   : > { %2618 = vrot.lane.b32.xlu0 %v2477_v35, %s5118_s23  ;;  %v1488_v16 = vsel %vm1392_vm9, %v1483_v61, %v1487_v55  ;;  %v1689_v35 = vsel %vm1665_vm8, %v1687_v44, %v1688_v53  ;;  %v769_v52 = vor.u32 %v767_v29, %v766_v58  ;;  %v4999_v47 = vld [vmem:[%s6911_s3 + $0x20] ss:$0 sps:$4 sm:$0xff]   ;;  %v2000_v57 = vrot.slane %v1998_v28, 1  ;;  %v5693_v61 = vld [vmem:[#allocation2 + $0x60] sm:$0xe] }
  0x8a   : > { %v770_v55 = vrot.slane %v766_v58, 4  ;;  %v774_v8 = vrot.slane %v772_v31, 7  ;;  %v1989_v30 = vsel %vm1392_vm9, %v1984_v0, %v1988_v12  ;;  %v5701_v44 = vcombine.low %v1087_v46, %v5683_v22  ;;  %v5710_v53 = vld [vmem:[%s5269_s30 + $0x58] sm:$0xf]  ;;  %v1089_v7 = vld [vmem:[#allocation2 + $0x6c] sm:$0xf]  ;;  %4876 = vmatprep.subr.msk.bf16.mxu0 %vm3103_vm10, %v4999_v47 }
  0x8b   : > { %2620 = vrot.lane.b32.xlu1 %v2489_v18, %s5118_s23  ;;  %v2493_v18 = vshll.u32 %v5671_v14, 16  ;;  %v995_v4 = vsel %vm5259_vm7, %v769_v52, %v994_v39  ;;  %v4565_v20 = vcombine.low %v5693_v61, %v5660_v56  ;;  %v5717_v23 = vld [vmem:[#allocation2 + $0x70] sm:$0xf]  ;;  %v5729_v58 = vld [vmem:[#allocation2 + $0x68] ss:$0 sps:$4 sm:$0x11]  }
  0x8c   : > { %996 = vst [vmem:[#allocation2 + $0x78] sm:$0xf] %v995_v4  ;;  %v779_v21 = vrot.slane %v774_v8, 4  ;;  %v1490_v36 = vshrl.u32 %v5701_v44, 16  ;;  %v781_v0 = vshrl.u32 %v495_v38, 16  ;;  %v784_v46 = vshll.u32 %v495_v38, 16 }
  0x8d   : > { %2746 = vrot.lane.b32.xlu0 %v2704_v50, %s5116_s19  ;;  %v2197_v50 = vrot.slane %v5654_v62, 1  ;;  %v2199_v62 = vrot.slane %v4518_v43, 1  ;;  %v2495_v45 = vrot.slane %v2493_v18, 1  ;;  %v5739_v43 = vcombine.low %v1089_v7, %v5717_v23  ;;  %v1064_v12 = vld [vmem:[#allocation2 + $0xcc] sm:$0xf] }
  0x8e   : > { %v999_v28 = vsel %vm5254_vm6, %v779_v21, %v998_v63  ;;  %v1068_v29 = vld [vmem:[#allocation2 + $0xd4] sm:$0x1]  ;;  %v1005_v63 = vld [vmem:[#allocation2 + $0x8c] sm:$0x1] }
  0x8f   : > { %1597 = vrot.lane.b32.xlu1 %v1476_v60, %s5114_s13  ;;  %v5691_v60 = vcombine.low %v1214_v37, %v5680_v32  ;;  %v2198_v17 = vsel %vm1665_vm8, %v2196_v10, %v2197_v50  ;;  %v5721_v13 = vld [vmem:[#allocation2 + $0x74] ss:$0 sps:$4 sm:$0x11]   ;;  %v3105_v10 = vsel %vm3103_vm10, %v4999_v47, 0  ;;  %v2201_v37 = vsel %vm1665_vm8, %v2199_v62, %v2200_v9  ;;  %1000 = vst [vmem:[#allocation2 + $0x80] sm:$0x1] %v999_v28 }
  0x90   : > { %4809 = vmatpush3.bf16.msra.mxu0 %v3105_v10  ;;  %v798_v50 = vshrl.u32 %v5710_v53, 16  ;;  %v783_v47 = vrot.slane %v781_v0, 7  ;;  %v1065_v62 = vsel %vm5259_vm7, %v5182_v1, %v1064_v12  ;;  %v1069_v4 = vsel %vm5254_vm6, %v5243_v3, %v1068_v29  ;;  %v5764_v28 = vld [vmem:[#allocation2 + $0x74] ss:$0 sps:$4 sm:$0x11]  }
  0x91   : > { %2748 = vrot.lane.b32.xlu0 %v2707_v15, %s5116_s19  ;;  %v5698_v15 = vld [vmem:[#allocation2 + $0x68] ss:$0 sps:$4 sm:$0x11]   ;;  %v2505_v27 = vshll.u32 %v5691_v60, 16  ;;  %v2503_v39 = vshrl.u32 %v5691_v60, 16  ;;  %v2496_v38 = vor.u32 %v2495_v45, %v2491_v11  ;;  %v1504_v10 = vshll.u32 %v5739_v43, 16 }
  0x92   : > { %v2498_v24 = vshll.u32 %v5698_v15, 16  ;;  %v787_v7 = vrot.slane %v783_v47, 4  ;;  %1066 = vst [vmem:[#allocation2 + $0xcc] sm:$0xf] %v1065_v62  ;;  %1070 = vst [vmem:[#allocation2 + $0xd4] sm:$0x1] %v1069_v4 }
  0x93   : > { %1599 = vrot.lane.b32.xlu1 %v1488_v16, %s5114_s13  ;;  %v777_v16 = vor.u32 %v775_v42, %v774_v8  ;;  %v2507_v52 = vrot.slane %v2505_v27, 1  ;;  %v2510_v42 = vshll.u32 %v5721_v13, 16  ;;  %v1001_v8 = vld [vmem:[#allocation2 + $0x84] sm:$0xf]  ;;  %v1497_v27 = vshll.u32 %v5729_v58, 16 }
  0x94   : > { %v2500_v9 = vrot.slane %v2498_v24, 1  ;;  %v2712_v4 = vrot.slane %v5721_v13, 1 }
  0x95   : > { %1726 = vrot.lane.b32.xlu0 %v1686_v25, %s5111_s8  ;;  %v2001_v25 = vsel %vm1392_vm9, %v1996_v19, %v2000_v57  ;;  %v801_v57 = vshll.u32 %v5710_v53, 16  ;;  %v5756_v53 = vld [vmem:[#allocation2 + $0x70] sm:$0xf]  ;;  %v2508_v45 = vor.u32 %v2507_v52, %v2503_v39  ;;  %v2512_v24 = vrot.slane %v2510_v42, 1 }
  0x96   : > { %v1502_v42 = vshrl.u32 %v5739_v43, 16 }
  0x97   : > { %1728 = vrot.lane.b32.xlu1 %v1689_v35, %s5111_s8  ;;  %v1492_v35 = vshll.u32 %v5701_v44, 16 }
  0x99   : > { %1838 = vrot.lane.b32.xlu0 %v5641_v49, %s5112_s9  ;;  %v496_v49 = vld [vmem:[%s5269_s30 + $0x54] sm:$0xf]  ;;  %v1494_v1 = vrot.slane %v1492_v35, 1  ;;  %v2708_v35 = vrot.slane %v4565_v20, 1 }
  0x9a   : > { %v789_v31 = vshrl.u32 %v496_v49, 16  ;;  %v792_v19 = vshll.u32 %v496_v49, 16  ;;  %v1151_v49 = vld [vmem:[#allocation2 + $0x6c] sm:$0xf] }
  0x9b   : > { %1840 = vrot.lane.b32.xlu1 %v5648_v33, %s5112_s9  ;;  %v778_v33 = vsel %vm5237_vm4, %v770_v55, %v777_v16  ;;  %v1127_v16 = vld [vmem:[#allocation2 + $0x60] sm:$0xe]  ;;  %v1495_v20 = vor.u32 %v1494_v1, %v1490_v36  ;;  %v1153_v36 = vld [vmem:[#allocation2 + $0x78] sm:$0xf] }
  0x9c   : > { %997 = vst.msk [vmem:[#allocation2 + $0x7c] sm:$0xf] %vm519_vm0, %v778_v33  ;;  %v791_v55 = vrot.slane %v789_v31, 7  ;;  %v2709_v31 = vrot.slane %v5698_v15, 1  ;;  %v2513_v15 = vsel %vm1392_vm9, %v2508_v45, %v2512_v24 }
  0x9d   : > { %2110 = vrot.lane.b32.xlu0 %v1989_v30, %s5117_s22  ;;  %v5748_v30 = vrot.slane %v798_v50, 7  ;;  %v4471_v50 = vcombine.low %v1127_v16, %v5683_v22  ;;  %v5810_v16 = vld [vmem:[%s5269_s30 + $0x5c] sm:$0xf] }
  0x9e   : > { %v794_v33 = vor.u32 %v792_v19, %v791_v55  ;;  %v796_v3 = vrot.slane %v791_v55, 4  ;;  %v1499_v19 = vrot.slane %v1497_v27, 1 }
  0x9f   : > { %2112 = vrot.lane.b32.xlu1 %v2001_v25, %s5117_s22  ;;  %v1255_v25 = vld [vmem:[#allocation2 + $0x6c] sm:$0xe]  ;;  %v803_v12 = vor.u32 %v801_v57, %v5748_v30  ;;  %v5798_v57 = vld [vmem:[#allocation2 + $0x74] ss:$0 sps:$4 sm:$0x11]  }
  0xa0   : > { %v795_v39 = vsel %vm5237_vm4, %v787_v7, %v794_v33  ;;  %v4566_v29 = vcombine.low %v1255_v25, %v5680_v32  ;;  %v1006_v56 = vsel %vm5254_vm6, %v796_v3, %v1005_v63  ;;  %v1128_v32 = vld [vmem:[#allocation2 + $0x6c] sm:$0xe]  ;;  %v2710_v63 = vsel %vm1665_vm8, %v2708_v35, %v2709_v31 }
  0xa1   : > { %2238 = vrot.lane.b32.xlu0 %v2198_v17, %s5115_s16  ;;  %v786_v17 = vor.u32 %v784_v46, %v783_v47  ;;  %v2501_v46 = vsel %vm1392_vm9, %v2496_v38, %v2500_v9  ;;  %1004 = vst.msk [vmem:[#allocation2 + $0x88] sm:$0xf] %vm519_vm0, %v795_v39  ;;  %1007 = vst [vmem:[#allocation2 + $0x8c] sm:$0x1] %v1006_v56  ;;  %v1506_v47 = vrot.slane %v1504_v10, 1  ;;  %v1691_v7 = vrot.slane %v5729_v58, 1 }
  0xa2   : > { %v2711_v62 = vrot.slane %v4566_v29, 1  ;;  %v4472_v38 = vcombine.low %v1128_v32, %v5717_v23  ;;  %v1191_v9 = vld [vmem:[#allocation2 + $0x6c] sm:$0xe]  ;;  %v1500_v25 = vsel %vm1392_vm9, %v1495_v20, %v1499_v19  ;;  %v2010_v24 = vshll.u32 %v5798_v57, 16  ;;  %v1216_v56 = vld [vmem:[#allocation2 + $0x78] sm:$0xf] }
  0xa3   : > { %2240 = vrot.lane.b32.xlu1 %v2201_v37, %s5115_s16  ;;  %v5759_v21 = vpop.permute.xlu0 %1826  ;;  %v1002_v0 = vsel %vm5259_vm7, %v786_v17, %v1001_v8  ;;  %v5775_v37 = vcombine.low %v1151_v49, %v5756_v53  ;;  %v5801_v55 = vld [vmem:[#allocation2 + $0x7c] sm:$0xf]  ;;  %v1690_v17 = vrot.slane %v4471_v50, 1  ;;  %v1507_v27 = vor.u32 %v1506_v47, %v1502_v42  ;;  %v5830_v29 = vld [vmem:[#allocation2 + $0x80] ss:$0 sps:$4 sm:$0x11]  }
  0xa4   : > { %1003 = vst [vmem:[#allocation2 + $0x84] sm:$0xf] %v1002_v0  ;;  %v5818_v13 = vcombine.low %v1153_v36, %v5801_v55  ;;  %v4519_v23 = vcombine.low %v1191_v9, %v5756_v53  ;;  %v2713_v58 = vsel %vm1665_vm8, %v2711_v62, %v2712_v4  ;;  %v1693_v10 = vrot.slane %v4472_v38, 1  ;;  %v1192_v0 = vld [vmem:[#allocation2 + $0x78] sm:$0xe] }
  0xa5   : > { %v5742_v18 = vpop.permute.xlu1 %1714  ;;  %2350 = vrot.lane.b32.xlu0 %v5671_v14, %s5113_s10  ;;  %v1008_v14 = vld [vmem:[#allocation2 + $0x90] sm:$0xf]  ;;  %v2005_v22 = vshll.u32 %v5775_v37, 16  ;;  %v2003_v3 = vshrl.u32 %v5775_v37, 16  ;;  %v806_v35 = vshrl.u32 %v5810_v16, 16  ;;  %v2012_v19 = vrot.slane %v2010_v24, 1 }
  0xa6   : > { %v1009_v8 = vsel %vm5259_vm7, %v803_v12, %v1008_v14  ;;  %v1694_v12 = vrot.slane %v5764_v28, 1  ;;  %v2017_v31 = vshll.u32 %v5818_v13, 16  ;;  %v5836_v14 = vld [vmem:[#allocation2 + $0x7c] sm:$0xf]  ;;  %v2202_v32 = vrot.slane %v4519_v23, 1 }
  0xa7   : > { %2352 = vrot.lane.b32.xlu1 %v5691_v60, %s5113_s10  ;;  %v5788_v61 = vpop.permute.xlu0 %2338  ;;  %v1509_v60 = vshll.u32 %v5764_v28, 16  ;;  %1010 = vst [vmem:[#allocation2 + $0x90] sm:$0xf] %v1009_v8  ;;  %v2007_v45 = vrot.slane %v2005_v22, 1  ;;  %v2203_v28 = vrot.slane %v5798_v57, 1  ;;  %v1692_v50 = vsel %vm1665_vm8, %v1690_v17, %v1691_v7 }
  0xa8   : > { %v5842_v42 = vld [vmem:[#allocation2 + $0x78] sm:$0xe]  ;;  %v2015_v22 = vshrl.u32 %v5818_v13, 16  ;;  %v2022_v8 = vshll.u32 %v5830_v29, 16  ;;  %v5850_v57 = vcombine.low %v1216_v56, %v5836_v14  ;;  %v1695_v62 = vsel %vm1665_vm8, %v1693_v10, %v1694_v12  ;;  %v5856_v17 = vld [vmem:[#allocation2 + $0x88] sm:$0xf] }
  0xa9   : > { %v5762_v11 = vpop.permute.xlu1 %1828  ;;  %2622 = vrot.lane.b32.xlu0 %v2501_v46, %s5118_s23  ;;  %v1511_v33 = vrot.slane %v1509_v60, 1  ;;  %v2008_v20 = vor.u32 %v2007_v45, %v2003_v3  ;;  %v1091_v47 = vld [vmem:[#allocation2 + $0x78] sm:$0xf]  ;;  %v808_v60 = vrot.slane %v806_v35, 7  ;;  %v2019_v38 = vrot.slane %v2017_v31, 1 }
  0xaa   : > { %v809_v7 = vshll.u32 %v5810_v16, 16  ;;  %v5868_v23 = vld [vmem:[#allocation2 + $0x80] ss:$0 sps:$4 sm:$0x11]   ;;  %v2206_v45 = vrot.slane %v5830_v29, 1 }
  0xab   : > { %2624 = vrot.lane.b32.xlu1 %v2513_v15, %s5118_s23  ;;  %v1586_v49 = vpop.permute.xlu0 %1585  ;;  %v1512_v53 = vsel %vm1392_vm9, %v1507_v27, %v1511_v33  ;;  %v4520_v15 = vcombine.low %v1192_v0, %v5801_v55  ;;  %v804_v55 = vrot.slane %v5748_v30, 4  ;;  %v1218_v9 = vld [vmem:[#allocation2 + $0x84] sm:$0xf]  ;;  %v2013_v27 = vsel %vm1392_vm9, %v2008_v20, %v2012_v19  ;;  %v499_v12 = vld [vmem:[%s5269_s30 + $0x60] sm:$0xf] }
  0xac   : > { %v5864_v33 = vsel %vm1665_vm8, %v2202_v32, %v2203_v28  ;;  %v4567_v30 = vcombine.low %v5842_v42, %v5836_v14  ;;  %v5876_v10 = vcombine.low %v1218_v9, %v5856_v17  ;;  %v2517_v0 = vshll.u32 %v5850_v57, 16  ;;  %v500_v19 = vld [vmem:[%s5269_s30 + $0x64] sm:$0xf] }
  0xad   : > { %v5794_v52 = vpop.permute.xlu1 %2340  ;;  %2750 = vrot.lane.b32.xlu0 %v2710_v63, %s5116_s19  ;;  %v5852_v63 = vld [vmem:[#allocation2 + $0x7c] sm:$0xf]  ;;  %v2205_v3 = vrot.slane %v4520_v15, 1  ;;  %v813_v35 = vrot.slane %v808_v60, 4  ;;  %v2020_v56 = vor.u32 %v2019_v38, %v2015_v22  ;;  %v2515_v28 = vshrl.u32 %v5850_v57, 16 }
  0xae   : > { %v5872_v16 = vcombine.low %v1091_v47, %v5852_v63  ;;  %v5900_v15 = vld [vmem:[#allocation2 + $0x8c] ss:$0 sps:$4 sm:$0x11]   ;;  %v1157_v42 = vld [vmem:[#allocation2 + $0x90] sm:$0xf] }
  0xaf   : > { %1601 = vrot.lane.b32.xlu1 %v1500_v25, %s5114_s13  ;;  %v5827_v39 = vpop.permute.xlu0 %2226  ;;  %v2772_v25 = vsel %vm2770_vm11, %v5292_v54, %v1586_v49  ;;  %v811_v54 = vor.u32 %v809_v7, %v808_v60  ;;  %v1012_v49 = vld [vmem:[#allocation2 + $0x98] sm:$0x1]  ;;  %v818_v60 = vshll.u32 %v499_v12, 16 }
  0xb0   : > { %v2805_v29 = vsel %vm2803_vm12, %v2772_v25, %v5742_v18  ;;  %v2522_v18 = vshll.u32 %v5868_v23, 16  ;;  %v1514_v47 = vshrl.u32 %v5872_v16, 16  ;;  %v2207_v25 = vsel %vm1665_vm8, %v2205_v3, %v2206_v45 }
  0xb1   : > { %v5815_v1 = vpop.permute.xlu1 %1716  ;;  %2752 = vrot.lane.b32.xlu0 %v2713_v58, %s5116_s19  ;;  %v2024_v58 = vrot.slane %v2022_v8, 1  ;;  %v812_v20 = vsel %vm5237_vm4, %v804_v55, %v811_v54  ;;  %v2838_v22 = vsel %vm2836_vm13, %v2805_v29, %v5759_v21  ;;  %v2529_v55 = vshll.u32 %v5876_v10, 16  ;;  %v1093_v54 = vld [vmem:[#allocation2 + $0x84] sm:$0xf] }
  0xb2   : > { %1011 = vst.msk [vmem:[#allocation2 + $0x94] sm:$0xf] %vm519_vm0, %v812_v20  ;;  %v2534_v45 = vshll.u32 %v5900_v15, 16  ;;  %v826_v29 = vshll.u32 %v500_v19, 16 }
  0xb3   : > { %1603 = vrot.lane.b32.xlu1 %v1512_v53, %s5114_s13  ;;  %v5845_v36 = vpop.permute.xlu0 %2738  ;;  %v2025_v9 = vsel %vm1392_vm9, %v2020_v56, %v2024_v58  ;;  %v1516_v58 = vshll.u32 %v5872_v16, 16 }
  0xb5   : > { %v5833_v46 = vpop.permute.xlu1 %2228  ;;  %1730 = vrot.lane.b32.xlu0 %v1692_v50, %s5111_s8 }
  0xb7   : > { %1732 = vrot.lane.b32.xlu1 %v1695_v62, %s5111_s8  ;;  %v1588_v24 = vpop.permute.xlu0 %1587  ;;  %v823_v62 = vshrl.u32 %v500_v19, 16 }
  0xb8   : > { %v2774_v53 = vsel %vm2770_vm11, %v5327_v48, %v1588_v24  ;;  %v1013_v48 = vsel %vm5254_vm6, %v813_v35, %v1012_v49  ;;  %v2519_v24 = vrot.slane %v2517_v0, 1  ;;  %v5921_v35 = vld [vmem:[#allocation2 + $0x80] ss:$0 sps:$4 sm:$0x11]  }
  0xb9   : > { %v2101_v4 = vpop.permute.xlu1 %2100  ;;  %v2807_v32 = vsel %vm2803_vm12, %v2774_v53, %v5815_v1  ;;  %1842 = vrot.lane.b32.xlu0 %v5775_v37, %s5112_s9  ;;  %1014 = vst [vmem:[#allocation2 + $0x98] sm:$0x1] %v1013_v48  ;;  %v815_v1 = vshrl.u32 %v499_v12, 16  ;;  %v2527_v53 = vshrl.u32 %v5876_v10, 16  ;;  %v825_v0 = vrot.slane %v823_v62, 7 }
  0xba   : > { %v2840_v50 = vsel %vm2836_vm13, %v2807_v32, %v5762_v11  ;;  %v1015_v11 = vld [vmem:[#allocation2 + $0x9c] sm:$0xf]  ;;  %v1129_v32 = vld [vmem:[#allocation2 + $0x78] sm:$0xe] }
  0xbb   : > { %1844 = vrot.lane.b32.xlu1 %v5818_v13, %s5112_s9  ;;  %v2873_v37 = vsel %vm2869_vm14, %v2840_v50, %v2101_v4  ;;  %v2099_v8 = vpop.permute.xlu0 %2098  ;;  %v5914_v13 = vld [vmem:[#allocation2 + $0x88] sm:$0xf]  ;;  %v817_v4 = vrot.slane %v815_v1, 7  ;;  %v1019_v50 = vld [vmem:[#allocation2 + $0xa4] sm:$0x1]  ;;  %v828_v62 = vor.u32 %v826_v29, %v825_v0 }
  0xbc   : > { %v2871_v38 = vsel %vm2869_vm14, %v2838_v22, %v2099_v8  ;;  %v2906_v21 = vsel %vm2902_vm15, %v2873_v37, %v5833_v46  ;;  %v2520_v37 = vor.u32 %v2519_v24, %v2515_v28  ;;  %v2524_v22 = vrot.slane %v2522_v18, 1 }
  0xbd   : > { %v5884_v31 = vpop.permute.xlu1 %2612  ;;  %v2904_v49 = vsel %vm2902_vm15, %v2871_v38, %v5827_v39  ;;  %2114 = vrot.lane.b32.xlu0 %v2013_v27, %s5117_s22  ;;  %v820_v12 = vor.u32 %v818_v60, %v817_v4  ;;  %v2531_v39 = vrot.slane %v2529_v55, 1  ;;  %v5930_v27 = vcombine.low %v1093_v54, %v5914_v13  ;;  %v1257_v60 = vld [vmem:[#allocation2 + $0x84] sm:$0xe]  ;;  %v5951_v54 = vld [vmem:[#allocation2 + $0x8c] ss:$0 sps:$4 sm:$0x11]  }
  0xbe   : > { %v2937_v3 = vsel %vm2935_vm2, %v2904_v49, %v5788_v61  ;;  %v2939_v56 = vsel %vm2935_vm2, %v2906_v21, %v5794_v52  ;;  %v821_v48 = vrot.slane %v817_v4, 4  ;;  %v1521_v52 = vshll.u32 %v5921_v35, 16  ;;  %v1130_v21 = vld [vmem:[#allocation2 + $0x84] sm:$0xe] }
  0xbf   : > { %2116 = vrot.lane.b32.xlu1 %v2025_v9, %s5117_s22  ;;  %v2611_v46 = vpop.permute.xlu0 %2610  ;;  %v1016_v19 = vsel %vm5259_vm7, %v820_v12, %v1015_v11  ;;  %v2536_v8 = vrot.slane %v2534_v45, 1  ;;  %v1518_v55 = vrot.slane %v1516_v58, 1  ;;  %v830_v38 = vrot.slane %v825_v0, 4  ;;  %v5948_v9 = vld [vmem:[#allocation2 + $0x88] sm:$0xf] }
  0xc0   : > { %v2970_v20 = vsel %vm2968_vm5, %v2937_v3, %v2611_v46  ;;  %1017 = vst [vmem:[#allocation2 + $0x9c] sm:$0xf] %v1016_v19  ;;  %v2972_v11 = vsel %vm2968_vm5, %v2939_v56, %v5884_v31  ;;  %v2532_v18 = vor.u32 %v2531_v39, %v2527_v53  ;;  %v1528_v4 = vshll.u32 %v5930_v27, 16  ;;  %v501_v3 = vld [vmem:[%s5269_s30 + $0x68] sm:$0xf] }
  0xc1   : > { %v5911_v7 = vpop.permute.xlu1 %1589  ;;  %2242 = vrot.lane.b32.xlu0 %v5864_v33, %s5115_s16  ;;  %v3003_v1 = vsel %vm3001_vm3, %v2970_v20, %v5845_v36  ;;  %v1155_v36 = vld [vmem:[#allocation2 + $0x84] sm:$0xf]  ;;  %v829_v49 = vsel %vm5237_vm4, %v821_v48, %v828_v62  ;;  %v4568_v31 = vcombine.low %v1257_v60, %v5856_v17  ;;  %v4473_v24 = vcombine.low %v1129_v32, %v5852_v63  ;;  %v1158_v56 = vld [vmem:[#allocation2 + $0x94] sm:$0xf]  ;;  %v1194_v62 = vld [vmem:[#allocation2 + $0x90] sm:$0xe] }
  0xc2   : > { %4810 = vmatprep.mubr.msk.bf16.mxu0 %vm3070_vm1, %v3003_v1  ;;  %1018 = vst.msk [vmem:[#allocation2 + $0xa0] sm:$0xf] %vm519_vm0, %v829_v49  ;;  %v1020_v58 = vsel %vm5254_vm6, %v830_v38, %v1019_v50  ;;  %v2525_v45 = vsel %vm1392_vm9, %v2520_v37, %v2524_v22  ;;  %v2714_v17 = vrot.slane %v4567_v30, 1  ;;  %v5973_v12 = vcombine.low %v1155_v36, %v5948_v9  ;;  %v502_v30 = vld [vmem:[%s5269_s30 + $0x6c] sm:$0xf] }
  0xc3   : > { %2244 = vrot.lane.b32.xlu1 %v2207_v25, %s5115_s16  ;;  %v2741_v33 = vpop.permute.xlu0 %2740  ;;  %1021 = vst [vmem:[#allocation2 + $0xa4] sm:$0x1] %v1020_v58  ;;  %v1519_v29 = vor.u32 %v1518_v55, %v1514_v47  ;;  %v1523_v46 = vrot.slane %v1521_v52, 1  ;;  %v1526_v53 = vshrl.u32 %v5930_v27, 16  ;;  %v4474_v14 = vcombine.low %v1130_v21, %v5914_v13  ;;  %v1193_v19 = vld [vmem:[#allocation2 + $0x84] sm:$0xe] }
  0xc4   : > { %v3005_v28 = vsel %vm3001_vm3, %v2972_v11, %v2741_v33  ;;  %v1530_v39 = vrot.slane %v1528_v4, 1  ;;  %v1533_v0 = vshll.u32 %v5951_v54, 16  ;;  %v832_v20 = vshrl.u32 %v501_v3, 16  ;;  %v5990_v50 = vld [vmem:[#allocation2 + $0x8c] ss:$0 sps:$4 sm:$0x11]  }
  0xc5   : > { %v5935_v61 = vpop.permute.xlu1 %1591  ;;  %2354 = vrot.lane.b32.xlu0 %v5850_v57, %s5113_s10  ;;  %4811 = vmatmul.mubr.msk.bf16.vlgmr.msra.gmra.mrb[0].mxu0 %vm3070_vm1, %v3005_v28  ;;  %v2715_v57 = vrot.slane %v5868_v23, 1  ;;  %v2537_v23 = vsel %vm1392_vm9, %v2532_v18, %v2536_v8  ;;  %v2718_v32 = vrot.slane %v5900_v15, 1  ;;  %v1696_v47 = vrot.slane %v4473_v24, 1  ;;  %v1220_v18 = vld [vmem:[#allocation2 + $0x90] sm:$0xf] }
  0xc6   : > { %v2029_v13 = vshll.u32 %v5973_v12, 16  ;;  %v1524_v37 = vsel %vm1392_vm9, %v1519_v29, %v1523_v46  ;;  %v1699_v22 = vrot.slane %v4474_v14, 1  ;;  %v5998_v52 = vcombine.low %v1157_v42, %v1158_v56 }
  0xc7   : > { %2356 = vrot.lane.b32.xlu1 %v5876_v10, %s5113_s10  ;;  %v5977_v63 = vpop.permute.xlu0 %1718  ;;  %v2717_v10 = vrot.slane %v4568_v31, 1  ;;  %v2716_v48 = vsel %vm1665_vm8, %v2714_v17, %v2715_v57  ;;  %v840_v15 = vshrl.u32 %v502_v30, 16  ;;  %v1531_v8 = vor.u32 %v1530_v39, %v1526_v53  ;;  %v6006_v31 = vld [vmem:[#allocation2 + $0x94] sm:$0xf] }
  0xc8   : > { %v1535_v55 = vrot.slane %v1533_v0, 1  ;;  %v834_v38 = vrot.slane %v832_v20, 7  ;;  %v835_v11 = vshll.u32 %v501_v3, 16  ;;  %v1697_v33 = vrot.slane %v5921_v35, 1 }
  0xc9   : > { %v5960_v25 = vpop.permute.xlu1 %1720  ;;  %2626 = vrot.lane.b32.xlu0 %v2525_v45, %s5118_s23  ;;  %v4521_v36 = vcombine.low %v1193_v19, %v5948_v9  ;;  %v2027_v28 = vshrl.u32 %v5973_v12, 16  ;;  %v2719_v4 = vsel %vm1665_vm8, %v2717_v10, %v2718_v32  ;;  %v2031_v21 = vrot.slane %v2029_v13, 1  ;;  %v5016_v3 = vld [vmem:[#allocation2 + $0x98] ss:$0 sps:$4 sm:$0x11]  }
  0xca   : > { %v2034_v49 = vshll.u32 %v5990_v50, 16  ;;  %v2041_v58 = vshll.u32 %v5998_v52, 16  ;;  %v842_v35 = vrot.slane %v840_v15, 7  ;;  %v843_v45 = vshll.u32 %v502_v30, 16  ;;  %v6033_v15 = vld [vmem:[%s5269_s30 + $0x74] sm:$0xf] }
  0xcb   : > { %2628 = vrot.lane.b32.xlu1 %v2537_v23, %s5118_s23  ;;  %v5995_v60 = vpop.permute.xlu0 %1830  ;;  %v1536_v9 = vsel %vm1392_vm9, %v1531_v8, %v1535_v55  ;;  %v1700_v17 = vrot.slane %v5951_v54, 1  ;;  %v4522_v57 = vcombine.low %v1194_v62, %v1158_v56  ;;  %v837_v29 = vor.u32 %v835_v11, %v834_v38  ;;  %v1022_v23 = vld [vmem:[#allocation2 + $0xa8] sm:$0xf]  ;;  %v6041_v11 = vld [vmem:[#allocation2 + $0xa0] sm:$0xf] }
  0xcc   : > { %v1698_v53 = vsel %vm1665_vm8, %v1696_v47, %v1697_v33  ;;  %v2208_v14 = vrot.slane %v4521_v36, 1  ;;  %v838_v42 = vrot.slane %v834_v38, 4  ;;  %v2032_v39 = vor.u32 %v2031_v21, %v2027_v28  ;;  %v1222_v38 = vld [vmem:[#allocation2 + $0x9c] sm:$0xf] }
  0xcd   : > { %v5993_v1 = vpop.permute.xlu1 %1832  ;;  %2754 = vrot.lane.b32.xlu0 %v2716_v48, %s5116_s19  ;;  %v2036_v0 = vrot.slane %v2034_v49, 1  ;;  %v2209_v30 = vrot.slane %v5990_v50, 1  ;;  %v6020_v20 = vcombine.low %v1220_v18, %v6006_v31  ;;  %v2039_v56 = vshrl.u32 %v5998_v52, 16  ;;  %v1026_v48 = vld [vmem:[#allocation2 + $0xb0] sm:$0x1] }
  0xce   : > { %v2043_v10 = vrot.slane %v2041_v58, 1  ;;  %v2046_v32 = vshll.u32 %v5016_v3, 16  ;;  %v845_v47 = vor.u32 %v843_v45, %v842_v35  ;;  %v1701_v19 = vsel %vm1665_vm8, %v1699_v22, %v1700_v17  ;;  %v6030_v50 = vld [vmem:[%s5269_s30 + $0x70] sm:$0xf]  ;;  %v6052_v18 = vld [vmem:[#allocation2 + $0x94] sm:$0xf] }
  0xcf   : > { %1605 = vrot.lane.b32.xlu1 %v1524_v37, %s5114_s13  ;;  %v6009_v24 = vpop.permute.xlu0 %2102  ;;  %v2211_v13 = vrot.slane %v4522_v57, 1  ;;  %v1023_v37 = vsel %vm5259_vm7, %v837_v29, %v1022_v23  ;;  %v2778_v8 = vsel %vm2770_vm11, %v5374_v51, %v5935_v61  ;;  %v2212_v62 = vrot.slane %v5016_v3, 1  ;;  %v1095_v61 = vld [vmem:[#allocation2 + $0x90] sm:$0xf] }
  0xd0   : > { %v846_v22 = vsel %vm5237_vm4, %v838_v42, %v845_v47  ;;  %1024 = vst [vmem:[#allocation2 + $0xa8] sm:$0xf] %v1023_v37  ;;  %v847_v33 = vrot.slane %v842_v35, 4  ;;  %v2776_v36 = vsel %vm2770_vm11, %v5360_v34, %v5911_v7  ;;  %v6049_v28 = vsel %vm1665_vm8, %v2208_v14, %v2209_v30  ;;  %v6057_v3 = vld [vmem:[#allocation2 + $0x98] ss:$0 sps:$4 sm:$0x11]  }
  0xd1   : > { %v6014_v46 = vpop.permute.xlu1 %2104  ;;  %2756 = vrot.lane.b32.xlu0 %v2719_v4, %s5116_s19  ;;  %v2541_v51 = vshll.u32 %v6020_v20, 16  ;;  %1025 = vst.msk [vmem:[#allocation2 + $0xac] sm:$0xf] %vm519_vm0, %v846_v22  ;;  %v2044_v21 = vor.u32 %v2043_v10, %v2039_v56  ;;  %v2048_v49 = vrot.slane %v2046_v32, 1  ;;  %v2037_v58 = vsel %vm1392_vm9, %v2032_v39, %v2036_v0  ;;  %v1029_v14 = vld [vmem:[#allocation2 + $0xb4] sm:$0xf] }
  0xd2   : > { %v1027_v34 = vsel %vm5254_vm6, %v847_v33, %v1026_v48  ;;  %v2811_v7 = vsel %vm2803_vm12, %v2778_v8, %v5960_v25  ;;  %v6064_v35 = vcombine.low %v1222_v38, %v6041_v11  ;;  %v849_v45 = vshrl.u32 %v6030_v50, 16  ;;  %v1097_v32 = vld [vmem:[#allocation2 + $0x9c] sm:$0xf]  ;;  %v6092_v47 = vld [vmem:[#allocation2 + $0xa0] sm:$0xf] }
  0xd3   : > { %1607 = vrot.lane.b32.xlu1 %v1536_v9, %s5114_s13  ;;  %v6023_v54 = vpop.permute.xlu0 %2230  ;;  %1028 = vst [vmem:[#allocation2 + $0xb0] sm:$0x1] %v1027_v34  ;;  %v852_v9 = vshll.u32 %v6030_v50, 16  ;;  %v6071_v57 = vsel %vm1665_vm8, %v2211_v13, %v2212_v62  ;;  %v6074_v29 = vcombine.low %v1095_v61, %v6052_v18  ;;  %v857_v25 = vshrl.u32 %v6033_v15, 16  ;;  %v1033_v33 = vld [vmem:[#allocation2 + $0xbc] sm:$0x1] }
  0xd4   : > { %v2809_v42 = vsel %vm2803_vm12, %v2776_v36, %v5977_v63  ;;  %v2539_v23 = vshrl.u32 %v6020_v20, 16  ;;  %v2543_v39 = vrot.slane %v2541_v51, 1  ;;  %v851_v0 = vrot.slane %v849_v45, 7  ;;  %v5058_v36 = vld [vmem:[%s5269_s30] sm:$0xf] }
  0xd5   : > { %v6038_v55 = vpop.permute.xlu1 %2232  ;;  %1734 = vrot.lane.b32.xlu0 %v1698_v53, %s5111_s8  ;;  %v860_v53 = vshll.u32 %v6033_v15, 16  ;;  %v2842_v30 = vsel %vm2836_vm13, %v2809_v42, %v5995_v60  ;;  %v2049_v10 = vsel %vm1392_vm9, %v2044_v21, %v2048_v49  ;;  %v2546_v63 = vshll.u32 %v6057_v3, 16  ;;  %v5059_v51 = vld [vmem:[%s5269_s30 + $0x4] sm:$0xf]  ;;  %v1258_v49 = vld [vmem:[#allocation2 + $0x90] sm:$0xe] }
  0xd6   : > { %v859_v48 = vrot.slane %v857_v25, 7  ;;  %v2875_v60 = vsel %vm2869_vm14, %v2842_v30, %v6009_v24  ;;  %v854_v13 = vor.u32 %v852_v9, %v851_v0  ;;  %v855_v37 = vrot.slane %v851_v0, 4  ;;  %v6110_v34 = vld [vmem:[#allocation2 + $0x98] ss:$0 sps:$4 sm:$0x11]  }
  0xd7   : > { %1736 = vrot.lane.b32.xlu1 %v1701_v19, %s5111_s8  ;;  %v2343_v4 = vpop.permute.xlu0 %2342  ;;  %v2553_v19 = vshll.u32 %v6064_v35, 16  ;;  %v2908_v8 = vsel %vm2902_vm15, %v2875_v60, %v6023_v54  ;;  %v1540_v38 = vshll.u32 %v6074_v29, 16  ;;  %v4596_v61 = vcombine.low %v5058_v36, %v5059_v51  ;;  %v6157_v51 = vld [vmem:[%s5269_s30 + $0x78] sm:$0xf] }
  0xd8   : > { %v862_v22 = vor.u32 %v860_v53, %v859_v48  ;;  %v2844_v24 = vsel %vm2836_vm13, %v2811_v7, %v5993_v1  ;;  %v2941_v21 = vsel %vm2935_vm2, %v2908_v8, %v2343_v4  ;;  %v6113_v54 = vcombine.low %v1097_v32, %v6092_v47 }
  0xd9   : > { %v2345_v17 = vpop.permute.xlu1 %2344  ;;  %1846 = vrot.lane.b32.xlu0 %v5973_v12, %s5112_s9  ;;  %v6084_v12 = vld [vmem:[%s6912_s4] sm:$0xf]  ;;  %v2551_v25 = vshrl.u32 %v6064_v35, 16  ;;  %v864_v4 = vrot.slane %v859_v48, 4  ;;  %4844 = vmatprep.mubr.msk.bf16.mxu1 %vm2770_vm11, %v4596_v61  ;;  %v2877_v7 = vsel %vm2869_vm14, %v2844_v24, %v6014_v46  ;;  %v2544_v32 = vor.u32 %v2543_v39, %v2539_v23 }
  0xda   : > { %4877 = vmatprep.subr.msk.bf16.mxu1 %vm3103_vm10, %v6084_v12  ;;  %v863_v1 = vsel %vm5237_vm4, %v855_v37, %v862_v22  ;;  %v2910_v0 = vsel %vm2902_vm15, %v2877_v7, %v6038_v55  ;;  %v2548_v48 = vrot.slane %v2546_v63, 1  ;;  %v1545_v60 = vshll.u32 %v6110_v34, 16  ;;  %v1131_v37 = vld [vmem:[#allocation2 + $0x90] sm:$0xe] }
  0xdb   : > { %1848 = vrot.lane.b32.xlu1 %v5998_v52, %s5112_s9  ;;  %v2615_v56 = vpop.permute.xlu0 %2614  ;;  %v6099_v52 = vld [vmem:[#allocation2 + $0xa4] ss:$0 sps:$4 sm:$0x11]   ;;  %1032 = vst.msk [vmem:[#allocation2 + $0xb8] sm:$0xf] %vm519_vm0, %v863_v1  ;;  %v1034_v46 = vsel %vm5254_vm6, %v864_v4, %v1033_v33  ;;  %v1552_v63 = vshll.u32 %v6113_v54, 16 }
  0xdc   : > { %v2974_v45 = vsel %vm2968_vm5, %v2941_v21, %v2615_v56  ;;  %v2558_v42 = vshll.u32 %v6099_v52, 16  ;;  %v4569_v56 = vcombine.low %v1258_v49, %v6006_v31  ;;  %1035 = vst [vmem:[#allocation2 + $0xbc] sm:$0x1] %v1034_v46  ;;  %v1542_v31 = vrot.slane %v1540_v38, 1  ;;  %v1159_v49 = vld [vmem:[#allocation2 + $0x9c] sm:$0xf] }
  0xdd   : > { %v2617_v62 = vpop.permute.xlu1 %2616  ;;  %2118 = vrot.lane.b32.xlu0 %v2037_v58, %s5117_s22  ;;  %v1030_v58 = vsel %vm5259_vm7, %v854_v13, %v1029_v14  ;;  %v2555_v14 = vrot.slane %v2553_v19, 1  ;;  %v1259_v19 = vld [vmem:[#allocation2 + $0x9c] sm:$0xe]  ;;  %v1538_v13 = vshrl.u32 %v6074_v29, 16  ;;  %v2549_v33 = vsel %vm1392_vm9, %v2544_v32, %v2548_v48  ;;  %v1161_v4 = vld [vmem:[#allocation2 + $0xa8] sm:$0xf] }
  0xde   : > { %1031 = vst [vmem:[#allocation2 + $0xb4] sm:$0xf] %v1030_v58  ;;  %v2560_v23 = vrot.slane %v2558_v42, 1  ;;  %v6145_v39 = vld [vmem:[#allocation2 + $0xa4] ss:$0 sps:$4 sm:$0x11]   ;;  %v4570_v38 = vcombine.low %v1259_v19, %v6041_v11  ;;  %v4475_v21 = vcombine.low %v1131_v37, %v6052_v18 }
  0xdf   : > { %2120 = vrot.lane.b32.xlu1 %v2049_v10, %s5117_s22  ;;  %v2743_v9 = vpop.permute.xlu0 %2742  ;;  %v2943_v10 = vsel %vm2935_vm2, %v2910_v0, %v2345_v17  ;;  %v2556_v17 = vor.u32 %v2555_v14, %v2551_v25  ;;  %v1547_v36 = vrot.slane %v1545_v60, 1  ;;  %v1543_v24 = vor.u32 %v1542_v31, %v1538_v13  ;;  %v6164_v58 = vld [vmem:[#allocation2 + $0xa0] sm:$0xf]  ;;  %v6170_v25 = vld [vmem:[%s5269_s30 + $0x7c] sm:$0xf] }
  0xe0   : > { %v3007_v53 = vsel %vm3001_vm3, %v2974_v45, %v2743_v9  ;;  %v2976_v55 = vsel %vm2968_vm5, %v2943_v10, %v2617_v62  ;;  %v2721_v62 = vrot.slane %v6057_v3, 1  ;;  %v1550_v11 = vshrl.u32 %v6113_v54, 16  ;;  %v6176_v18 = vld [vmem:[#allocation2 + $0xac] sm:$0xf] }
  0xe1   : > { %v6130_v30 = vpop.permute.xlu1 %1593  ;;  %2246 = vrot.lane.b32.xlu0 %v6049_v28, %s5115_s16  ;;  %4814 = vmatprep.mubr.msk.bf16.mxu0 %vm3070_vm1, %v3007_v53  ;;  %v2561_v3 = vsel %vm1392_vm9, %v2556_v17, %v2560_v23  ;;  %v1554_v45 = vrot.slane %v1552_v63, 1  ;;  %v1557_v9 = vshll.u32 %v6145_v39, 16  ;;  %v2723_v7 = vrot.slane %v4570_v38, 1  ;;  %v1196_v23 = vld [vmem:[#allocation2 + $0xa8] sm:$0xe] }
  0xe2   : > { %v2724_v53 = vrot.slane %v6099_v52, 1  ;;  %v6181_v42 = vcombine.low %v1159_v49, %v6164_v58  ;;  %v1702_v46 = vrot.slane %v4475_v21, 1  ;;  %v1703_v10 = vrot.slane %v6110_v34, 1  ;;  %v1195_v63 = vld [vmem:[#allocation2 + $0x9c] sm:$0xe] }
  0xe3   : > { %2248 = vrot.lane.b32.xlu1 %v6071_v57, %s5115_s16  ;;  %v2745_v28 = vpop.permute.xlu0 %2744  ;;  %v2720_v57 = vrot.slane %v4569_v56, 1  ;;  %v1548_v56 = vsel %vm1392_vm9, %v1543_v24, %v1547_v36  ;;  %v866_v32 = vshrl.u32 %v6157_v51, 16  ;;  %v1555_v48 = vor.u32 %v1554_v45, %v1550_v11  ;;  %v6206_v38 = vld [vmem:[#allocation2 + $0xb0] ss:$0 sps:$4 sm:$0x11]  }
  0xe4   : > { %v3009_v8 = vsel %vm3001_vm3, %v2976_v55, %v2745_v28  ;;  %v1559_v60 = vrot.slane %v1557_v9, 1  ;;  %v6190_v52 = vcombine.low %v1161_v4, %v6176_v18  ;;  %v6196_v28 = vld [vmem:[#allocation2 + $0xa4] ss:$0 sps:$4 sm:$0x11]   ;;  %v869_v19 = vshll.u32 %v6157_v51, 16 }
  0xe5   : > { %v6148_v22 = vpop.permute.xlu1 %1595  ;;  %2358 = vrot.lane.b32.xlu0 %v6020_v20, %s5113_s10  ;;  %4815 = vmatmul.mubr.msk.bf16.gmra.mrb[4].mxu0 %vm3070_vm1, %v3009_v8  ;;  %v1132_v20 = vld [vmem:[#allocation2 + $0x9c] sm:$0xe]  ;;  %v2725_v13 = vsel %vm1665_vm8, %v2723_v7, %v2724_v53  ;;  %v1706_v31 = vrot.slane %v6145_v39, 1  ;;  %v2053_v37 = vshll.u32 %v6181_v42, 16  ;;  %v1036_v8 = vld [vmem:[#allocation2 + $0xc0] sm:$0xf]  ;;  %v1704_v9 = vsel %vm1665_vm8, %v1702_v46, %v1703_v10 }
  0xe6   : > { %v4476_v14 = vcombine.low %v1132_v20, %v6092_v47  ;;  %v874_v47 = vshrl.u32 %v6170_v25, 16  ;;  %v2051_v36 = vshrl.u32 %v6181_v42, 16  ;;  %v2058_v20 = vshll.u32 %v6196_v28, 16  ;;  %v1040_v11 = vld [vmem:[#allocation2 + $0xc8] sm:$0x1] }
  0xe7   : > { %2360 = vrot.lane.b32.xlu1 %v6064_v35, %s5113_s10  ;;  %v6161_v61 = vpop.permute.xlu0 %1722  ;;  %v2722_v35 = vsel %vm1665_vm8, %v2720_v57, %v2721_v62  ;;  %v868_v57 = vrot.slane %v866_v32, 7  ;;  %v1560_v62 = vsel %vm1392_vm9, %v1555_v48, %v1559_v60  ;;  %v1224_v4 = vld [vmem:[#allocation2 + $0xa8] sm:$0xf]  ;;  %v6217_v7 = vld [vmem:[#allocation2 + $0xac] sm:$0xf]  ;;  %v4523_v32 = vcombine.low %v1195_v63, %v6164_v58 }
  0xe8   : > { %v1705_v34 = vrot.slane %v4476_v14, 1  ;;  %v876_v24 = vrot.slane %v874_v47, 7  ;;  %v2063_v47 = vshrl.u32 %v6190_v52, 16  ;;  %v2070_v10 = vshll.u32 %v6206_v38, 16  ;;  %v6233_v58 = vld [vmem:[#allocation2 + $0xb8] sm:$0xf] }
  0xe9   : > { %v6172_v1 = vpop.permute.xlu1 %1724  ;;  %2630 = vrot.lane.b32.xlu0 %v2549_v33, %s5118_s23  ;;  %v2065_v33 = vshll.u32 %v6190_v52, 16  ;;  %v871_v21 = vor.u32 %v869_v19, %v868_v57  ;;  %v872_v49 = vrot.slane %v868_v57, 4  ;;  %v6236_v6 = vcombine.low %v1224_v4, %v6217_v7 }
  0xea   : > { %v1707_v45 = vsel %vm1665_vm8, %v1705_v34, %v1706_v31  ;;  %v881_v53 = vrot.slane %v876_v24, 4  ;;  %v2215_v5 = vrot.slane %v6196_v28, 1  ;;  %v3398_v2 = vsel %vm3103_vm10, %v6084_v12, 0  ;;  %v6258_v12 = vld [vmem:[#allocation2 + $0xb0] ss:$0 sps:$4 sm:$0x11]  }
  0xeb   : > { %2632 = vrot.lane.b32.xlu1 %v2561_v3, %s5118_s23  ;;  %v6184_v0 = vpop.permute.xlu0 %1834  ;;  %v877_v3 = vshll.u32 %v6170_v25, 16  ;;  %v1037_v60 = vsel %vm5259_vm7, %v871_v21, %v1036_v8  ;;  %v2067_v46 = vrot.slane %v2065_v33, 1  ;;  %v1099_v8 = vld [vmem:[#allocation2 + $0xa8] sm:$0xf]  ;;  %v2072_v28 = vrot.slane %v2070_v10, 1  ;;  %4843 = vmatpush3.bf16.msra.mxu1 %v3398_v2 }
  0xec   : > { %1038 = vst [vmem:[#allocation2 + $0xc0] sm:$0xf] %v1037_v60  ;;  %v1041_v19 = vsel %vm5254_vm6, %v881_v53, %v1040_v11  ;;  %v5060_v33 = vld [vmem:[%s5269_s30 + $0x8] sm:$0xf]  ;;  %v2218_v21 = vrot.slane %v6206_v38, 1 }
  0xed   : > { %v6193_v55 = vpop.permute.xlu1 %1836  ;;  %2758 = vrot.lane.b32.xlu0 %v2722_v35, %s5116_s19  ;;  %v2055_v35 = vrot.slane %v2053_v37, 1  ;;  %v879_v48 = vor.u32 %v877_v3, %v876_v24  ;;  %1042 = vst [vmem:[#allocation2 + $0xc8] sm:$0x1] %v1041_v19  ;;  %v2060_v37 = vrot.slane %v2058_v20, 1  ;;  %v2068_v20 = vor.u32 %v2067_v46, %v2063_v47  ;;  %v5062_v38 = vld [vmem:[%s5269_s30 + $0x10] sm:$0xf] }
  0xee   : > { %v2780_v3 = vsel %vm2770_vm11, %v5462_v59, %v6130_v30  ;;  %v1101_v59 = vld [vmem:[#allocation2 + $0xb4] sm:$0xf]  ;;  %v2782_v30 = vsel %vm2770_vm11, %v5481_v26, %v6148_v22  ;;  %v6277_v60 = vld [vmem:[#allocation2 + $0xbc] ss:$0 sps:$4 sm:$0x11]  }
  0xef   : > { %1609 = vrot.lane.b32.xlu1 %v1548_v56, %s5114_s13  ;;  %v6203_v17 = vpop.permute.xlu0 %2106  ;;  %v4524_v56 = vcombine.low %v1196_v23, %v6176_v18  ;;  %v1226_v18 = vld [vmem:[#allocation2 + $0xb4] sm:$0xf]  ;;  %v880_v34 = vsel %vm5237_vm4, %v872_v49, %v879_v48  ;;  %v2056_v31 = vor.u32 %v2055_v35, %v2051_v36  ;;  %v6241_v23 = vld [vmem:[#allocation2 + $0xac] sm:$0xf]  ;;  %v2813_v53 = vsel %vm2803_vm12, %v2780_v3, %v6161_v61  ;;  %v6280_v47 = vld [vmem:[#allocation2 + $0xb8] sm:$0xf] }
  0xf0   : > { %1039 = vst.msk [vmem:[#allocation2 + $0xc4] sm:$0xf] %vm519_vm0, %v880_v34  ;;  %v5061_v36 = vld [vmem:[%s5269_s30 + $0xc] sm:$0xf]  ;;  %v6251_v49 = vcombine.low %v1226_v18, %v6233_v58  ;;  %v5063_v35 = vld [vmem:[%s5269_s30 + $0x14] sm:$0xf]  ;;  %v2073_v22 = vsel %vm1392_vm9, %v2068_v20, %v2072_v28  ;;  %v2815_v34 = vsel %vm2803_vm12, %v2782_v30, %v6172_v1 }
  0xf1   : > { %v6210_v39 = vpop.permute.xlu1 %2108  ;;  %2760 = vrot.lane.b32.xlu0 %v2725_v13, %s5116_s19  ;;  %v2217_v57 = vrot.slane %v4524_v56, 1  ;;  %v4597_v24 = vcombine.low %v5060_v33, %v5061_v36  ;;  %v4598_v4 = vcombine.low %v5062_v38, %v5063_v35  ;;  %v2061_v56 = vsel %vm1392_vm9, %v2056_v31, %v2060_v37  ;;  %v6306_v1 = vld [vmem:[#allocation2 + $0xb0] ss:$0 sps:$4 sm:$0x11]   ;;  %v5064_v2 = vld [vmem:[%s5269_s30 + $0x18] sm:$0xf] }
  0xf2   : > { %v2563_v61 = vshrl.u32 %v6236_v6, 16  ;;  %v2570_v18 = vshll.u32 %v6258_v12, 16  ;;  %v2575_v37 = vshrl.u32 %v6251_v49, 16  ;;  %v5065_v33 = vld [vmem:[%s5269_s30 + $0x1c] sm:$0xf] }
  0xf3   : > { %1611 = vrot.lane.b32.xlu1 %v1560_v62, %s5114_s13  ;;  %v6220_v14 = vpop.permute.xlu0 %2234  ;;  %v2214_v62 = vrot.slane %v4523_v32, 1  ;;  %4845 = vmatmul.mubr.msk.bf16.vlgmr.msra.gmra.mrb[0].mxu1 %vm2770_vm11, %v4597_v24  ;;  %v4599_v36 = vcombine.low %v5064_v2, %v5065_v33  ;;  %v5070_v2 = vld [vmem:[%s5269_s30 + $0x30] sm:$0xf] }
  0xf4   : > { %4848 = vmatprep.mubr.msk.bf16.mxu1 %vm2770_vm11, %v4598_v4 }
  0xf5   : > { %v6230_v13 = vpop.permute.xlu1 %2236  ;;  %1738 = vrot.lane.b32.xlu0 %v1704_v9, %s5111_s8  ;;  %v6262_v9 = vcombine.low %v1099_v8, %v6241_v23  ;;  %v2216_v48 = vsel %vm1665_vm8, %v2214_v62, %v2215_v5  ;;  %v2848_v5 = vsel %vm2836_vm13, %v2815_v34, %v6193_v55  ;;  %v2582_v62 = vshll.u32 %v6277_v60, 16  ;;  %v5066_v55 = vld [vmem:[%s5269_s30 + $0x20] sm:$0xf] }
  0xf6   : > { %v2881_v24 = vsel %vm2869_vm14, %v2848_v5, %v6210_v39  ;;  %v5068_v5 = vld [vmem:[%s5269_s30 + $0x28] sm:$0xf] }
  0xf7   : > { %1740 = vrot.lane.b32.xlu1 %v1707_v45, %s5111_s8  ;;  %v2347_v63 = vpop.permute.xlu0 %2346  ;;  %v2565_v45 = vshll.u32 %v6236_v6, 16  ;;  %v1562_v30 = vshrl.u32 %v6262_v9, 16 }
  0xf9   : > { %v2349_v11 = vpop.permute.xlu1 %2348  ;;  %1850 = vrot.lane.b32.xlu0 %v6181_v42, %s5112_s9  ;;  %v2846_v42 = vsel %vm2836_vm13, %v2813_v53, %v6184_v0  ;;  %v2219_v0 = vsel %vm1665_vm8, %v2217_v57, %v2218_v21  ;;  %v2567_v19 = vrot.slane %v2565_v45, 1  ;;  %v5067_v21 = vld [vmem:[%s5269_s30 + $0x24] sm:$0xf]  ;;  %v2914_v45 = vsel %vm2902_vm15, %v2881_v24, %v6230_v13 }
  0xfa   : > { %v2879_v26 = vsel %vm2869_vm14, %v2846_v42, %v6203_v17  ;;  %v1564_v17 = vshll.u32 %v6262_v9, 16  ;;  %v4600_v3 = vcombine.low %v5066_v55, %v5067_v21  ;;  %v2947_v35 = vsel %vm2935_vm2, %v2914_v45, %v2349_v11 }
  0xfb   : > { %1852 = vrot.lane.b32.xlu1 %v6190_v52, %s5112_s9  ;;  %v2619_v32 = vpop.permute.xlu0 %2618  ;;  %v2577_v52 = vshll.u32 %v6251_v49, 16  ;;  %v2912_v46 = vsel %vm2902_vm15, %v2879_v26, %v6220_v14  ;;  %v6299_v14 = vcombine.low %v1101_v59, %v6280_v47  ;;  %v2568_v4 = vor.u32 %v2567_v19, %v2563_v61  ;;  %4849 = vmatmul.mubr.msk.bf16.gmra.mrb[4].mxu1 %vm2770_vm11, %v4599_v36  ;;  %v6329_v26 = vld [vmem:[#allocation2 + $0xbc] ss:$0 sps:$4 sm:$0x11]   ;;  %v1133_v19 = vld [vmem:[#allocation2 + $0xa8] sm:$0xe] }
  0xfc   : > { %v2945_v31 = vsel %vm2935_vm2, %v2912_v46, %v2347_v63  ;;  %v1260_v63 = vld [vmem:[#allocation2 + $0xa8] sm:$0xe]  ;;  %v2572_v53 = vrot.slane %v2570_v18, 1  ;;  %v1566_v13 = vrot.slane %v1564_v17, 1  ;;  %v1569_v42 = vshll.u32 %v6306_v1, 16  ;;  %4852 = vmatprep.mubr.msk.bf16.mxu1 %vm2770_vm11, %v4600_v3 }
  0xfd   : > { %v2621_v10 = vpop.permute.xlu1 %2620  ;;  %2122 = vrot.lane.b32.xlu0 %v2061_v56, %s5117_s22  ;;  %v2978_v8 = vsel %vm2968_vm5, %v2945_v31, %v2619_v32  ;;  %v2579_v28 = vrot.slane %v2577_v52, 1  ;;  %v4571_v39 = vcombine.low %v1260_v63, %v6217_v7  ;;  %v1261_v32 = vld [vmem:[#allocation2 + $0xb4] sm:$0xe]  ;;  %v2584_v61 = vrot.slane %v2582_v62, 1 }
  0xfe   : > { %v2980_v56 = vsel %vm2968_vm5, %v2947_v35, %v2621_v10  ;;  %v1576_v7 = vshll.u32 %v6299_v14, 16  ;;  %v2727_v46 = vrot.slane %v6258_v12, 1  ;;  %v4572_v10 = vcombine.low %v1261_v32, %v6233_v58  ;;  %v1163_v31 = vld [vmem:[#allocation2 + $0xb4] sm:$0xf] }
  0xff   : > { %2124 = vrot.lane.b32.xlu1 %v2073_v22, %s5117_s22  ;;  %v2747_v57 = vpop.permute.xlu0 %2746  ;;  %v2580_v11 = vor.u32 %v2579_v28, %v2575_v37  ;;  %v2726_v52 = vrot.slane %v4571_v39, 1  ;;  %v1567_v17 = vor.u32 %v1566_v13, %v1562_v30  ;;  %v1571_v34 = vrot.slane %v1569_v42, 1  ;;  %v6346_v37 = vld [vmem:[#allocation2 + $0xb8] sm:$0xf]  ;;  %v1134_v63 = vld [vmem:[#allocation2 + $0xb4] sm:$0xe] }
 0x100   : > { %v3011_v20 = vsel %vm3001_vm3, %v2978_v8, %v2747_v57  ;;  %v5069_v8 = vld [vmem:[%s5269_s30 + $0x2c] sm:$0xf]  ;;  %v1578_v57 = vrot.slane %v1576_v7, 1  ;;  %v1581_v62 = vshll.u32 %v6329_v26, 16  ;;  %v4477_v24 = vcombine.low %v1133_v19, %v6241_v23  ;;  %v6358_v28 = vld [vmem:[#allocation2 + $0xc4] sm:$0xf] }
 0x101   : > { %v6317_v38 = vpop.permute.xlu1 %1597  ;;  %2250 = vrot.lane.b32.xlu0 %v2216_v48, %s5115_s16  ;;  %4818 = vmatprep.mubr.msk.bf16.mxu0 %vm3070_vm1, %v3011_v20  ;;  %v4601_v12 = vcombine.low %v5068_v5, %v5069_v8  ;;  %v2585_v58 = vsel %vm1392_vm9, %v2580_v11, %v2584_v61  ;;  %v1165_v20 = vld [vmem:[#allocation2 + $0xc0] sm:$0xf]  ;;  %v2728_v55 = vsel %vm1665_vm8, %v2726_v52, %v2727_v46  ;;  %v2729_v21 = vrot.slane %v4572_v10, 1  ;;  %v6380_v13 = vld [vmem:[#allocation2 + $0xbc] ss:$0 sps:$4 sm:$0x11]  }
 0x102   : > { %v2730_v3 = vrot.slane %v6277_v60, 1  ;;  %v6363_v45 = vcombine.low %v1163_v31, %v6346_v37  ;;  %v1572_v23 = vsel %vm1392_vm9, %v1567_v17, %v1571_v34  ;;  %v1583_v39 = vrot.slane %v1581_v62, 1  ;;  %v5072_v11 = vld [vmem:[%s5269_s30 + $0x38] sm:$0xf]  ;;  %v5073_v61 = vld [vmem:[%s5269_s30 + $0x3c] sm:$0xf] }
 0x103   : > { %2252 = vrot.lane.b32.xlu1 %v2219_v0, %s5115_s16  ;;  %v2749_v59 = vpop.permute.xlu0 %2748  ;;  %v2573_v0 = vsel %vm1392_vm9, %v2568_v4, %v2572_v53  ;;  %v4478_v4 = vcombine.low %v1134_v63, %v6280_v47  ;;  %4853 = vmatmul.mubr.msk.bf16.gmra.mrb[8].mxu1 %vm2770_vm11, %v4601_v12  ;;  %v1709_v30 = vrot.slane %v6306_v1, 1  ;;  %v4603_v7 = vcombine.low %v5072_v11, %v5073_v61  ;;  %v6390_v46 = vld [vmem:[#allocation2 + $0xc8] ss:$0 sps:$4 sm:$0x11]   ;;  %v5074_v10 = vld [vmem:[%s5269_s30 + $0x40] sm:$0xf] }
 0x104   : > { %v3013_v48 = vsel %vm3001_vm3, %v2980_v56, %v2749_v59  ;;  %v6372_v56 = vcombine.low %v1165_v20, %v6358_v28  ;;  %v2731_v47 = vsel %vm1665_vm8, %v2729_v21, %v2730_v3  ;;  %v1708_v59 = vrot.slane %v4477_v24, 1  ;;  %v5075_v19 = vld [vmem:[%s5269_s30 + $0x44] sm:$0xf]  ;;  %v1197_v12 = vld [vmem:[#allocation2 + $0xb4] sm:$0xe] }
 0x105   : > { %v6333_v22 = vpop.permute.xlu1 %1599  ;;  %2362 = vrot.lane.b32.xlu0 %v6236_v6, %s5113_s10  ;;  %4819 = vmatmul.mubr.msk.bf16.gmra.mrb[8].mxu0 %vm3070_vm1, %v3013_v48  ;;  %v1574_v6 = vshrl.u32 %v6299_v14, 16  ;;  %v2077_v42 = vshll.u32 %v6363_v45, 16  ;;  %v1711_v48 = vrot.slane %v4478_v4, 1  ;;  %v1712_v52 = vrot.slane %v6329_v26, 1  ;;  %v6404_v62 = vld [vmem:[#allocation2 + $0xc4] sm:$0xf] }
 0x106   : > { %v2089_v1 = vshll.u32 %v6372_v56, 16  ;;  %v4604_v17 = vcombine.low %v5074_v10, %v5075_v19  ;;  %v2075_v31 = vshrl.u32 %v6363_v45, 16  ;;  %v2082_v8 = vshll.u32 %v6380_v13, 16  ;;  %v1230_v24 = vld [vmem:[#allocation2 + $0xcc] sm:$0xf] }
 0x107   : > { %2364 = vrot.lane.b32.xlu1 %v6251_v49, %s5113_s10  ;;  %v6343_v18 = vpop.permute.xlu0 %1726  ;;  %v5071_v49 = vld [vmem:[%s5269_s30 + $0x34] sm:$0xf]  ;;  %v1579_v53 = vor.u32 %v1578_v57, %v1574_v6  ;;  %v1710_v6 = vsel %vm1665_vm8, %v1708_v59, %v1709_v30  ;;  %v2079_v5 = vrot.slane %v2077_v42, 1  ;;  %v1228_v57 = vld [vmem:[#allocation2 + $0xc0] sm:$0xf]  ;;  %v1713_v63 = vsel %vm1665_vm8, %v1711_v48, %v1712_v52 }
 0x108   : > { %v4602_v33 = vcombine.low %v5070_v2, %v5071_v49  ;;  %v2087_v2 = vshrl.u32 %v6372_v56, 16  ;;  %v2091_v49 = vrot.slane %v2089_v1, 1  ;;  %v4525_v21 = vcombine.low %v1197_v12, %v6346_v37  ;;  %v5076_v30 = vld [vmem:[%s5269_s30 + $0x48] sm:$0xf]  ;;  %v5077_v37 = vld [vmem:[%s5269_s30 + $0x4c] sm:$0xf] }
 0x109   : > { %v6354_v36 = vpop.permute.xlu1 %1728  ;;  %2634 = vrot.lane.b32.xlu0 %v2573_v0, %s5118_s23  ;;  %v1584_v0 = vsel %vm1392_vm9, %v1579_v53, %v1583_v39  ;;  %v4610_v3 = vcombine.low %v6030_v50, %v6033_v15  ;;  %v2080_v4 = vor.u32 %v2079_v5, %v2075_v31  ;;  %v6418_v53 = vcombine.low %v1228_v57, %v6404_v62  ;;  %v6442_v5 = vld [vmem:[#allocation2 + $0xc8] ss:$0 sps:$4 sm:$0x11]  }
 0x10a   : > { %4856 = vmatprep.mubr.msk.bf16.mxu1 %vm2770_vm11, %v4602_v33  ;;  %v2094_v33 = vshll.u32 %v6390_v46, 16  ;;  %v4611_v39 = vcombine.low %v6157_v51, %v6170_v25  ;;  %v4605_v42 = vcombine.low %v5076_v30, %v5077_v37  ;;  %v2092_v48 = vor.u32 %v2091_v49, %v2087_v2  ;;  %v5080_v30 = vld [vmem:[%s5269_s30 + $0x58] sm:$0xf]  ;;  %v5081_v37 = vld [vmem:[%s5269_s30 + $0x5c] sm:$0xf] }
 0x10b   : > { %2636 = vrot.lane.b32.xlu1 %v2585_v58, %s5118_s23  ;;  %v6366_v35 = vpop.permute.xlu0 %1838  ;;  %v6402_v58 = vld [vmem:[#allocation2 + $0xd0] sm:$0xf]  ;;  %4857 = vmatmul.mubr.msk.bf16.gmra.mrb[12].mxu1 %vm2770_vm11, %v4603_v7  ;;  %v2784_v1 = vsel %vm2770_vm11, %v5585_v40, %v6317_v38  ;;  %v2220_v19 = vrot.slane %v4525_v21, 1  ;;  %v2786_v40 = vsel %vm2770_vm11, %v5605_v41, %v6333_v22  ;;  %v2224_v41 = vrot.slane %v6390_v46, 1 }
 0x10c   : > { %4860 = vmatprep.mubr.msk.bf16.mxu1 %vm2770_vm11, %v4604_v17  ;;  %v6424_v59 = vcombine.low %v1230_v24, %v6402_v58  ;;  %v2096_v11 = vrot.slane %v2094_v33, 1  ;;  %v5078_v7 = vld [vmem:[%s5269_s30 + $0x50] sm:$0xf]  ;;  %v2221_v17 = vrot.slane %v6380_v13, 1  ;;  %v2817_v31 = vsel %vm2803_vm12, %v2784_v1, %v6343_v18 }
 0x10d   : > { %v6375_v60 = vpop.permute.xlu1 %1840  ;;  %2762 = vrot.lane.b32.xlu0 %v2728_v55, %s5116_s19  ;;  %v1198_v55 = vld [vmem:[#allocation2 + $0xc0] sm:$0xe]  ;;  %v2850_v38 = vsel %vm2836_vm13, %v2817_v31, %v6366_v35  ;;  %v2819_v49 = vsel %vm2803_vm12, %v2786_v40, %v6354_v36  ;;  %v4607_v36 = vcombine.low %v5080_v30, %v5081_v37 }
 0x10e   : > { %v4526_v61 = vcombine.low %v1198_v55, %v6358_v28  ;;  %v2599_v13 = vshrl.u32 %v6424_v59, 16  ;;  %v2601_v18 = vshll.u32 %v6424_v59, 16  ;;  %v2097_v57 = vsel %vm1392_vm9, %v2092_v48, %v2096_v11  ;;  %v5082_v11 = vld [vmem:[%s5269_s30 + $0x60] sm:$0xf] }
 0x10f   : > { %1613 = vrot.lane.b32.xlu1 %v1572_v23, %s5114_s13  ;;  %v6384_v32 = vpop.permute.xlu0 %2110  ;;  %v2084_v23 = vrot.slane %v2082_v8, 1  ;;  %v2589_v8 = vshll.u32 %v6418_v53, 16  ;;  %v2852_v24 = vsel %vm2836_vm13, %v2819_v49, %v6375_v60 }
 0x110   : > { %v2883_v12 = vsel %vm2869_vm14, %v2850_v38, %v6384_v32  ;;  %v2587_v32 = vshrl.u32 %v6418_v53, 16 }
 0x111   : > { %v6395_v34 = vpop.permute.xlu1 %2112  ;;  %2764 = vrot.lane.b32.xlu0 %v2731_v47, %s5116_s19  ;;  %v2085_v28 = vsel %vm1392_vm9, %v2080_v4, %v2084_v23  ;;  %v2591_v33 = vrot.slane %v2589_v8, 1  ;;  %v2603_v4 = vrot.slane %v2601_v18, 1  ;;  %v1262_v23 = vld [vmem:[#allocation2 + $0xc0] sm:$0xe]  ;;  %v2733_v18 = vrot.slane %v6442_v5, 1 }
 0x113   : > { %1615 = vrot.lane.b32.xlu1 %v1584_v0, %s5114_s13  ;;  %v2239_v26 = vpop.permute.xlu0 %2238  ;;  %v5079_v0 = vld [vmem:[%s5269_s30 + $0x54] sm:$0xf]  ;;  %4861 = vmatmul.mubr.msk.bf16.gmra.mrb[16].mxu1 %vm2770_vm11, %v4605_v42  ;;  %v2604_v8 = vor.u32 %v2603_v4, %v2599_v13 }
 0x114   : > { %v4606_v52 = vcombine.low %v5078_v7, %v5079_v0  ;;  %v2916_v22 = vsel %vm2902_vm15, %v2883_v12, %v2239_v26  ;;  %v2594_v26 = vshll.u32 %v6442_v5, 16  ;;  %v5084_v12 = vld [vmem:[%s5269_s30 + $0x68] sm:$0xf] }
 0x115   : > { %v6411_v20 = vpop.permute.xlu1 %2240  ;;  %1742 = vrot.lane.b32.xlu0 %v1710_v6, %s5111_s8  ;;  %v6437_v6 = vld [vmem:[#allocation2 + $0xd4] ss:$0 sps:$4 sm:$0x11]  }
 0x116   : > { %4864 = vmatprep.mubr.msk.bf16.mxu1 %vm2770_vm11, %v4606_v52  ;;  %v2606_v2 = vshll.u32 %v6437_v6, 16  ;;  %v1263_v52 = vld [vmem:[#allocation2 + $0xcc] sm:$0xe] }
 0x117   : > { %1744 = vrot.lane.b32.xlu1 %v1713_v63, %s5111_s8  ;;  %v2351_v47 = vpop.permute.xlu0 %2350  ;;  %v2223_v63 = vrot.slane %v4526_v61, 1  ;;  %v5083_v61 = vld [vmem:[%s5269_s30 + $0x64] sm:$0xf]  ;;  %v4574_v38 = vcombine.low %v1263_v52, %v6402_v58 }
 0x118   : > { %v2949_v46 = vsel %vm2935_vm2, %v2916_v22, %v2351_v47  ;;  %v2885_v47 = vsel %vm2869_vm14, %v2852_v24, %v6395_v34  ;;  %v4608_v60 = vcombine.low %v5082_v11, %v5083_v61  ;;  %v2596_v34 = vrot.slane %v2594_v26, 1 }
 0x119   : > { %v2353_v10 = vpop.permute.xlu1 %2352  ;;  %1854 = vrot.lane.b32.xlu0 %v6363_v45, %s5112_s9  ;;  %v2225_v48 = vsel %vm1665_vm8, %v2223_v63, %v2224_v41  ;;  %v2918_v7 = vsel %vm2902_vm15, %v2885_v47, %v6411_v20  ;;  %v2608_v40 = vrot.slane %v2606_v2, 1  ;;  %v2735_v41 = vrot.slane %v4574_v38, 1 }
 0x11a   : > { %v2951_v1 = vsel %vm2935_vm2, %v2918_v7, %v2353_v10  ;;  %v2736_v22 = vrot.slane %v6437_v6, 1 }
 0x11b   : > { %1856 = vrot.lane.b32.xlu1 %v6372_v56, %s5112_s9  ;;  %v2623_v45 = vpop.permute.xlu0 %2622  ;;  %v2222_v56 = vsel %vm1665_vm8, %v2220_v19, %v2221_v17  ;;  %v2592_v19 = vor.u32 %v2591_v33, %v2587_v32  ;;  %v4573_v17 = vcombine.low %v1262_v23, %v6404_v62  ;;  %4865 = vmatmul.mubr.msk.bf16.gmra.mrb[20].mxu1 %vm2770_vm11, %v4607_v36 }
 0x11c   : > { %v2982_v55 = vsel %vm2968_vm5, %v2949_v46, %v2623_v45  ;;  %4868 = vmatprep.mubr.msk.bf16.mxu1 %vm2770_vm11, %v4608_v60  ;;  %v2609_v63 = vsel %vm1392_vm9, %v2604_v8, %v2608_v40 }
 0x11d   : > { %v2625_v35 = vpop.permute.xlu1 %2624  ;;  %2126 = vrot.lane.b32.xlu0 %v2085_v28, %s5117_s22  ;;  %v2597_v62 = vsel %vm1392_vm9, %v2592_v19, %v2596_v34  ;;  %v2732_v45 = vrot.slane %v4573_v17, 1 }
 0x11e   : > { %v2984_v31 = vsel %vm2968_vm5, %v2951_v1, %v2625_v35 }
 0x11f   : > { %2128 = vrot.lane.b32.xlu1 %v2097_v57, %s5117_s22  ;;  %v2751_v21 = vpop.permute.xlu0 %2750  ;;  %v5085_v57 = vld [vmem:[%s5269_s30 + $0x6c] sm:$0xf]  ;;  %v2734_v35 = vsel %vm1665_vm8, %v2732_v45, %v2733_v18  ;;  %s4426_s30 = sshll.u32 %s5100_s24, 5 }
 0x120   : > { %v3015_v42 = vsel %vm3001_vm3, %v2982_v55, %v2751_v21  ;;  %v4609_v58 = vcombine.low %v5084_v12, %v5085_v57  ;;  %p454_p5 = scmp.lt.s32.totalorder %s4426_s30, 63 }
 0x121   : > { %v1602_v0 = vpop.permute.xlu1 %1601  ;;  %2254 = vrot.lane.b32.xlu0 %v2222_v56, %s5115_s16  ;;  %4822 = vmatprep.mubr.msk.bf16.mxu0 %vm3070_vm1, %v3015_v42 }
 0x122   : > { %v2788_v50 = vsel %vm2770_vm11, %v5701_v44, %v1602_v0  ;;  %s6932_s30 = smov (!%p454_p5, %s4426_s30), 63 }
 0x123   : > { %2256 = vrot.lane.b32.xlu1 %v2225_v48, %s5115_s16  ;;  %v2753_v28 = vpop.permute.xlu0 %2752  ;;  %4869 = vmatmul.mubr.msk.bf16.gmra.mrb[24].mxu1 %vm2770_vm11, %v4609_v58  ;;  %s4427_s8 = sshll.u32 %s6932_s30, 2 }
 0x124   : > { %v3017_v20 = vsel %vm3001_vm3, %v2984_v31, %v2753_v28  ;;  %4872 = vmatprep.mubr.msk.bf16.mxu1 %vm2770_vm11, %v4610_v3  ;;  %s6647_s14 = scalar_lea.vmem %s6914_s6, %s4427_s8 }
 0x125   : > { %v1604_v10 = vpop.permute.xlu1 %1603  ;;  %2366 = vrot.lane.b32.xlu0 %v6418_v53, %s5113_s10  ;;  %4823 = vmatmul.mubr.msk.bf16.gmra.mrb[12].mxu0 %vm3070_vm1, %v3017_v20 }
 0x126   : > { %v2790_v33 = vsel %vm2770_vm11, %v5739_v43, %v1604_v10 }
 0x127   : > { %2368 = vrot.lane.b32.xlu1 %v6424_v59, %s5113_s10  ;;  %v1731_v13 = vpop.permute.xlu0 %1730  ;;  %v2737_v59 = vsel %vm1665_vm8, %v2735_v41, %v2736_v22  ;;  %s6593_s10 = scalar_lea.vmem %s6913_s5, %s4427_s8 }
 0x128   : > { %v2821_v3 = vsel %vm2803_vm12, %v2788_v50, %v1731_v13 }
 0x129   : > { %v1733_v53 = vpop.permute.xlu1 %1732  ;;  %2638 = vrot.lane.b32.xlu0 %v2597_v62, %s5118_s23 }
 0x12b   : > { %2640 = vrot.lane.b32.xlu1 %v2609_v63, %s5118_s23  ;;  %v1843_v5 = vpop.permute.xlu0 %1842  ;;  %4873 = vmatmul.mubr.msk.bf16.gmra.mrb[28].mxu1 %vm2770_vm11, %v4611_v39  ;;  %v2823_v39 = vsel %vm2803_vm12, %v2790_v33, %v1733_v53 }
 0x12c   : > { %v2854_v26 = vsel %vm2836_vm13, %v2821_v3, %v1843_v5 }
 0x12d   : > { %v1845_v56 = vpop.permute.xlu1 %1844  ;;  %2766 = vrot.lane.b32.xlu0 %v2734_v35, %s5116_s19 }
 0x12e   : > { %v2856_v44 = vsel %vm2836_vm13, %v2823_v39, %v1845_v56 }
 0x12f   : > { %2768 = vrot.lane.b32.xlu1 %v2737_v59, %s5116_s19  ;;  %v2115_v6 = vpop.permute.xlu0 %2114 }
 0x130   : > { %v2887_v55 = vsel %vm2869_vm14, %v2854_v26, %v2115_v6 }
 0x131   : > { %v2117_v2 = vpop.permute.xlu1 %2116 }
 0x132   : > { %v2889_v30 = vsel %vm2869_vm14, %v2856_v44, %v2117_v2 }
 0x133   : > { %v2243_v32 = vpop.permute.xlu0 %2242 }
 0x134   : > { %v2920_v51 = vsel %vm2902_vm15, %v2887_v55, %v2243_v32 }
 0x135   : > { %v2245_v49 = vpop.permute.xlu1 %2244 }
 0x136   : > { %v2922_v37 = vsel %vm2902_vm15, %v2889_v30, %v2245_v49 }
 0x137   : > { %v2355_v46 = vpop.permute.xlu0 %2354 }
 0x138   : > { %v2953_v21 = vsel %vm2935_vm2, %v2920_v51, %v2355_v46 }
 0x139   : > { %v2357_v15 = vpop.permute.xlu1 %2356 }
 0x13a   : > { %v2955_v47 = vsel %vm2935_vm2, %v2922_v37, %v2357_v15 }
 0x13b   : > { %v2627_v24 = vpop.permute.xlu0 %2626 }
 0x13c   : > { %v2986_v4 = vsel %vm2968_vm5, %v2953_v21, %v2627_v24 }
 0x13d   : > { %v2629_v25 = vpop.permute.xlu1 %2628 }
 0x13e   : > { %v2988_v42 = vsel %vm2968_vm5, %v2955_v47, %v2629_v25 }
 0x13f   : > { %v2755_v23 = vpop.permute.xlu0 %2754 }
 0x140   : > { %v3019_v43 = vsel %vm3001_vm3, %v2986_v4, %v2755_v23 }
 0x141   : > { %v1606_v36 = vpop.permute.xlu1 %1605  ;;  %4826 = vmatprep.mubr.msk.bf16.mxu0 %vm3070_vm1, %v3019_v43 }
 0x142   : > { %v2792_v28 = vsel %vm2770_vm11, %v5872_v16, %v1606_v36 }
 0x143   : > { %v2757_v48 = vpop.permute.xlu0 %2756 }
 0x144   : > { %v3021_v11 = vsel %vm3001_vm3, %v2988_v42, %v2757_v48 }
 0x145   : > { %v1608_v61 = vpop.permute.xlu1 %1607  ;;  %4827 = vmatmul.mubr.msk.bf16.gmra.mrb[16].mxu0 %vm3070_vm1, %v3021_v11 }
 0x146   : > { %v2794_v40 = vsel %vm2770_vm11, %v5930_v27, %v1608_v61 }
 0x147   : > { %v1735_v60 = vpop.permute.xlu0 %1734 }
 0x148   : > { %v2825_v8 = vsel %vm2803_vm12, %v2792_v28, %v1735_v60 }
 0x149   : > { %v1737_v7 = vpop.permute.xlu1 %1736 }
 0x14a   : > { %v2827_v13 = vsel %vm2803_vm12, %v2794_v40, %v1737_v7 }
 0x14b   : > { %v1847_v0 = vpop.permute.xlu0 %1846 }
 0x14c   : > { %v2858_v38 = vsel %vm2836_vm13, %v2825_v8, %v1847_v0 }
 0x14d   : > { %v1849_v52 = vpop.permute.xlu1 %1848 }
 0x14e   : > { %v2860_v16 = vsel %vm2836_vm13, %v2827_v13, %v1849_v52 }
 0x14f   : > { %v2119_v1 = vpop.permute.xlu0 %2118 }
 0x150   : > { %v2891_v62 = vsel %vm2869_vm14, %v2858_v38, %v2119_v1 }
 0x151   : > { %v2121_v19 = vpop.permute.xlu1 %2120 }
 0x152   : > { %v2893_v63 = vsel %vm2869_vm14, %v2860_v16, %v2121_v19 }
 0x153   : > { %v2247_v34 = vpop.permute.xlu0 %2246 }
 0x154   : > { %v2924_v45 = vsel %vm2902_vm15, %v2891_v62, %v2247_v34 }
 0x155   : > { %v2249_v17 = vpop.permute.xlu1 %2248 }
 0x156   : > { %v2926_v41 = vsel %vm2902_vm15, %v2893_v63, %v2249_v17 }
 0x157   : > { %v2359_v31 = vpop.permute.xlu0 %2358 }
 0x158   : > { %v2957_v12 = vsel %vm2935_vm2, %v2924_v45, %v2359_v31 }
 0x159   : > { %v2361_v20 = vpop.permute.xlu1 %2360 }
 0x15a   : > { %v2959_v53 = vsel %vm2935_vm2, %v2926_v41, %v2361_v20 }
 0x15b   : > { %v2631_v10 = vpop.permute.xlu0 %2630 }
 0x15c   : > { %v2990_v57 = vsel %vm2968_vm5, %v2957_v12, %v2631_v10 }
 0x15d   : > { %v2633_v18 = vpop.permute.xlu1 %2632 }
 0x15e   : > { %v2992_v35 = vsel %vm2968_vm5, %v2959_v53, %v2633_v18 }
 0x15f   : > { %v2759_v58 = vpop.permute.xlu0 %2758 }
 0x160   : > { %v3023_v27 = vsel %vm3001_vm3, %v2990_v57, %v2759_v58 }
 0x161   : > { %v1610_v22 = vpop.permute.xlu1 %1609  ;;  %4830 = vmatprep.mubr.msk.bf16.mxu0 %vm3070_vm1, %v3023_v27 }
 0x162   : > { %v2796_v26 = vsel %vm2770_vm11, %v6074_v29, %v1610_v22 }
 0x163   : > { %v2761_v5 = vpop.permute.xlu0 %2760 }
 0x164   : > { %v3025_v59 = vsel %vm3001_vm3, %v2992_v35, %v2761_v5 }
 0x165   : > { %v1612_v56 = vpop.permute.xlu1 %1611  ;;  %4831 = vmatmul.mubr.msk.bf16.gmra.mrb[20].mxu0 %vm3070_vm1, %v3025_v59 }
 0x166   : > { %v2798_v51 = vsel %vm2770_vm11, %v6113_v54, %v1612_v56 }
 0x167   : > { %v1739_v6 = vpop.permute.xlu0 %1738 }
 0x168   : > { %v2829_v55 = vsel %vm2803_vm12, %v2796_v26, %v1739_v6 }
 0x169   : > { %v1741_v2 = vpop.permute.xlu1 %1740 }
 0x16a   : > { %v2831_v23 = vsel %vm2803_vm12, %v2798_v51, %v1741_v2 }
 0x16b   : > { %v1851_v32 = vpop.permute.xlu0 %1850 }
 0x16c   : > { %v2862_v25 = vsel %vm2836_vm13, %v2829_v55, %v1851_v32 }
 0x16d   : > { %v1853_v49 = vpop.permute.xlu1 %1852 }
 0x16e   : > { %v2864_v29 = vsel %vm2836_vm13, %v2831_v23, %v1853_v49 }
 0x16f   : > { %v2123_v46 = vpop.permute.xlu0 %2122 }
 0x170   : > { %v2895_v21 = vsel %vm2869_vm14, %v2862_v25, %v2123_v46 }
 0x171   : > { %v2125_v50 = vpop.permute.xlu1 %2124 }
 0x172   : > { %v2897_v54 = vsel %vm2869_vm14, %v2864_v29, %v2125_v50 }
 0x173   : > { %v2251_v15 = vpop.permute.xlu0 %2250 }
 0x174   : > { %v2928_v44 = vsel %vm2902_vm15, %v2895_v21, %v2251_v15 }
 0x175   : > { %v2253_v3 = vpop.permute.xlu1 %2252 }
 0x176   : > { %v2930_v47 = vsel %vm2902_vm15, %v2897_v54, %v2253_v3 }
 0x177   : > { %v2363_v33 = vpop.permute.xlu0 %2362 }
 0x178   : > { %v2961_v30 = vsel %vm2935_vm2, %v2928_v44, %v2363_v33 }
 0x179   : > { %v2365_v24 = vpop.permute.xlu1 %2364 }
 0x17a   : > { %v2963_v48 = vsel %vm2935_vm2, %v2930_v47, %v2365_v24 }
 0x17b   : > { %v2635_v39 = vpop.permute.xlu0 %2634 }
 0x17c   : > { %v2994_v43 = vsel %vm2968_vm5, %v2961_v30, %v2635_v39 }
 0x17d   : > { %v2637_v4 = vpop.permute.xlu1 %2636 }
 0x17e   : > { %v2996_v11 = vsel %vm2968_vm5, %v2963_v48, %v2637_v4 }
 0x17f   : > { %v2763_v37 = vpop.permute.xlu0 %2762 }
 0x180   : > { %v3027_v36 = vsel %vm3001_vm3, %v2994_v43, %v2763_v37 }
 0x181   : > { %v1614_v42 = vpop.permute.xlu1 %1613  ;;  %4834 = vmatprep.mubr.msk.bf16.mxu0 %vm3070_vm1, %v3027_v36 }
 0x182   : > { %v2800_v20 = vsel %vm2770_vm11, %v6262_v9, %v1614_v42 }
 0x183   : > { %v2765_v61 = vpop.permute.xlu0 %2764 }
 0x184   : > { %v3029_v60 = vsel %vm3001_vm3, %v2996_v11, %v2765_v61 }
 0x185   : > { %v1616_v7 = vpop.permute.xlu1 %1615  ;;  %4835 = vmatmul.mubr.msk.bf16.gmra.mrb[24].mxu0 %vm3070_vm1, %v3029_v60 }
 0x186   : > { %v2802_v8 = vsel %vm2770_vm11, %v6299_v14, %v1616_v7 }
 0x187   : > { %v1743_v0 = vpop.permute.xlu0 %1742 }
 0x188   : > { %v2833_v38 = vsel %vm2803_vm12, %v2800_v20, %v1743_v0 }
 0x189   : > { %v1745_v52 = vpop.permute.xlu1 %1744 }
 0x18a   : > { %v2835_v13 = vsel %vm2803_vm12, %v2802_v8, %v1745_v52 }
 0x18b   : > { %v1855_v1 = vpop.permute.xlu0 %1854 }
 0x18c   : > { %v2866_v62 = vsel %vm2836_vm13, %v2833_v38, %v1855_v1 }
 0x18d   : > { %v1857_v19 = vpop.permute.xlu1 %1856 }
 0x18e   : > { %v2868_v58 = vsel %vm2836_vm13, %v2835_v13, %v1857_v19 }
 0x18f   : > { %v2127_v34 = vpop.permute.xlu0 %2126 }
 0x190   : > { %v2899_v14 = vsel %vm2869_vm14, %v2866_v62, %v2127_v34 }
 0x191   : > { %v2129_v17 = vpop.permute.xlu1 %2128 }
 0x192   : > { %v2901_v6 = vsel %vm2869_vm14, %v2868_v58, %v2129_v17 }
 0x193   : > { %v2255_v31 = vpop.permute.xlu0 %2254 }
 0x194   : > { %v2932_v63 = vsel %vm2902_vm15, %v2899_v14, %v2255_v31 }
 0x195   : > { %v2257_v28 = vpop.permute.xlu1 %2256 }
 0x196   : > { %v2934_v33 = vsel %vm2902_vm15, %v2901_v6, %v2257_v28 }
 0x197   : > { %v2367_v40 = vpop.permute.xlu0 %2366 }
 0x198   : > { %v4812_v10 = vpop.f32.mrb[0].mxu0  ;;  %v2965_v2 = vsel %vm2935_vm2, %v2932_v63, %v2367_v40 }
 0x199   : > { %v2369_v45 = vpop.permute.xlu1 %2368  ;;  %v4700_v18 = vpack.c.bf16 %v4812_v10, %v4812_v10  ;;  %v3141_v9 = vpop.f32.mrb[1].mxu0  ;;  %v3953_v27 = vmul.f32 %v4812_v10, %v4812_v10  ;;  %v3884_v46 = vsel %vm2770_vm11, %v4812_v10, 0.0 }
 0x19a   : > { %v4698_v12 = vpack.c.bf16 %v3141_v9, %v3141_v9  ;;  %v3951_v16 = vmul.f32 %v3141_v9, %v3141_v9  ;;  %v4813_v57 = vpop.f32.mrb[2].mxu0  ;;  %v3881_v35 = vsel %vm2770_vm11, %v3141_v9, 0.0  ;;  %v2967_v25 = vsel %vm2935_vm2, %v2934_v33, %v2369_v45 }
 0x19b   : > { %3691 = vst.msk [vmem:[%s6593_s10 + $0x8] sm:$0xf] %vm519_vm0, %v4700_v18  ;;  %v4701_v41 = vpack.c.bf16 %v4813_v57, %v4813_v57  ;;  %v3144_v22 = vpop.f32.mrb[3].mxu0  ;;  %v2639_v53 = vpop.permute.xlu0 %2638  ;;  %v3954_v15 = vmul.f32 %v4813_v57, %v4813_v57  ;;  %v3986_v39 = vsel %vm2770_vm11, %v3953_v27, 0.0  ;;  %v3886_v21 = vsel %vm2770_vm11, %v4813_v57, 0.0 }
 0x19c   : > { %3689 = vst.msk [vmem:[%s6593_s10] sm:$0xf] %vm519_vm0, %v4698_v12  ;;  %v4699_v5 = vpack.c.bf16 %v3144_v22, %v3144_v22  ;;  %v3882_v59 = vsel %vm2770_vm11, %v3144_v22, 0.0  ;;  %v3952_v56 = vmul.f32 %v3144_v22, %v3144_v22  ;;  %v3983_v50 = vsel %vm2770_vm11, %v3951_v16, 0.0 }
 0x19d   : > { %v2641_v32 = vpop.permute.xlu1 %2640  ;;  %3692 = vst.msk [vmem:[%s6593_s10 + $0xc] sm:$0xf] %vm519_vm0, %v4701_v41  ;;  %v3883_v49 = vadd.f32 %v3882_v59, %v3881_v35  ;;  %v2998_v55 = vsel %vm2968_vm5, %v2965_v2, %v2639_v53  ;;  %v3988_v43 = vsel %vm2770_vm11, %v3954_v15, 0.0 }
 0x19e   : > { %3690 = vst.msk [vmem:[%s6593_s10 + $0x4] sm:$0xf] %vm519_vm0, %v4699_v5  ;;  %v3984_v3 = vsel %vm2770_vm11, %v3952_v56, 0.0  ;;  %v3000_v4 = vsel %vm2968_vm5, %v2967_v25, %v2641_v32 }
 0x19f   : > { %v3885_v26 = vadd.f32 %v3884_v46, %v3883_v49  ;;  %v3985_v24 = vadd.f32 %v3984_v3, %v3983_v50  ;;  %v2767_v51 = vpop.permute.xlu0 %2766 }
 0x1a0   : > { %v3031_v44 = vsel %vm3001_vm3, %v2998_v55, %v2767_v51 }
 0x1a1   : > { %v3987_v23 = vadd.f32 %v3986_v39, %v3985_v24  ;;  %v2769_v30 = vpop.permute.xlu1 %2768  ;;  %4838 = vmatprep.mubr.msk.bf16.mxu0 %vm3070_vm1, %v3031_v44  ;;  %v3887_v29 = vadd.f32 %v3886_v21, %v3885_v26 }
 0x1a2   : > { %v3033_v37 = vsel %vm3001_vm3, %v3000_v4, %v2769_v30 }
 0x1a3   : > { %4839 = vmatmul.mubr.msk.bf16.gmra.mrb[28].mxu0 %vm3070_vm1, %v3033_v37  ;;  %v3989_v54 = vadd.f32 %v3988_v43, %v3987_v23  ;;  %vm6923_vm1 = vcmask 57344  }
 0x1a4   : > { %vm6924_vm4 = vmmov %vm6923_vm1 }
 0x1b8   : > { %v4816_v36 = vpop.f32.mrb[4].mxu0 }
 0x1b9   : > { %v4704_v47 = vpack.c.bf16 %v4816_v36, %v4816_v36  ;;  %v3157_v42 = vpop.f32.mrb[5].mxu0  ;;  %v3957_v17 = vmul.f32 %v4816_v36, %v4816_v36  ;;  %v3892_v8 = vsel %vm2770_vm11, %v4816_v36, 0.0 }
 0x1ba   : > { %v4702_v48 = vpack.c.bf16 %v3157_v42, %v3157_v42  ;;  %v3888_v11 = vsel %vm2770_vm11, %v3157_v42, 0.0  ;;  %v3955_v61 = vmul.f32 %v3157_v42, %v3157_v42  ;;  %v4817_v60 = vpop.f32.mrb[6].mxu0 }
 0x1bb   : > { %3695 = vst.msk [vmem:[%s6593_s10 + $0x18] sm:$0xf] %vm519_vm0, %v4704_v47  ;;  %v3889_v7 = vadd.f32 %v3888_v11, %v3887_v29  ;;  %v4705_v0 = vpack.c.bf16 %v4817_v60, %v4817_v60  ;;  %v3160_v52 = vpop.f32.mrb[7].mxu0  ;;  %v3958_v40 = vmul.f32 %v4817_v60, %v4817_v60  ;;  %v3894_v62 = vsel %vm2770_vm11, %v4817_v60, 0.0 }
 0x1bc   : > { %3693 = vst.msk [vmem:[%s6593_s10 + $0x10] sm:$0xf] %vm519_vm0, %v4702_v48  ;;  %v3990_v1 = vsel %vm2770_vm11, %v3955_v61, 0.0  ;;  %v4703_v19 = vpack.c.bf16 %v3160_v52, %v3160_v52  ;;  %v3890_v34 = vsel %vm2770_vm11, %v3160_v52, 0.0  ;;  %v3956_v20 = vmul.f32 %v3160_v52, %v3160_v52 }
 0x1bd   : > { %v3991_v31 = vadd.f32 %v3990_v1, %v3989_v54  ;;  %3696 = vst.msk [vmem:[%s6593_s10 + $0x1c] sm:$0xf] %vm519_vm0, %v4705_v0  ;;  %v3891_v28 = vadd.f32 %v3890_v34, %v3889_v7  ;;  %v3994_v18 = vsel %vm2770_vm11, %v3957_v17, 0.0  ;;  %v3996_v14 = vsel %vm2770_vm11, %v3958_v40, 0.0 }
 0x1be   : > { %3694 = vst.msk [vmem:[%s6593_s10 + $0x14] sm:$0xf] %vm519_vm0, %v4703_v19  ;;  %v3992_v10 = vsel %vm2770_vm11, %v3956_v20, 0.0 }
 0x1bf   : > { %v3893_v38 = vadd.f32 %v3892_v8, %v3891_v28  ;;  %v3993_v45 = vadd.f32 %v3992_v10, %v3991_v31 }
 0x1c1   : > { %v3895_v9 = vadd.f32 %v3894_v62, %v3893_v38  ;;  %v3995_v13 = vadd.f32 %v3994_v18, %v3993_v45 }
 0x1c3   : > { %v3997_v12 = vadd.f32 %v3996_v14, %v3995_v13 }
 0x1c6   : > { %v4846_v16 = vpop.f32.mrb[0].mxu1 }
 0x1c7   : > { %v4732_v57 = vpack.c.bf16 %v4846_v16, %v4846_v16  ;;  %v3434_v58 = vpop.f32.mrb[1].mxu1  ;;  %v4125_v63 = vmul.f32 %v4846_v16, %v4846_v16  ;;  %v4056_v35 = vsel %vm2770_vm11, %v4846_v16, 0.0 }
 0x1c8   : > { %v4730_v27 = vpack.c.bf16 %v3434_v58, %v3434_v58  ;;  %v4053_v41 = vsel %vm2770_vm11, %v3434_v58, 0.0  ;;  %v4123_v22 = vmul.f32 %v3434_v58, %v3434_v58  ;;  %v4847_v53 = vpop.f32.mrb[2].mxu1 }
 0x1c9   : > { %3851 = vst.msk [vmem:[%s6647_s14 + $0x8] sm:$0xf] %vm519_vm0, %v4732_v57  ;;  %v4733_v5 = vpack.c.bf16 %v4847_v53, %v4847_v53  ;;  %v3437_v59 = vpop.f32.mrb[3].mxu1  ;;  %v4158_v46 = vsel %vm2770_vm11, %v4125_v63, 0.0  ;;  %v4058_v15 = vsel %vm2770_vm11, %v4847_v53, 0.0  ;;  %v4126_v3 = vmul.f32 %v4847_v53, %v4847_v53 }
 0x1ca   : > { %3849 = vst.msk [vmem:[%s6647_s14] sm:$0xf] %vm519_vm0, %v4730_v27  ;;  %v4155_v56 = vsel %vm2770_vm11, %v4123_v22, 0.0  ;;  %v4731_v6 = vpack.c.bf16 %v3437_v59, %v3437_v59  ;;  %v4054_v2 = vsel %vm2770_vm11, %v3437_v59, 0.0  ;;  %v4124_v32 = vmul.f32 %v3437_v59, %v3437_v59 }
 0x1cb   : > { %3852 = vst.msk [vmem:[%s6647_s14 + $0xc] sm:$0xf] %vm519_vm0, %v4733_v5  ;;  %v4055_v49 = vadd.f32 %v4054_v2, %v4053_v41  ;;  %v4160_v37 = vsel %vm2770_vm11, %v4126_v3, 0.0 }
 0x1cc   : > { %3850 = vst.msk [vmem:[%s6647_s14 + $0x4] sm:$0xf] %vm519_vm0, %v4731_v6  ;;  %v4156_v50 = vsel %vm2770_vm11, %v4124_v32, 0.0 }
 0x1cd   : > { %v4057_v33 = vadd.f32 %v4056_v35, %v4055_v49  ;;  %v4157_v26 = vadd.f32 %v4156_v50, %v4155_v56 }
 0x1ce   : > { %v4850_v24 = vpop.f32.mrb[4].mxu1 }
 0x1cf   : > { %v4159_v55 = vadd.f32 %v4158_v46, %v4157_v26  ;;  %v4736_v51 = vpack.c.bf16 %v4850_v24, %v4850_v24  ;;  %v3450_v25 = vpop.f32.mrb[5].mxu1  ;;  %v4129_v21 = vmul.f32 %v4850_v24, %v4850_v24  ;;  %v4059_v4 = vadd.f32 %v4058_v15, %v4057_v33 }
 0x1d0   : > { %v4734_v44 = vpack.c.bf16 %v3450_v25, %v3450_v25  ;;  %v4060_v23 = vsel %vm2770_vm11, %v3450_v25, 0.0  ;;  %v4851_v30 = vpop.f32.mrb[6].mxu1  ;;  %v4064_v54 = vsel %vm2770_vm11, %v4850_v24, 0.0  ;;  %v4127_v36 = vmul.f32 %v3450_v25, %v3450_v25 }
 0x1d1   : > { %3855 = vst.msk [vmem:[%s6647_s14 + $0x18] sm:$0xf] %vm519_vm0, %v4736_v51  ;;  %v3453_v47 = vpop.f32.mrb[7].mxu1  ;;  %v4061_v60 = vadd.f32 %v4060_v23, %v4059_v4  ;;  %v4166_v28 = vsel %vm2770_vm11, %v4129_v21, 0.0  ;;  %v4161_v38 = vadd.f32 %v4160_v37, %v4159_v55  ;;  %v4737_v18 = vpack.c.bf16 %v4851_v30, %v4851_v30 }
 0x1d2   : > { %3853 = vst.msk [vmem:[%s6647_s14 + $0x10] sm:$0xf] %vm519_vm0, %v4734_v44  ;;  %v4162_v45 = vsel %vm2770_vm11, %v4127_v36, 0.0  ;;  %v4735_v63 = vpack.c.bf16 %v3453_v47, %v3453_v47  ;;  %v4062_v27 = vsel %vm2770_vm11, %v3453_v47, 0.0  ;;  %v4128_v41 = vmul.f32 %v3453_v47, %v3453_v47 }
 0x1d3   : > { %v4163_v16 = vadd.f32 %v4162_v45, %v4161_v38  ;;  %3856 = vst.msk [vmem:[%s6647_s14 + $0x1c] sm:$0xf] %vm519_vm0, %v4737_v18  ;;  %v4063_v5 = vadd.f32 %v4062_v27, %v4061_v60  ;;  %v4066_v32 = vsel %vm2770_vm11, %v4851_v30, 0.0 }
 0x1d4   : > { %3854 = vst.msk [vmem:[%s6647_s14 + $0x14] sm:$0xf] %vm519_vm0, %v4735_v63  ;;  %v4164_v49 = vsel %vm2770_vm11, %v4128_v41, 0.0 }
 0x1d5   : > { %v4065_v50 = vadd.f32 %v4064_v54, %v4063_v5  ;;  %v4165_v15 = vadd.f32 %v4164_v49, %v4163_v16 }
 0x1d7   : > { %v4167_v51 = vadd.f32 %v4166_v28, %v4165_v15 }
 0x1d8   : > { %v4820_v39 = vpop.f32.mrb[8].mxu0 }
 0x1d9   : > { %v4708_v29 = vpack.c.bf16 %v4820_v39, %v4820_v39  ;;  %v3173_v43 = vpop.f32.mrb[9].mxu0  ;;  %v3900_v7 = vsel %vm2770_vm11, %v4820_v39, 0.0  ;;  %v3961_v0 = vmul.f32 %v4820_v39, %v4820_v39  ;;  %v4067_v39 = vadd.f32 %v4066_v32, %v4065_v50 }
 0x1da   : > { %v4706_v42 = vpack.c.bf16 %v3173_v43, %v3173_v43  ;;  %v3896_v48 = vsel %vm2770_vm11, %v3173_v43, 0.0  ;;  %v3959_v11 = vmul.f32 %v3173_v43, %v3173_v43  ;;  %v4821_v61 = vpop.f32.mrb[10].mxu0 }
 0x1db   : > { %3699 = vst.msk [vmem:[%s6593_s10 + $0x28] sm:$0xf] %vm519_vm0, %v4708_v29  ;;  %v3897_v52 = vadd.f32 %v3896_v48, %v3895_v9  ;;  %v4709_v1 = vpack.c.bf16 %v4821_v61, %v4821_v61  ;;  %v3176_v19 = vpop.f32.mrb[11].mxu0  ;;  %v3902_v10 = vsel %vm2770_vm11, %v4821_v61, 0.0  ;;  %v3962_v62 = vmul.f32 %v4821_v61, %v4821_v61  ;;  %v4854_v9 = vpop.f32.mrb[8].mxu1 }
 0x1dc   : > { %3697 = vst.msk [vmem:[%s6593_s10 + $0x20] sm:$0xf] %vm519_vm0, %v4706_v42  ;;  %v3998_v34 = vsel %vm2770_vm11, %v3959_v11, 0.0  ;;  %v4707_v17 = vpack.c.bf16 %v3176_v19, %v3176_v19  ;;  %v3898_v31 = vsel %vm2770_vm11, %v3176_v19, 0.0  ;;  %v3960_v40 = vmul.f32 %v3176_v19, %v3176_v19  ;;  %v3466_v57 = vpop.f32.mrb[9].mxu1 }
 0x1dd   : > { %v3999_v20 = vadd.f32 %v3998_v34, %v3997_v12  ;;  %3700 = vst.msk [vmem:[%s6593_s10 + $0x2c] sm:$0xf] %vm519_vm0, %v4709_v1  ;;  %v3899_v8 = vadd.f32 %v3898_v31, %v3897_v52  ;;  %v4130_v12 = vmul.f32 %v4851_v30, %v4851_v30  ;;  %v4855_v22 = vpop.f32.mrb[10].mxu1  ;;  %v4002_v53 = vsel %vm2770_vm11, %v3961_v0, 0.0 }
 0x1de   : > { %3698 = vst.msk [vmem:[%s6593_s10 + $0x24] sm:$0xf] %vm519_vm0, %v4707_v17  ;;  %v4000_v14 = vsel %vm2770_vm11, %v3960_v40, 0.0  ;;  %v4740_v59 = vpack.c.bf16 %v4854_v9, %v4854_v9  ;;  %v3469_v56 = vpop.f32.mrb[11].mxu1  ;;  %v4004_v6 = vsel %vm2770_vm11, %v3962_v62, 0.0  ;;  %v4738_v3 = vpack.c.bf16 %v3466_v57, %v3466_v57 }
 0x1df   : > { %v3901_v13 = vadd.f32 %v3900_v7, %v3899_v8  ;;  %v4001_v58 = vadd.f32 %v4000_v14, %v3999_v20  ;;  %v4168_v46 = vsel %vm2770_vm11, %v4130_v12, 0.0  ;;  %v4068_v26 = vsel %vm2770_vm11, %v3466_v57, 0.0  ;;  %v4858_v30 = vpop.f32.mrb[12].mxu1 }
 0x1e0   : > { %3859 = vst.msk [vmem:[%s6647_s14 + $0x28] sm:$0xf] %vm519_vm0, %v4740_v59  ;;  %v4131_v24 = vmul.f32 %v3466_v57, %v3466_v57  ;;  %v4741_v55 = vpack.c.bf16 %v4855_v22, %v4855_v22  ;;  %v4133_v25 = vmul.f32 %v4854_v9, %v4854_v9  ;;  %3857 = vst.msk [vmem:[%s6647_s14 + $0x20] sm:$0xf] %vm519_vm0, %v4738_v3  ;;  %v4070_v4 = vsel %vm2770_vm11, %v3469_v56, 0.0  ;;  %v3482_v54 = vpop.f32.mrb[13].mxu1 }
 0x1e1   : > { %v6691_v35 = vadd.f32 %v3902_v10, %v3901_v13  ;;  %v4003_v2 = vadd.f32 %v4002_v53, %v4001_v58  ;;  %v4739_v44 = vpack.c.bf16 %v3469_v56, %v3469_v56  ;;  %v4132_v23 = vmul.f32 %v3469_v56, %v3469_v56  ;;  %v4859_v11 = vpop.f32.mrb[14].mxu1 }
 0x1e2   : > { %v4170_v21 = vsel %vm2770_vm11, %v4131_v24, 0.0  ;;  %3860 = vst.msk [vmem:[%s6647_s14 + $0x2c] sm:$0xf] %vm519_vm0, %v4741_v55  ;;  %v4069_v29 = vadd.f32 %v4068_v26, %v4067_v39  ;;  %v4169_v43 = vadd.f32 %v4168_v46, %v4167_v51  ;;  %v4744_v37 = vpack.c.bf16 %v4858_v30, %v4858_v30  ;;  %v3485_v7 = vpop.f32.mrb[15].mxu1 }
 0x1e3   : > { %v6701_v33 = vadd.f32 %v4004_v6, %v4003_v2  ;;  %v4072_v36 = vsel %vm2770_vm11, %v4854_v9, 0.0  ;;  %v4134_v47 = vmul.f32 %v4855_v22, %v4855_v22  ;;  %3858 = vst.msk [vmem:[%s6647_s14 + $0x24] sm:$0xf] %vm519_vm0, %v4739_v44  ;;  %v4172_v42 = vsel %vm2770_vm11, %v4132_v23, 0.0 }
 0x1e4   : > { %v4742_v48 = vpack.c.bf16 %v3482_v54, %v3482_v54  ;;  %v4171_v61 = vadd.f32 %v4170_v21, %v4169_v43  ;;  %v4071_v60 = vadd.f32 %v4070_v4, %v4069_v29  ;;  %3863 = vst.msk [vmem:[%s6647_s14 + $0x38] sm:$0xf] %vm519_vm0, %v4744_v37  ;;  %v4174_v0 = vsel %vm2770_vm11, %v4133_v25, 0.0 }
 0x1e5   : > { %v4074_v52 = vsel %vm2770_vm11, %v4855_v22, 0.0  ;;  %v4135_v1 = vmul.f32 %v3482_v54, %v3482_v54  ;;  %v4745_v19 = vpack.c.bf16 %v4859_v11, %v4859_v11  ;;  %v4743_v31 = vpack.c.bf16 %v3485_v7, %v3485_v7 }
 0x1e6   : > { %3861 = vst.msk [vmem:[%s6647_s14 + $0x30] sm:$0xf] %vm519_vm0, %v4742_v48  ;;  %v4073_v34 = vadd.f32 %v4072_v36, %v4071_v60  ;;  %v4173_v17 = vadd.f32 %v4172_v42, %v4171_v61  ;;  %v4176_v28 = vsel %vm2770_vm11, %v4134_v47, 0.0  ;;  %v4076_v20 = vsel %vm2770_vm11, %v3482_v54, 0.0  ;;  %v4862_v18 = vpop.f32.mrb[16].mxu1 }
 0x1e7   : > { %3864 = vst.msk [vmem:[%s6647_s14 + $0x3c] sm:$0xf] %vm519_vm0, %v4745_v19  ;;  %v4136_v8 = vmul.f32 %v3485_v7, %v3485_v7  ;;  %3862 = vst.msk [vmem:[%s6647_s14 + $0x34] sm:$0xf] %vm519_vm0, %v4743_v31  ;;  %v4137_v10 = vmul.f32 %v4858_v30, %v4858_v30  ;;  %v4178_v62 = vsel %vm2770_vm11, %v4135_v1, 0.0  ;;  %v4078_v45 = vsel %vm2770_vm11, %v3485_v7, 0.0 }
 0x1e8   : > { %v4175_v40 = vadd.f32 %v4174_v0, %v4173_v17  ;;  %v4075_v38 = vadd.f32 %v4074_v52, %v4073_v34  ;;  %v4138_v14 = vmul.f32 %v4859_v11, %v4859_v11  ;;  %v4748_v16 = vpack.c.bf16 %v4862_v18, %v4862_v18  ;;  %v3498_v12 = vpop.f32.mrb[17].mxu1 }
 0x1e9   : > { %v4080_v57 = vsel %vm2770_vm11, %v4858_v30, 0.0  ;;  %v4180_v58 = vsel %vm2770_vm11, %v4136_v8, 0.0  ;;  %v4746_v63 = vpack.c.bf16 %v3498_v12, %v3498_v12  ;;  %v4863_v27 = vpop.f32.mrb[18].mxu1  ;;  %v4182_v59 = vsel %vm2770_vm11, %v4137_v10, 0.0 }
 0x1ea   : > { %v4077_v9 = vadd.f32 %v4076_v20, %v4075_v38  ;;  %v4177_v13 = vadd.f32 %v4176_v28, %v4175_v40  ;;  %3867 = vst.msk [vmem:[%s6647_s14 + $0x48] sm:$0xf] %vm519_vm0, %v4748_v16  ;;  %v4749_v53 = vpack.c.bf16 %v4863_v27, %v4863_v27  ;;  %v3501_v5 = vpop.f32.mrb[19].mxu1  ;;  %v4082_v56 = vsel %vm2770_vm11, %v4859_v11, 0.0 }
 0x1eb   : > { %3865 = vst.msk [vmem:[%s6647_s14 + $0x40] sm:$0xf] %vm519_vm0, %v4746_v63  ;;  %v4139_v6 = vmul.f32 %v3498_v12, %v3498_v12  ;;  %v4747_v2 = vpack.c.bf16 %v3501_v5, %v3501_v5  ;;  %v4184_v32 = vsel %vm2770_vm11, %v4138_v14, 0.0  ;;  %v4141_v50 = vmul.f32 %v4862_v18, %v4862_v18 }
 0x1ec   : > { %v4179_v41 = vadd.f32 %v4178_v62, %v4177_v13  ;;  %v4079_v22 = vadd.f32 %v4078_v45, %v4077_v9  ;;  %3868 = vst.msk [vmem:[%s6647_s14 + $0x4c] sm:$0xf] %vm519_vm0, %v4749_v53  ;;  %v4084_v15 = vsel %vm2770_vm11, %v3498_v12, 0.0  ;;  %v4142_v3 = vmul.f32 %v4863_v27, %v4863_v27 }
 0x1ed   : > { %3866 = vst.msk [vmem:[%s6647_s14 + $0x44] sm:$0xf] %vm519_vm0, %v4747_v2  ;;  %v4140_v26 = vmul.f32 %v3501_v5, %v3501_v5  ;;  %v4088_v51 = vsel %vm2770_vm11, %v4862_v18, 0.0  ;;  %v4186_v25 = vsel %vm2770_vm11, %v4139_v6, 0.0  ;;  %v4090_v39 = vsel %vm2770_vm11, %v4863_v27, 0.0 }
 0x1ee   : > { %v4081_v49 = vadd.f32 %v4080_v57, %v4079_v22  ;;  %v4181_v46 = vadd.f32 %v4180_v58, %v4179_v41  ;;  %v4866_v21 = vpop.f32.mrb[20].mxu1  ;;  %v4086_v23 = vsel %vm2770_vm11, %v3501_v5, 0.0  ;;  %v4190_v37 = vsel %vm2770_vm11, %v4141_v50, 0.0 }
 0x1ef   : > { %v4752_v30 = vpack.c.bf16 %v4866_v21, %v4866_v21  ;;  %v3514_v29 = vpop.f32.mrb[21].mxu1  ;;  %v4192_v54 = vsel %vm2770_vm11, %v4142_v3, 0.0  ;;  %v4188_v36 = vsel %vm2770_vm11, %v4140_v26, 0.0  ;;  %v4096_v7 = vsel %vm2770_vm11, %v4866_v21, 0.0 }
 0x1f0   : > { %v4183_v24 = vadd.f32 %v4182_v59, %v4181_v46  ;;  %v4083_v55 = vadd.f32 %v4082_v56, %v4081_v49  ;;  %v4750_v47 = vpack.c.bf16 %v3514_v29, %v3514_v29  ;;  %v4867_v42 = vpop.f32.mrb[22].mxu1  ;;  %v4145_v8 = vmul.f32 %v4866_v21, %v4866_v21 }
 0x1f1   : > { %3871 = vst.msk [vmem:[%s6647_s14 + $0x58] sm:$0xf] %vm519_vm0, %v4752_v30  ;;  %v3517_v0 = vpop.f32.mrb[23].mxu1  ;;  %v4092_v40 = vsel %vm2770_vm11, %v3514_v29, 0.0  ;;  %v4143_v45 = vmul.f32 %v3514_v29, %v3514_v29 }
 0x1f2   : > { %v4085_v44 = vadd.f32 %v4084_v15, %v4083_v55  ;;  %v4185_v4 = vadd.f32 %v4184_v32, %v4183_v24  ;;  %3869 = vst.msk [vmem:[%s6647_s14 + $0x50] sm:$0xf] %vm519_vm0, %v4750_v47  ;;  %v4751_v49 = vpack.c.bf16 %v3517_v0, %v3517_v0  ;;  %v4094_v46 = vsel %vm2770_vm11, %v3517_v0, 0.0 }
 0x1f3   : > { %v4194_v56 = vsel %vm2770_vm11, %v4143_v45, 0.0  ;;  %v4144_v24 = vmul.f32 %v3517_v0, %v3517_v0  ;;  %v4098_v55 = vsel %vm2770_vm11, %v4867_v42, 0.0  ;;  %v4198_v30 = vsel %vm2770_vm11, %v4145_v8, 0.0 }
 0x1f4   : > { %v4187_v60 = vadd.f32 %v4186_v25, %v4185_v4  ;;  %v4087_v17 = vadd.f32 %v4086_v23, %v4085_v44  ;;  %3870 = vst.msk [vmem:[%s6647_s14 + $0x54] sm:$0xf] %vm519_vm0, %v4751_v49 }
 0x1f5   : > { %v4196_v4 = vsel %vm2770_vm11, %v4144_v24, 0.0 }
 0x1f6   : > { %v4089_v13 = vadd.f32 %v4088_v51, %v4087_v17  ;;  %v4189_v57 = vadd.f32 %v4188_v36, %v4187_v60  ;;  %v4870_v58 = vpop.f32.mrb[24].mxu1  ;;  %v4146_v51 = vmul.f32 %v4867_v42, %v4867_v42 }
 0x1f7   : > { %v3530_v22 = vpop.f32.mrb[25].mxu1 }
 0x1f8   : > { %v4824_v43 = vpop.f32.mrb[12].mxu0  ;;  %v4091_v41 = vadd.f32 %v4090_v39, %v4089_v13  ;;  %v4191_v59 = vadd.f32 %v4190_v37, %v4189_v57  ;;  %v4871_v6 = vpop.f32.mrb[26].mxu1  ;;  %v4756_v39 = vpack.c.bf16 %v4870_v58, %v4870_v58  ;;  %v4754_v23 = vpack.c.bf16 %v3530_v22, %v3530_v22 }
 0x1f9   : > { %v4712_v48 = vpack.c.bf16 %v4824_v43, %v4824_v43  ;;  %v3965_v11 = vmul.f32 %v4824_v43, %v4824_v43  ;;  %v3189_v61 = vpop.f32.mrb[13].mxu0  ;;  %v3908_v14 = vsel %vm2770_vm11, %v4824_v43, 0.0  ;;  %v3533_v50 = vpop.f32.mrb[27].mxu1  ;;  %v4147_v43 = vmul.f32 %v3530_v22, %v3530_v22 }
 0x1fa   : > { %v4710_v52 = vpack.c.bf16 %v3189_v61, %v3189_v61  ;;  %v3904_v1 = vsel %vm2770_vm11, %v3189_v61, 0.0  ;;  %v3963_v19 = vmul.f32 %v3189_v61, %v3189_v61  ;;  %v4825_v34 = vpop.f32.mrb[14].mxu0  ;;  %v4093_v32 = vadd.f32 %v4092_v40, %v4091_v41  ;;  %3875 = vst.msk [vmem:[%s6647_s14 + $0x68] sm:$0xf] %vm519_vm0, %v4756_v39  ;;  %3873 = vst.msk [vmem:[%s6647_s14 + $0x60] sm:$0xf] %vm519_vm0, %v4754_v23 }
 0x1fb   : > { %3703 = vst.msk [vmem:[%s6593_s10 + $0x38] sm:$0xf] %vm519_vm0, %v4712_v48  ;;  %v3905_v31 = vadd.f32 %v3904_v1, %v6691_v35  ;;  %v4713_v28 = vpack.c.bf16 %v4825_v34, %v4825_v34  ;;  %v3192_v20 = vpop.f32.mrb[15].mxu0  ;;  %v4010_v16 = vsel %vm2770_vm11, %v3965_v11, 0.0  ;;  %v3966_v12 = vmul.f32 %v4825_v34, %v4825_v34 }
 0x1fc   : > { %3701 = vst.msk [vmem:[%s6593_s10 + $0x30] sm:$0xf] %vm519_vm0, %v4710_v52  ;;  %v4006_v38 = vsel %vm2770_vm11, %v3963_v19, 0.0  ;;  %v4711_v10 = vpack.c.bf16 %v3192_v20, %v3192_v20  ;;  %v3906_v62 = vsel %vm2770_vm11, %v3192_v20, 0.0  ;;  %v3964_v35 = vmul.f32 %v3192_v20, %v3192_v20 }
 0x1fd   : > { %v4007_v18 = vadd.f32 %v4006_v38, %v6701_v33  ;;  %3704 = vst.msk [vmem:[%s6593_s10 + $0x3c] sm:$0xf] %vm519_vm0, %v4713_v28  ;;  %v3907_v9 = vadd.f32 %v3906_v62, %v3905_v31  ;;  %v4753_v33 = vpack.c.bf16 %v4867_v42, %v4867_v42  ;;  %v3910_v53 = vsel %vm2770_vm11, %v4825_v34, 0.0 }
 0x1fe   : > { %3702 = vst.msk [vmem:[%s6593_s10 + $0x34] sm:$0xf] %vm519_vm0, %v4711_v10  ;;  %v4008_v27 = vsel %vm2770_vm11, %v3964_v35, 0.0  ;;  %v4012_v15 = vsel %vm2770_vm11, %v3966_v12, 0.0  ;;  %v4193_v26 = vadd.f32 %v4192_v54, %v4191_v59  ;;  %v4095_v25 = vadd.f32 %v4094_v46, %v4093_v32  ;;  %v4874_v47 = vpop.f32.mrb[28].mxu1 }
 0x1ff   : > { %v3909_v63 = vadd.f32 %v3908_v14, %v3907_v9  ;;  %v4009_v5 = vadd.f32 %v4008_v27, %v4007_v18  ;;  %3872 = vst.msk [vmem:[%s6647_s14 + $0x5c] sm:$0xf] %vm519_vm0, %v4753_v33  ;;  %v4100_v54 = vsel %vm2770_vm11, %v3530_v22, 0.0  ;;  %v4757_v36 = vpack.c.bf16 %v4871_v6, %v4871_v6  ;;  %v3546_v61 = vpop.f32.mrb[29].mxu1 }
 0x200   : > { %v4195_v44 = vadd.f32 %v4194_v56, %v4193_v26  ;;  %v4097_v29 = vadd.f32 %v4096_v7, %v4095_v25  ;;  %v4200_v42 = vsel %vm2770_vm11, %v4146_v51, 0.0  ;;  %v4755_v11 = vpack.c.bf16 %v3533_v50, %v3533_v50  ;;  %v4875_v1 = vpop.f32.mrb[30].mxu1 }
 0x201   : > { %v6773_v2 = vadd.f32 %v3910_v53, %v3909_v63  ;;  %v4011_v3 = vadd.f32 %v4010_v16, %v4009_v5  ;;  %3876 = vst.msk [vmem:[%s6647_s14 + $0x6c] sm:$0xf] %vm519_vm0, %v4757_v36  ;;  %v4102_v7 = vsel %vm2770_vm11, %v3533_v50, 0.0  ;;  %v4148_v0 = vmul.f32 %v3533_v50, %v3533_v50  ;;  %v3549_v28 = vpop.f32.mrb[31].mxu1 }
 0x202   : > { %v4197_v37 = vadd.f32 %v4196_v4, %v4195_v44  ;;  %v4099_v48 = vadd.f32 %v4098_v55, %v4097_v29  ;;  %v4760_v52 = vpack.c.bf16 %v4874_v47, %v4874_v47  ;;  %v4149_v19 = vmul.f32 %v4870_v58, %v4870_v58  ;;  %3874 = vst.msk [vmem:[%s6647_s14 + $0x64] sm:$0xf] %vm519_vm0, %v4755_v11 }
 0x203   : > { %v6782_v21 = vadd.f32 %v4012_v15, %v4011_v3  ;;  %v4202_v17 = vsel %vm2770_vm11, %v4147_v43, 0.0  ;;  %v4758_v31 = vpack.c.bf16 %v3546_v61, %v3546_v61  ;;  %v4104_v20 = vsel %vm2770_vm11, %v4870_v58, 0.0 }
 0x204   : > { %v4199_v60 = vadd.f32 %v4198_v30, %v4197_v37  ;;  %v4101_v34 = vadd.f32 %v4100_v54, %v4099_v48  ;;  %3879 = vst.msk [vmem:[%s6647_s14 + $0x78] sm:$0xf] %vm519_vm0, %v4760_v52  ;;  %v4150_v40 = vmul.f32 %v4871_v6, %v4871_v6  ;;  %v4204_v10 = vsel %vm2770_vm11, %v4148_v0, 0.0 }
 0x205   : > { %3877 = vst.msk [vmem:[%s6647_s14 + $0x70] sm:$0xf] %vm519_vm0, %v4758_v31  ;;  %v4761_v62 = vpack.c.bf16 %v4875_v1, %v4875_v1  ;;  %v4106_v18 = vsel %vm2770_vm11, %v4871_v6, 0.0  ;;  %v4759_v9 = vpack.c.bf16 %v3549_v28, %v3549_v28  ;;  %v4206_v35 = vsel %vm2770_vm11, %v4149_v19, 0.0 }
 0x206   : > { %v4201_v8 = vadd.f32 %v4200_v42, %v4199_v60  ;;  %v4103_v38 = vadd.f32 %v4102_v7, %v4101_v34  ;;  %v4151_v14 = vmul.f32 %v3546_v61, %v3546_v61  ;;  %v4108_v12 = vsel %vm2770_vm11, %v3546_v61, 0.0 }
 0x207   : > { %3880 = vst.msk [vmem:[%s6647_s14 + $0x7c] sm:$0xf] %vm519_vm0, %v4761_v62  ;;  %3878 = vst.msk [vmem:[%s6647_s14 + $0x74] sm:$0xf] %vm519_vm0, %v4759_v9  ;;  %v4208_v57 = vsel %vm2770_vm11, %v4150_v40, 0.0  ;;  %v4152_v63 = vmul.f32 %v3549_v28, %v3549_v28  ;;  %v4110_v41 = vsel %vm2770_vm11, %v3549_v28, 0.0  ;;  %v4153_v33 = vmul.f32 %v4874_v47, %v4874_v47 }
 0x208   : > { %v4203_v45 = vadd.f32 %v4202_v17, %v4201_v8  ;;  %v4105_v13 = vadd.f32 %v4104_v20, %v4103_v38  ;;  %v4210_v53 = vsel %vm2770_vm11, %v4151_v14, 0.0  ;;  %v4112_v5 = vsel %vm2770_vm11, %v4874_v47, 0.0 }
 0x209   : > { %v4154_v56 = vmul.f32 %v4875_v1, %v4875_v1  ;;  %v4212_v32 = vsel %vm2770_vm11, %v4152_v63, 0.0  ;;  %v4114_v46 = vsel %vm2770_vm11, %v4875_v1, 0.0  ;;  %v4214_v50 = vsel %vm2770_vm11, %v4153_v33, 0.0 }
 0x20a   : > { %v4205_v16 = vadd.f32 %v4204_v10, %v4203_v45  ;;  %v4107_v58 = vadd.f32 %v4106_v18, %v4105_v13 }
 0x20b   : > { %v4216_v26 = vsel %vm2770_vm11, %v4154_v56, 0.0 }
 0x20c   : > { %v4207_v27 = vadd.f32 %v4206_v35, %v4205_v16  ;;  %v4109_v22 = vadd.f32 %v4108_v12, %v4107_v58 }
 0x20e   : > { %v4209_v59 = vadd.f32 %v4208_v57, %v4207_v27  ;;  %v4111_v6 = vadd.f32 %v4110_v41, %v4109_v22 }
 0x210   : > { %v4211_v49 = vadd.f32 %v4210_v53, %v4209_v59  ;;  %v4113_v15 = vadd.f32 %v4112_v5, %v4111_v6 }
 0x212   : > { %v4213_v3 = vadd.f32 %v4212_v32, %v4211_v49  ;;  %v4115_v24 = vadd.f32 %v4114_v46, %v4113_v15 }
 0x214   : > { %v4215_v51 = vadd.f32 %v4214_v50, %v4213_v3  ;;  %v4116_v44 = vrot.slane %v4115_v24, 4 }
 0x216   : > { %v4217_v43 = vadd.f32 %v4216_v26, %v4215_v51  ;;  %v4117_v0 = vadd.f32 %v4116_v44, %v4115_v24 }
 0x218   : > { %v4828_v55 = vpop.f32.mrb[16].mxu0  ;;  %v4218_v52 = vrot.slane %v4217_v43, 4  ;;  %v4118_v17 = vrot.slane %v4117_v0, 2 }
 0x219   : > { %v4716_v25 = vpack.c.bf16 %v4828_v55, %v4828_v55  ;;  %v3205_v39 = vpop.f32.mrb[17].mxu0  ;;  %v3969_v47 = vmul.f32 %v4828_v55, %v4828_v55 }
 0x21a   : > { %v4714_v4 = vpack.c.bf16 %v3205_v39, %v3205_v39  ;;  %v3912_v23 = vsel %vm2770_vm11, %v3205_v39, 0.0  ;;  %v3967_v30 = vmul.f32 %v3205_v39, %v3205_v39  ;;  %v4829_v29 = vpop.f32.mrb[18].mxu0  ;;  %v4119_v40 = vadd.f32 %v4118_v17, %v4117_v0 }
 0x21b   : > { %3707 = vst.msk [vmem:[%s6593_s10 + $0x48] sm:$0xf] %vm519_vm0, %v4716_v25  ;;  %v3913_v37 = vadd.f32 %v3912_v23, %v6773_v2  ;;  %v4717_v54 = vpack.c.bf16 %v4829_v29, %v4829_v29  ;;  %v3208_v36 = vpop.f32.mrb[19].mxu0  ;;  %v3916_v2 = vsel %vm2770_vm11, %v4828_v55, 0.0  ;;  %v3970_v1 = vmul.f32 %v4829_v29, %v4829_v29 }
 0x21c   : > { %3705 = vst.msk [vmem:[%s6593_s10 + $0x40] sm:$0xf] %vm519_vm0, %v4714_v4  ;;  %v4014_v42 = vsel %vm2770_vm11, %v3967_v30, 0.0  ;;  %v4715_v48 = vpack.c.bf16 %v3208_v36, %v3208_v36  ;;  %v3914_v11 = vsel %vm2770_vm11, %v3208_v36, 0.0  ;;  %v3968_v7 = vmul.f32 %v3208_v36, %v3208_v36 }
 0x21d   : > { %v4015_v61 = vadd.f32 %v4014_v42, %v6782_v21  ;;  %3708 = vst.msk [vmem:[%s6593_s10 + $0x4c] sm:$0xf] %vm519_vm0, %v4717_v54  ;;  %v3915_v60 = vadd.f32 %v3914_v11, %v3913_v37  ;;  %v3918_v31 = vsel %vm2770_vm11, %v4829_v29, 0.0  ;;  %v4219_v21 = vadd.f32 %v4218_v52, %v4217_v43 }
 0x21e   : > { %3706 = vst.msk [vmem:[%s6593_s10 + $0x44] sm:$0xf] %vm519_vm0, %v4715_v48  ;;  %v4016_v34 = vsel %vm2770_vm11, %v3968_v7, 0.0  ;;  %v4018_v20 = vsel %vm2770_vm11, %v3969_v47, 0.0  ;;  %v4020_v62 = vsel %vm2770_vm11, %v3970_v1, 0.0  ;;  %v4120_v45 = vrot.slane %v4119_v40, 1 }
 0x21f   : > { %v3917_v19 = vadd.f32 %v3916_v2, %v3915_v60  ;;  %v4017_v28 = vadd.f32 %v4016_v34, %v4015_v61  ;;  %v4220_v10 = vrot.slane %v4219_v21, 2 }
 0x220   : > { %v4121_v35 = vadd.f32 %v4120_v45, %v4119_v40 }
 0x221   : > { %v3919_v8 = vadd.f32 %v3918_v31, %v3917_v19  ;;  %v4019_v38 = vadd.f32 %v4018_v20, %v4017_v28  ;;  %v4221_v9 = vadd.f32 %v4220_v10, %v4219_v21 }
 0x222   : > { %4122 = vst.msk [vmem:[%s6841_s18 + $0x2] sm:$0x1] %vm6923_vm1, %v4121_v35 }
 0x223   : > { %v4021_v18 = vadd.f32 %v4020_v62, %v4019_v38  ;;  %v4222_v13 = vrot.slane %v4221_v9, 1 }
 0x225   : > { %v4223_v14 = vadd.f32 %v4222_v13, %v4221_v9 }
 0x227   : > { %4224 = vst.msk [vmem:[%s6841_s18 + $0x3] sm:$0x1] %vm6924_vm4, %v4223_v14 }
 0x238   : > { %v4832_v16 = vpop.f32.mrb[20].mxu0 }
 0x239   : > { %v4720_v12 = vpack.c.bf16 %v4832_v16, %v4832_v16  ;;  %v3221_v57 = vpop.f32.mrb[21].mxu0  ;;  %v3973_v6 = vmul.f32 %v4832_v16, %v4832_v16  ;;  %v3924_v50 = vsel %vm2770_vm11, %v4832_v16, 0.0 }
 0x23a   : > { %v4718_v58 = vpack.c.bf16 %v3221_v57, %v3221_v57  ;;  %v3920_v63 = vsel %vm2770_vm11, %v3221_v57, 0.0  ;;  %v3971_v27 = vmul.f32 %v3221_v57, %v3221_v57  ;;  %v4833_v41 = vpop.f32.mrb[22].mxu0 }
 0x23b   : > { %3711 = vst.msk [vmem:[%s6593_s10 + $0x58] sm:$0xf] %vm519_vm0, %v4720_v12  ;;  %v3921_v33 = vadd.f32 %v3920_v63, %v3919_v8  ;;  %v4721_v22 = vpack.c.bf16 %v4833_v41, %v4833_v41  ;;  %v3224_v53 = vpop.f32.mrb[23].mxu0  ;;  %v3974_v15 = vmul.f32 %v4833_v41, %v4833_v41  ;;  %v3926_v24 = vsel %vm2770_vm11, %v4833_v41, 0.0 }
 0x23c   : > { %3709 = vst.msk [vmem:[%s6593_s10 + $0x50] sm:$0xf] %vm519_vm0, %v4718_v58  ;;  %v4022_v5 = vsel %vm2770_vm11, %v3971_v27, 0.0  ;;  %v4719_v59 = vpack.c.bf16 %v3224_v53, %v3224_v53  ;;  %v3922_v56 = vsel %vm2770_vm11, %v3224_v53, 0.0  ;;  %v3972_v46 = vmul.f32 %v3224_v53, %v3224_v53 }
 0x23d   : > { %v4023_v32 = vadd.f32 %v4022_v5, %v4021_v18  ;;  %3712 = vst.msk [vmem:[%s6593_s10 + $0x5c] sm:$0xf] %vm519_vm0, %v4721_v22  ;;  %v3923_v49 = vadd.f32 %v3922_v56, %v3921_v33  ;;  %v4026_v51 = vsel %vm2770_vm11, %v3973_v6, 0.0  ;;  %v4028_v44 = vsel %vm2770_vm11, %v3974_v15, 0.0 }
 0x23e   : > { %3710 = vst.msk [vmem:[%s6593_s10 + $0x54] sm:$0xf] %vm519_vm0, %v4719_v59  ;;  %v4024_v26 = vsel %vm2770_vm11, %v3972_v46, 0.0 }
 0x23f   : > { %v3925_v3 = vadd.f32 %v3924_v50, %v3923_v49  ;;  %v4025_v55 = vadd.f32 %v4024_v26, %v4023_v32 }
 0x241   : > { %v3927_v25 = vadd.f32 %v3926_v24, %v3925_v3  ;;  %v4027_v39 = vadd.f32 %v4026_v51, %v4025_v55 }
 0x243   : > { %v4029_v4 = vadd.f32 %v4028_v44, %v4027_v39 }
 0x258   : > { %v4836_v23 = vpop.f32.mrb[24].mxu0 }
 0x259   : > { %v4724_v30 = vpack.c.bf16 %v4836_v23, %v4836_v23  ;;  %v3237_v29 = vpop.f32.mrb[25].mxu0  ;;  %v3977_v7 = vmul.f32 %v4836_v23, %v4836_v23  ;;  %v3932_v1 = vsel %vm2770_vm11, %v4836_v23, 0.0 }
 0x25a   : > { %v4722_v43 = vpack.c.bf16 %v3237_v29, %v3237_v29  ;;  %v3928_v37 = vsel %vm2770_vm11, %v3237_v29, 0.0  ;;  %v3975_v54 = vmul.f32 %v3237_v29, %v3237_v29  ;;  %v4837_v36 = vpop.f32.mrb[26].mxu0 }
 0x25b   : > { %3715 = vst.msk [vmem:[%s6593_s10 + $0x68] sm:$0xf] %vm519_vm0, %v4724_v30  ;;  %v3929_v47 = vadd.f32 %v3928_v37, %v3927_v25  ;;  %v4725_v42 = vpack.c.bf16 %v4837_v36, %v4837_v36  ;;  %v3240_v48 = vpop.f32.mrb[27].mxu0  ;;  %v3978_v19 = vmul.f32 %v4837_v36, %v4837_v36  ;;  %v3934_v31 = vsel %vm2770_vm11, %v4837_v36, 0.0 }
 0x25c   : > { %3713 = vst.msk [vmem:[%s6593_s10 + $0x60] sm:$0xf] %vm519_vm0, %v4722_v43  ;;  %v4030_v11 = vsel %vm2770_vm11, %v3975_v54, 0.0  ;;  %v4723_v61 = vpack.c.bf16 %v3240_v48, %v3240_v48  ;;  %v3930_v60 = vsel %vm2770_vm11, %v3240_v48, 0.0  ;;  %v3976_v52 = vmul.f32 %v3240_v48, %v3240_v48 }
 0x25d   : > { %v4031_v0 = vadd.f32 %v4030_v11, %v4029_v4  ;;  %3716 = vst.msk [vmem:[%s6593_s10 + $0x6c] sm:$0xf] %vm519_vm0, %v4725_v42  ;;  %v3931_v2 = vadd.f32 %v3930_v60, %v3929_v47  ;;  %v4034_v21 = vsel %vm2770_vm11, %v3977_v7, 0.0  ;;  %v4036_v40 = vsel %vm2770_vm11, %v3978_v19, 0.0 }
 0x25e   : > { %3714 = vst.msk [vmem:[%s6593_s10 + $0x64] sm:$0xf] %vm519_vm0, %v4723_v61  ;;  %v4032_v17 = vsel %vm2770_vm11, %v3976_v52, 0.0 }
 0x25f   : > { %v3933_v34 = vadd.f32 %v3932_v1, %v3931_v2  ;;  %v4033_v28 = vadd.f32 %v4032_v17, %v4031_v0 }
 0x261   : > { %v3935_v20 = vadd.f32 %v3934_v31, %v3933_v34  ;;  %v4035_v8 = vadd.f32 %v4034_v21, %v4033_v28 }
 0x263   : > { %v4037_v38 = vadd.f32 %v4036_v40, %v4035_v8 }
 0x276   : > { %v4840_v10 = vpop.f32.mrb[28].mxu0 }
 0x277   : > { %v4728_v62 = vpack.c.bf16 %v4840_v10, %v4840_v10  ;;  %v3253_v45 = vpop.f32.mrb[29].mxu0  ;;  %v3981_v27 = vmul.f32 %v4840_v10, %v4840_v10  ;;  %v3940_v53 = vsel %vm2770_vm11, %v4840_v10, 0.0 }
 0x278   : > { %v4726_v18 = vpack.c.bf16 %v3253_v45, %v3253_v45  ;;  %v3936_v9 = vsel %vm2770_vm11, %v3253_v45, 0.0  ;;  %v3979_v35 = vmul.f32 %v3253_v45, %v3253_v45  ;;  %v4841_v13 = vpop.f32.mrb[30].mxu0 }
 0x279   : > { %3719 = vst.msk [vmem:[%s6593_s10 + $0x78] sm:$0xf] %vm519_vm0, %v4728_v62  ;;  %v3937_v14 = vadd.f32 %v3936_v9, %v3935_v20  ;;  %v4729_v16 = vpack.c.bf16 %v4841_v13, %v4841_v13  ;;  %v3256_v12 = vpop.f32.mrb[31].mxu0  ;;  %v3982_v5 = vmul.f32 %v4841_v13, %v4841_v13  ;;  %v3942_v6 = vsel %vm2770_vm11, %v4841_v13, 0.0 }
 0x27a   : > { %3717 = vst.msk [vmem:[%s6593_s10 + $0x70] sm:$0xf] %vm519_vm0, %v4726_v18  ;;  %v4038_v57 = vsel %vm2770_vm11, %v3979_v35, 0.0  ;;  %v4727_v58 = vpack.c.bf16 %v3256_v12, %v3256_v12  ;;  %v3938_v63 = vsel %vm2770_vm11, %v3256_v12, 0.0  ;;  %v3980_v22 = vmul.f32 %v3256_v12, %v3256_v12 }
 0x27b   : > { %v4039_v41 = vadd.f32 %v4038_v57, %v4037_v38  ;;  %3720 = vst.msk [vmem:[%s6593_s10 + $0x7c] sm:$0xf] %vm519_vm0, %v4729_v16  ;;  %v3939_v33 = vadd.f32 %v3938_v63, %v3937_v14  ;;  %v4042_v49 = vsel %vm2770_vm11, %v3981_v27, 0.0  ;;  %v4044_v15 = vsel %vm2770_vm11, %v3982_v5, 0.0 }
 0x27c   : > { %3718 = vst.msk [vmem:[%s6593_s10 + $0x74] sm:$0xf] %vm519_vm0, %v4727_v58  ;;  %v4040_v56 = vsel %vm2770_vm11, %v3980_v22, 0.0  ;;  %vm6925_vm0 = vmmov %vm6923_vm1 }
 0x27d   : > { %v3941_v59 = vadd.f32 %v3940_v53, %v3939_v33  ;;  %v4041_v32 = vadd.f32 %v4040_v56, %v4039_v41  ;;  %vm6926_vm6 = vmmov %vm6925_vm0 }
 0x27f   : > { %v3943_v46 = vadd.f32 %v3942_v6, %v3941_v59  ;;  %v4043_v50 = vadd.f32 %v4042_v49, %v4041_v32 }
 0x281   : > { %v3944_v3 = vrot.slane %v3943_v46, 4  ;;  %v4045_v26 = vadd.f32 %v4044_v15, %v4043_v50 }
 0x283   : > { %v3945_v24 = vadd.f32 %v3944_v3, %v3943_v46  ;;  %v4046_v55 = vrot.slane %v4045_v26, 4 }
 0x285   : > { %v3946_v51 = vrot.slane %v3945_v24, 2  ;;  %v4047_v25 = vadd.f32 %v4046_v55, %v4045_v26 }
 0x287   : > { %v3947_v39 = vadd.f32 %v3946_v51, %v3945_v24  ;;  %v4048_v44 = vrot.slane %v4047_v25, 2 }
 0x289   : > { %v3948_v4 = vrot.slane %v3947_v39, 1  ;;  %v4049_v23 = vadd.f32 %v4048_v44, %v4047_v25 }
 0x28b   : > { %v3949_v30 = vadd.f32 %v3948_v4, %v3947_v39  ;;  %v4050_v29 = vrot.slane %v4049_v23, 1 }
 0x28d   : > { %3950 = vst.msk [vmem:[%s6841_s18] sm:$0x1] %vm6925_vm0, %v3949_v30  ;;  %v4051_v43 = vadd.f32 %v4050_v29, %v4049_v23 }
 0x28f   : > { %4052 = vst.msk [vmem:[%s6841_s18 + $0x1] sm:$0x1] %vm6926_vm6, %v4051_v43 }
 0x290 PF: > { %s18_s2 = sadd.s32 1, %s5108_s2   ;;  %s6927_s24 = smov %s5104_s1 }
 0x291   : > { %p15_p6 = scmp.ge.s32.totalorder %s18_s2, 4   ;;  %s6928_s1 = smov %s6930_s25 }
 0x293   :  { %17 = sbr.rel (!%p15_p6) target bundleno = 2 (0x2), region = 103 }

</bundles_post_ra>
